<compile_context>
chip_gen: v7x
topology: tpu7x:2x2x1
jax: 0.10.0
libtpu: 0.0.40
codegen_flags: <defaults>
</compile_context>

<pallas_src>
import functools
import numpy as np
import jax
import jax.numpy as jnp
from jax import lax
from jax.experimental import pallas as pl
from jax.experimental.pallas import tpu as pltpu

CHANNELS = 64
PE_DIM = 8
NODE_DIM = CHANNELS - PE_DIM
NUM_LAYERS = 10
HEADS = 4
HEAD_DIM = CHANNELS // HEADS
PE_IN = 20
NUM_NODE_TYPES = 28
NUM_EDGE_TYPES = 4
BN_EPS = 1e-5
ATTN_SCALE = 1.0 / float(np.sqrt(HEAD_DIM))

_VMEM = pl.BlockSpec(memory_space=pltpu.MemorySpace.VMEM)


def _round_up(n, m):
    return max(m, ((n + m - 1) // m) * m)


def _dot(a, b):
    return jnp.dot(a, b, preferred_element_type=jnp.float32)


def _dot_nt(a, b):  # a @ b.T without materializing the transpose
    return lax.dot_general(a, b, (((1,), (1,)), ((), ())),
                           preferred_element_type=jnp.float32)


# --------------------------- stem kernel (1 call) ----------------------------
# node_emb lookup + (pe_norm folded into pe_lin) + concat, plus edge_emb lookup,
# all as one-hot matmuls so no JAX-side gathers remain.

def _stem_kernel(noh_ref, ntab_ref, pe_ref, pw_ref, pb_ref, eoh_ref, etab_ref,
                 x0_ref, e_ref):
    x0_ref[:, :NODE_DIM] = _dot(noh_ref[...], ntab_ref[...])               # node_emb(x)
    x0_ref[:, NODE_DIM:] = _dot(pe_ref[...], pw_ref[...]) + pb_ref[...]    # pe_lin(pe_norm(pe))
    e_ref[...] = _dot(eoh_ref[...], etab_ref[...])                         # edge_emb(edge_attr)


def stem(node_oh, node_tab, pe_pad, pe_w, pe_b, edge_oh, edge_tab):
    NP_ = node_oh.shape[0]
    EP_ = edge_oh.shape[0]
    return pl.pallas_call(
        _stem_kernel,
        out_shape=(jax.ShapeDtypeStruct((NP_, CHANNELS), jnp.float32),
                   jax.ShapeDtypeStruct((EP_, CHANNELS), jnp.float32)),
        in_specs=[_VMEM] * 7,
        out_specs=(_VMEM, _VMEM),
    )(node_oh, node_tab, pe_pad, pe_w, pe_b, edge_oh, edge_tab)


# ------------------- fused 10-layer GPSConv stack (1 call) -------------------

LAYER_PARAM_KEYS = ("gine_w1", "gine_b1", "gine_w2", "gine_b2",
                    "attn_w_in", "attn_b_in", "attn_w_out", "attn_b_out",
                    "mlp_w1", "mlp_b1", "mlp_w2", "mlp_b2",
                    "bn1_scale", "bn1_shift", "bn2_scale", "bn2_shift",
                    "bn3_scale", "bn3_shift")


def _gps_stack_kernel(B, SP,
                      x0_ref, e_ref, asrc_ref, adst_ref, scat_ref, gath_ref,
                      bias_ref,
                      gw1_ref, gb1_ref, gw2_ref, gb2_ref,
                      wi_ref, bi_ref, wo_ref, bo_ref,
                      mw1_ref, mb1_ref, mw2_ref, mb2_ref,
                      bn1s_ref, bn1t_ref, bn2s_ref, bn2t_ref,
                      bn3s_ref, bn3t_ref,
                      x_ref, attn_scr):
    C = CHANNELS

    # layer 0: initialize the VMEM-resident accumulator with the stem output.
    @pl.when(pl.program_id(0) == 0)
    def _():
        x_ref[...] = x0_ref[...]

    x = x_ref[...]

    # ---- local MPNN: GINEConv(nn=Linear->ReLU->Linear), eps=0, sum aggregation ----
    x_j = _dot(asrc_ref[...], x)                       # gather x[edge_src] (one-hot matmul)
    msg = jnp.maximum(x_j + e_ref[...], 0.0)           # relu(x_j + edge_attr)
    agg = _dot(adst_ref[...], msg)                     # scatter-add to destination nodes
    h = jnp.maximum(_dot(agg + x, gw1_ref[...]) + gb1_ref[...], 0.0)
    h = _dot(h, gw2_ref[...]) + gb2_ref[...]
    h_local = (h + x) * bn1s_ref[...] + bn1t_ref[...]  # residual + BN1 (eval affine)

    # ---- global multi-head self-attention over to_dense_batch(x, batch) ----
    dense = _dot(scat_ref[...], x)                     # [B*SP, C]  dense batch (padded)
    qkv = _dot(dense, wi_ref[...]) + bi_ref[...]       # fused in-projection [B*SP, 3C]
    for b in range(B):                                 # unrolled; tiny, layout-friendly 2-D ops
        r0 = b * SP
        bias_b = bias_ref[b:b + 1, :]                  # [1, SP] additive key-padding mask
        for hh in range(HEADS):
            c0 = hh * HEAD_DIM
            q = qkv[r0:r0 + SP, c0:c0 + HEAD_DIM]
            k = qkv[r0:r0 + SP, C + c0:C + c0 + HEAD_DIM]
            v = qkv[r0:r0 + SP, 2 * C + c0:2 * C + c0 + HEAD_DIM]
            s = _dot_nt(q, k) * ATTN_SCALE + bias_b
            s = s - jnp.max(s, axis=-1, keepdims=True)
            p = jnp.exp(s)
            p = p * pl.reciprocal(jnp.sum(p, axis=-1, keepdims=True), approx=True)
            attn_scr[r0:r0 + SP, c0:c0 + HEAD_DIM] = _dot(p, v)
    attn_nodes = _dot(gath_ref[...], attn_scr[...])              # h_dense[mask] gather
    h_attn = _dot(attn_nodes, wo_ref[...]) + bo_ref[...]         # out-projection
    h_attn = (h_attn + x) * bn2s_ref[...] + bn2t_ref[...]        # residual + BN2

    # ---- combine + feed-forward MLP ----
    out = h_local + h_attn
    m = jnp.maximum(_dot(out, mw1_ref[...]) + mb1_ref[...], 0.0)
    m = _dot(m, mw2_ref[...]) + mb2_ref[...]
    x_ref[...] = (out + m) * bn3s_ref[...] + bn3t_ref[...]       # residual + BN3


def gps_layer_stack(x0, e_emb, layers, g):
    NP_, C = x0.shape
    EP_ = e_emb.shape[0]
    B, SP = g["B"], g["SP"]
    BS = B * SP

    graph_inputs = [x0, e_emb, g["a_src"], g["a_dst"], g["scatter"],
                    g["gather"], g["attn_bias"]]
    graph_specs = [pl.BlockSpec(tuple(a.shape), lambda l, nd=a.ndim: (0,) * nd)
                   for a in graph_inputs]
    weight_inputs = [layers[k] for k in LAYER_PARAM_KEYS]
    weight_specs = [pl.BlockSpec((None,) + tuple(w.shape[1:]), lambda l: (l, 0, 0))
                    for w in weight_inputs]

    flops = NUM_LAYERS * 2 * (
        EP_ * NP_ * C + NP_ * EP_ * C + 2 * NP_ * C * C
        + BS * NP_ * C + BS * C * 3 * C
        + B * HEADS * 2 * SP * SP * HEAD_DIM
        + NP_ * BS * C + NP_ * C * C + 2 * NP_ * C * 2 * C)
    bytes_accessed = 4 * (sum(int(np.prod(w.shape)) for w in weight_inputs)
                          + sum(int(np.prod(a.shape)) for a in graph_inputs)
                          + NP_ * C)

    return pl.pallas_call(
        functools.partial(_gps_stack_kernel, B, SP),
        out_shape=jax.ShapeDtypeStruct((NP_, C), jnp.float32),
        grid_spec=pltpu.PrefetchScalarGridSpec(
            num_scalar_prefetch=0,
            grid=(NUM_LAYERS,),
            in_specs=graph_specs + weight_specs,
            out_specs=pl.BlockSpec((NP_, C), lambda l: (0, 0)),   # resident accumulator
            scratch_shapes=[pltpu.VMEM((BS, C), jnp.float32)]),
        compiler_params=pltpu.CompilerParams(dimension_semantics=("arbitrary",)),
        cost_estimate=pl.CostEstimate(
            flops=flops,
            transcendentals=NUM_LAYERS * B * HEADS * SP * SP,
            bytes_accessed=bytes_accessed),
    )(*graph_inputs, *weight_inputs)


# ------------------ global_add_pool + head MLP (1 call) ----------------------

def _head_kernel(pool_ref, x_ref, w1_ref, b1_ref, w2_ref, b2_ref, w3_ref, b3_ref,
                 o_ref):
    pooled = _dot(pool_ref[...], x_ref[...])                     # global_add_pool
    h = jnp.maximum(_dot(pooled, w1_ref[...]) + b1_ref[...], 0.0)
    h = jnp.maximum(_dot(h, w2_ref[...]) + b2_ref[...], 0.0)
    o_ref[...] = _dot(h, w3_ref[...]) + b3_ref[...]


def pooled_head(pool_mat, x, p):
    B = pool_mat.shape[0]
    return pl.pallas_call(
        _head_kernel,
        out_shape=jax.ShapeDtypeStruct((B, 1), jnp.float32),
        in_specs=[_VMEM] * 8,
        out_specs=_VMEM,
    )(pool_mat, x, p["head_w1"], p["head_b1"], p["head_w2"], p["head_b2"],
      p["head_w3"], p["head_b3"])


# ------------------------------ model forward --------------------------------

def make_forward(g):
    def forward(params, node_oh, pe_pad, edge_oh):
        x0, e_emb = stem(node_oh, params["node_emb"], pe_pad,
                         params["pe_w"], params["pe_b"],
                         edge_oh, params["edge_emb"])
        x = gps_layer_stack(x0, e_emb, params["layers"], g)
        return pooled_head(g["pool_mat"], x, params)
    return forward


# ------------------------------ parameter init -------------------------------

def init_linear(key, fan_in, fan_out):
    kw, kb = jax.random.split(key)
    bound = 1.0 / np.sqrt(fan_in)
    w = jax.random.uniform(kw, (fan_in, fan_out), jnp.float32, -bound, bound)
    b = jax.random.uniform(kb, (1, fan_out), jnp.float32, -bound, bound)
    return w, b


def init_layer(key):
    ks = jax.random.split(key, 6)
    gw1, gb1 = init_linear(ks[0], CHANNELS, CHANNELS)
    gw2, gb2 = init_linear(ks[1], CHANNELS, CHANNELS)
    win, bin_ = init_linear(ks[2], CHANNELS, 3 * CHANNELS)
    wout, bout = init_linear(ks[3], CHANNELS, CHANNELS)
    mw1, mb1 = init_linear(ks[4], CHANNELS, 2 * CHANNELS)
    mw2, mb2 = init_linear(ks[5], 2 * CHANNELS, CHANNELS)
    bn_scale = jnp.full((1, CHANNELS), 1.0 / np.sqrt(1.0 + BN_EPS), jnp.float32)
    bn_shift = jnp.zeros((1, CHANNELS), jnp.float32)
    return dict(gine_w1=gw1, gine_b1=gb1, gine_w2=gw2, gine_b2=gb2,
                attn_w_in=win, attn_b_in=bin_, attn_w_out=wout, attn_b_out=bout,
                mlp_w1=mw1, mlp_b1=mb1, mlp_w2=mw2, mlp_b2=mb2,
                bn1_scale=bn_scale, bn1_shift=bn_shift,
                bn2_scale=bn_scale, bn2_shift=bn_shift,
                bn3_scale=bn_scale, bn3_shift=bn_shift)


if __name__ == "__main__":
    key = jax.random.PRNGKey(0)

    # small synthetic batch of 3 graphs
    graph_sizes = np.array([10, 8, 6])
    B = len(graph_sizes)
    N = int(graph_sizes.sum())
    S = int(graph_sizes.max())
    SP = _round_up(S, 8)                       # pad dense seq len (10 -> 16)
    batch = np.repeat(np.arange(B), graph_sizes)
    offsets = np.concatenate([[0], np.cumsum(graph_sizes)[:-1]])

    key, k_edges, k_x, k_pe, k_ea, k_params = jax.random.split(key, 6)

    # random within-graph edges (edge_index[0]=src, edge_index[1]=dst)
    srcs, dsts = [], []
    ek = k_edges
    for gi in range(B):
        n = int(graph_sizes[gi])
        ek, k1, k2 = jax.random.split(ek, 3)
        srcs.append(np.asarray(jax.random.randint(k1, (2 * n,), 0, n)) + offsets[gi])
        dsts.append(np.asarray(jax.random.randint(k2, (2 * n,), 0, n)) + offsets[gi])
    edge_src = np.concatenate(srcs).astype(np.int32)
    edge_dst = np.concatenate(dsts).astype(np.int32)
    E = edge_src.shape[0]

    NP = _round_up(N, 8)                       # padded node count
    EP = _round_up(E, 8)                       # padded edge count
    BS = B * SP

    x_idx = np.asarray(jax.random.randint(k_x, (N, 1), 0, NUM_NODE_TYPES))
    pe = np.asarray(jax.random.normal(k_pe, (N, PE_IN), dtype=jnp.float32))
    edge_attr_idx = np.asarray(jax.random.randint(k_ea, (E,), 0, NUM_EDGE_TYPES))

    # data-dependent lookups as one-hot matrices (padded rows are all-zero so
    # padding never leaks into real nodes/edges)
    node_oh = np.zeros((NP, NUM_NODE_TYPES), np.float32)
    node_oh[np.arange(N), x_idx[:, 0]] = 1.0
    edge_oh = np.zeros((EP, NUM_EDGE_TYPES), np.float32)
    edge_oh[np.arange(E), edge_attr_idx] = 1.0
    pe_pad = np.zeros((NP, PE_IN), np.float32)
    pe_pad[:N] = pe

    # static graph-structure matrices (gathers/scatters done in-kernel via MXU)
    a_src = np.zeros((EP, NP), np.float32)     # x_j = a_src @ x
    a_src[np.arange(E), edge_src] = 1.0
    a_dst = np.zeros((NP, EP), np.float32)     # scatter-add messages to dst nodes
    a_dst[edge_dst, np.arange(E)] = 1.0
    pos = np.arange(N) - offsets[batch]
    dense_slot = (batch * SP + pos).astype(np.int64)
    scatter = np.zeros((BS, NP), np.float32)   # to_dense_batch
    scatter[dense_slot, np.arange(N)] = 1.0
    gather = scatter.T.copy()                  # h_dense[mask]
    valid = np.arange(SP)[None, :] < graph_sizes[:, None]
    attn_bias = np.where(valid, 0.0, -1e30).astype(np.float32)     # [B, SP]
    pool_mat = np.zeros((B, NP), np.float32)   # global_add_pool
    pool_mat[batch, np.arange(N)] = 1.0

    g = dict(B=B, SP=SP,
             a_src=jnp.asarray(a_src), a_dst=jnp.asarray(a_dst),
             scatter=jnp.asarray(scatter), gather=jnp.asarray(gather),
             attn_bias=jnp.asarray(attn_bias), pool_mat=jnp.asarray(pool_mat))

    # deterministic parameters
    pk = jax.random.split(k_params, 6 + NUM_LAYERS)
    node_emb = jax.random.normal(pk[0], (NUM_NODE_TYPES, NODE_DIM), jnp.float32)
    edge_emb = jax.random.normal(pk[1], (NUM_EDGE_TYPES, CHANNELS), jnp.float32)
    pe_w, pe_b = init_linear(pk[2], PE_IN, PE_DIM)
    # fold eval-mode BatchNorm1d(20) (running mean=0, var=1, identity affine) into pe_lin
    pe_scale = jnp.full((PE_IN,), 1.0 / np.sqrt(1.0 + BN_EPS), jnp.float32)
    pe_shift = jnp.zeros((PE_IN,), jnp.float32)
    pe_w_folded = pe_scale[:, None] * pe_w
    pe_b_folded = pe_shift[None, :] @ pe_w + pe_b
    head_w1, head_b1 = init_linear(pk[3], CHANNELS, CHANNELS // 2)
    head_w2, head_b2 = init_linear(pk[4], CHANNELS // 2, CHANNELS // 4)
    head_w3, head_b3 = init_linear(pk[5], CHANNELS // 4, 1)
    layers = [init_layer(k) for k in pk[6:]]
    stacked_layers = jax.tree.map(lambda *a: jnp.stack(a), *layers)

    params = dict(node_emb=node_emb, edge_emb=edge_emb,
                  pe_w=pe_w_folded, pe_b=pe_b_folded,
                  layers=stacked_layers,
                  head_w1=head_w1, head_b1=head_b1,
                  head_w2=head_w2, head_b2=head_b2,
                  head_w3=head_w3, head_b3=head_b3)

    # TODO(synk): training-mode dropout / batch-statistics BatchNorm and the
    # 'performer' attention variant are not implemented (eval-mode 'multihead' only).
    # TODO(synk): the one-hot gather/scatter matrices are O(N*E); for non-toy graphs
    # switch to scalar-prefetched SMEM index lists (segment-sum) instead.

    forward = jax.jit(make_forward(g))
    out = forward(params, jnp.asarray(node_oh), jnp.asarray(pe_pad),
                  jnp.asarray(edge_oh))
    jax.block_until_ready(out)
    assert out.shape == (B, 1) and out.dtype == jnp.float32
    print("KERNEL_OK")
</pallas_src>

<mosaic_0001>
module attributes {stable_mosaic.version = 11 : i64} {
  func.func @_stem_kernel(%arg0: memref<24x28xf32, #tpu.memory_space<vmem>>, %arg1: memref<28x56xf32, #tpu.memory_space<vmem>>, %arg2: memref<24x20xf32, #tpu.memory_space<vmem>>, %arg3: memref<20x8xf32, #tpu.memory_space<vmem>>, %arg4: memref<1x8xf32, #tpu.memory_space<vmem>>, %arg5: memref<48x4xf32, #tpu.memory_space<vmem>>, %arg6: memref<4x64xf32, #tpu.memory_space<vmem>>, %arg7: memref<24x64xf32, #tpu.memory_space<vmem>>, %arg8: memref<48x64xf32, #tpu.memory_space<vmem>>) attributes {dimension_semantics = [], scalar_prefetch = 0 : i64, scratch_operands = 0 : i64, tpu.core_type = #tpu.core_type<tc>} {
    %c0 = arith.constant 0 : index
    %c0_0 = arith.constant 0 : index
    %0 = vector.load %arg0[%c0, %c0_0] : memref<24x28xf32, #tpu.memory_space<vmem>>, vector<24x28xf32>
    %c0_1 = arith.constant 0 : index
    %c0_2 = arith.constant 0 : index
    %1 = vector.load %arg1[%c0_1, %c0_2] : memref<28x56xf32, #tpu.memory_space<vmem>>, vector<28x56xf32>
    %cst = arith.constant dense<0.000000e+00> : vector<24x56xf32>
    %2 = tpu.matmul %0, %1, %cst {dimension_numbers = #tpu.dot_dimension_numbers<[1], [0], [0], [1], [0, 0, 1, 1], [], []>} : vector<24x28xf32>, vector<28x56xf32>, vector<24x56xf32> -> vector<24x56xf32>
    %c0_3 = arith.constant 0 : index
    %c0_4 = arith.constant 0 : index
    %3 = vector.load %arg7[%c0_3, %c0_4] : memref<24x64xf32, #tpu.memory_space<vmem>>, vector<24x56xf32>
    tpu.vector_store %arg7[%c0_3, %c0_4], %2 {strides = array<i32>} : memref<24x64xf32, #tpu.memory_space<vmem>>, vector<24x56xf32>,
    %c0_5 = arith.constant 0 : index
    %c0_6 = arith.constant 0 : index
    %4 = vector.load %arg2[%c0_5, %c0_6] : memref<24x20xf32, #tpu.memory_space<vmem>>, vector<24x20xf32>
    %c0_7 = arith.constant 0 : index
    %c0_8 = arith.constant 0 : index
    %5 = vector.load %arg3[%c0_7, %c0_8] : memref<20x8xf32, #tpu.memory_space<vmem>>, vector<20x8xf32>
    %cst_9 = arith.constant dense<0.000000e+00> : vector<24x8xf32>
    %6 = tpu.matmul %4, %5, %cst_9 {dimension_numbers = #tpu.dot_dimension_numbers<[1], [0], [0], [1], [0, 0, 1, 1], [], []>} : vector<24x20xf32>, vector<20x8xf32>, vector<24x8xf32> -> vector<24x8xf32>
    %c0_10 = arith.constant 0 : index
    %c0_11 = arith.constant 0 : index
    %7 = vector.load %arg4[%c0_10, %c0_11] : memref<1x8xf32, #tpu.memory_space<vmem>>, vector<1x8xf32>
    %8 = vector.broadcast %7 : vector<1x8xf32> to vector<24x8xf32>
    %9 = arith.addf %6, %8 : vector<24x8xf32>
    %c0_12 = arith.constant 0 : index
    %c56 = arith.constant 56 : index
    %10 = vector.load %arg7[%c0_12, %c56] : memref<24x64xf32, #tpu.memory_space<vmem>>, vector<24x8xf32>
    tpu.vector_store %arg7[%c0_12, %c56], %9 {strides = array<i32>} : memref<24x64xf32, #tpu.memory_space<vmem>>, vector<24x8xf32>,
    %c0_13 = arith.constant 0 : index
    %c0_14 = arith.constant 0 : index
    %11 = vector.load %arg5[%c0_13, %c0_14] : memref<48x4xf32, #tpu.memory_space<vmem>>, vector<48x4xf32>
    %c0_15 = arith.constant 0 : index
    %c0_16 = arith.constant 0 : index
    %12 = vector.load %arg6[%c0_15, %c0_16] : memref<4x64xf32, #tpu.memory_space<vmem>>, vector<4x64xf32>
    %cst_17 = arith.constant dense<0.000000e+00> : vector<48x64xf32>
    %13 = tpu.matmul %11, %12, %cst_17 {dimension_numbers = #tpu.dot_dimension_numbers<[1], [0], [0], [1], [0, 0, 1, 1], [], []>} : vector<48x4xf32>, vector<4x64xf32>, vector<48x64xf32> -> vector<48x64xf32>
    %c0_18 = arith.constant 0 : index
    %c0_19 = arith.constant 0 : index
    %14 = vector.load %arg8[%c0_18, %c0_19] : memref<48x64xf32, #tpu.memory_space<vmem>>, vector<48x64xf32>
    tpu.vector_store %arg8[%c0_18, %c0_19], %13 {strides = array<i32>} : memref<48x64xf32, #tpu.memory_space<vmem>>, vector<48x64xf32>,
    return
  }
}

module attributes {stable_mosaic.version = 11 : i64} {
  func.func @_head_kernel(%arg0: memref<3x24xf32, #tpu.memory_space<vmem>>, %arg1: memref<24x64xf32, #tpu.memory_space<vmem>>, %arg2: memref<64x32xf32, #tpu.memory_space<vmem>>, %arg3: memref<1x32xf32, #tpu.memory_space<vmem>>, %arg4: memref<32x16xf32, #tpu.memory_space<vmem>>, %arg5: memref<1x16xf32, #tpu.memory_space<vmem>>, %arg6: memref<16x1xf32, #tpu.memory_space<vmem>>, %arg7: memref<1x1xf32, #tpu.memory_space<vmem>>, %arg8: memref<3x1xf32, #tpu.memory_space<vmem>>) attributes {dimension_semantics = [], scalar_prefetch = 0 : i64, scratch_operands = 0 : i64, tpu.core_type = #tpu.core_type<tc>} {
    %c0 = arith.constant 0 : index
    %c0_0 = arith.constant 0 : index
    %0 = vector.load %arg0[%c0, %c0_0] : memref<3x24xf32, #tpu.memory_space<vmem>>, vector<3x24xf32>
    %c0_1 = arith.constant 0 : index
    %c0_2 = arith.constant 0 : index
    %1 = vector.load %arg1[%c0_1, %c0_2] : memref<24x64xf32, #tpu.memory_space<vmem>>, vector<24x64xf32>
    %cst = arith.constant dense<0.000000e+00> : vector<3x64xf32>
    %2 = tpu.matmul %0, %1, %cst {dimension_numbers = #tpu.dot_dimension_numbers<[1], [0], [0], [1], [0, 0, 1, 1], [], []>} : vector<3x24xf32>, vector<24x64xf32>, vector<3x64xf32> -> vector<3x64xf32>
    %c0_3 = arith.constant 0 : index
    %c0_4 = arith.constant 0 : index
    %3 = vector.load %arg2[%c0_3, %c0_4] : memref<64x32xf32, #tpu.memory_space<vmem>>, vector<64x32xf32>
    %cst_5 = arith.constant dense<0.000000e+00> : vector<3x32xf32>
    %4 = tpu.matmul %2, %3, %cst_5 {dimension_numbers = #tpu.dot_dimension_numbers<[1], [0], [0], [1], [0, 0, 1, 1], [], []>} : vector<3x64xf32>, vector<64x32xf32>, vector<3x32xf32> -> vector<3x32xf32>
    %c0_6 = arith.constant 0 : index
    %c0_7 = arith.constant 0 : index
    %5 = vector.load %arg3[%c0_6, %c0_7] : memref<1x32xf32, #tpu.memory_space<vmem>>, vector<1x32xf32>
    %6 = vector.broadcast %5 : vector<1x32xf32> to vector<3x32xf32>
    %7 = arith.addf %4, %6 : vector<3x32xf32>
    %cst_8 = arith.constant 0.000000e+00 : f32
    %8 = vector.broadcast %cst_8 : f32 to vector<3x32xf32>
    %9 = arith.maximumf %7, %8 : vector<3x32xf32>
    %c0_9 = arith.constant 0 : index
    %c0_10 = arith.constant 0 : index
    %10 = vector.load %arg4[%c0_9, %c0_10] : memref<32x16xf32, #tpu.memory_space<vmem>>, vector<32x16xf32>
    %cst_11 = arith.constant dense<0.000000e+00> : vector<3x16xf32>
    %11 = tpu.matmul %9, %10, %cst_11 {dimension_numbers = #tpu.dot_dimension_numbers<[1], [0], [0], [1], [0, 0, 1, 1], [], []>} : vector<3x32xf32>, vector<32x16xf32>, vector<3x16xf32> -> vector<3x16xf32>
    %c0_12 = arith.constant 0 : index
    %c0_13 = arith.constant 0 : index
    %12 = vector.load %arg5[%c0_12, %c0_13] : memref<1x16xf32, #tpu.memory_space<vmem>>, vector<1x16xf32>
    %13 = vector.broadcast %12 : vector<1x16xf32> to vector<3x16xf32>
    %14 = arith.addf %11, %13 : vector<3x16xf32>
    %cst_14 = arith.constant 0.000000e+00 : f32
    %15 = vector.broadcast %cst_14 : f32 to vector<3x16xf32>
    %16 = arith.maximumf %14, %15 : vector<3x16xf32>
    %c0_15 = arith.constant 0 : index
    %c0_16 = arith.constant 0 : index
    %17 = vector.load %arg6[%c0_15, %c0_16] : memref<16x1xf32, #tpu.memory_space<vmem>>, vector<16x1xf32>
    %cst_17 = arith.constant dense<0.000000e+00> : vector<3x1xf32>
    %18 = tpu.matmul %16, %17, %cst_17 {dimension_numbers = #tpu.dot_dimension_numbers<[1], [0], [0], [1], [0, 0, 1, 1], [], []>} : vector<3x16xf32>, vector<16x1xf32>, vector<3x1xf32> -> vector<3x1xf32>
    %c0_18 = arith.constant 0 : index
    %c0_19 = arith.constant 0 : index
    %19 = vector.load %arg7[%c0_18, %c0_19] : memref<1x1xf32, #tpu.memory_space<vmem>>, vector<1x1xf32>
    %20 = vector.broadcast %19 : vector<1x1xf32> to vector<3x1xf32>
    %21 = arith.addf %18, %20 : vector<3x1xf32>
    %c0_20 = arith.constant 0 : index
    %c0_21 = arith.constant 0 : index
    %22 = vector.load %arg8[%c0_20, %c0_21] : memref<3x1xf32, #tpu.memory_space<vmem>>, vector<3x1xf32>
    tpu.vector_store %arg8[%c0_20, %c0_21], %21 {strides = array<i32>} : memref<3x1xf32, #tpu.memory_space<vmem>>, vector<3x1xf32>,
    return
  }
}

module attributes {stable_mosaic.version = 11 : i64} {
  func.func @_gps_stack_kernel(%arg0: i32, %arg1: memref<24x64xf32, #tpu.memory_space<vmem>>, %arg2: memref<48x64xf32, #tpu.memory_space<vmem>>, %arg3: memref<48x24xf32, #tpu.memory_space<vmem>>, %arg4: memref<24x48xf32, #tpu.memory_space<vmem>>, %arg5: memref<48x24xf32, #tpu.memory_space<vmem>>, %arg6: memref<24x48xf32, #tpu.memory_space<vmem>>, %arg7: memref<3x16xf32, #tpu.memory_space<vmem>>, %arg8: memref<1x64x64xf32, #tpu.memory_space<vmem>>, %arg9: memref<1x1x64xf32, #tpu.memory_space<vmem>>, %arg10: memref<1x64x64xf32, #tpu.memory_space<vmem>>, %arg11: memref<1x1x64xf32, #tpu.memory_space<vmem>>, %arg12: memref<1x64x192xf32, #tpu.memory_space<vmem>>, %arg13: memref<1x1x192xf32, #tpu.memory_space<vmem>>, %arg14: memref<1x64x64xf32, #tpu.memory_space<vmem>>, %arg15: memref<1x1x64xf32, #tpu.memory_space<vmem>>, %arg16: memref<1x64x128xf32, #tpu.memory_space<vmem>>, %arg17: memref<1x1x128xf32, #tpu.memory_space<vmem>>, %arg18: memref<1x128x64xf32, #tpu.memory_space<vmem>>, %arg19: memref<1x1x64xf32, #tpu.memory_space<vmem>>, %arg20: memref<1x1x64xf32, #tpu.memory_space<vmem>>, %arg21: memref<1x1x64xf32, #tpu.memory_space<vmem>>, %arg22: memref<1x1x64xf32, #tpu.memory_space<vmem>>, %arg23: memref<1x1x64xf32, #tpu.memory_space<vmem>>, %arg24: memref<1x1x64xf32, #tpu.memory_space<vmem>>, %arg25: memref<1x1x64xf32, #tpu.memory_space<vmem>>, %arg26: memref<24x64xf32, #tpu.memory_space<vmem>>, %arg27: memref<48x64xf32, #tpu.memory_space<vmem>>) attributes {dimension_semantics = [#tpu.dimension_semantics<arbitrary>], iteration_bounds = array<i64: 10>, scalar_prefetch = 0 : i64, scratch_operands = 1 : i64, tpu.core_type = #tpu.core_type<tc>, window_params = [{pipeline_mode = #tpu.pipeline_mode<synchronous>, transform_indices = @transform_0, window_bounds = array<i64: 24, 64>}, {pipeline_mode = #tpu.pipeline_mode<synchronous>, transform_indices = @transform_1, window_bounds = array<i64: 48, 64>}, {pipeline_mode = #tpu.pipeline_mode<synchronous>, transform_indices = @transform_2, window_bounds = array<i64: 48, 24>}, {pipeline_mode = #tpu.pipeline_mode<synchronous>, transform_indices = @transform_3, window_bounds = array<i64: 24, 48>}, {pipeline_mode = #tpu.pipeline_mode<synchronous>, transform_indices = @transform_4, window_bounds = array<i64: 48, 24>}, {pipeline_mode = #tpu.pipeline_mode<synchronous>, transform_indices = @transform_5, window_bounds = array<i64: 24, 48>}, {pipeline_mode = #tpu.pipeline_mode<synchronous>, transform_indices = @transform_6, window_bounds = array<i64: 3, 16>}, {transform_indices = @transform_7, window_bounds = array<i64: 1, 64, 64>}, {transform_indices = @transform_8, window_bounds = array<i64: 1, 1, 64>}, {transform_indices = @transform_9, window_bounds = array<i64: 1, 64, 64>}, {transform_indices = @transform_10, window_bounds = array<i64: 1, 1, 64>}, {transform_indices = @transform_11, window_bounds = array<i64: 1, 64, 192>}, {transform_indices = @transform_12, window_bounds = array<i64: 1, 1, 192>}, {transform_indices = @transform_13, window_bounds = array<i64: 1, 64, 64>}, {transform_indices = @transform_14, window_bounds = array<i64: 1, 1, 64>}, {transform_indices = @transform_15, window_bounds = array<i64: 1, 64, 128>}, {transform_indices = @transform_16, window_bounds = array<i64: 1, 1, 128>}, {transform_indices = @transform_17, window_bounds = array<i64: 1, 128, 64>}, {transform_indices = @transform_18, window_bounds = array<i64: 1, 1, 64>}, {transform_indices = @transform_19, window_bounds = array<i64: 1, 1, 64>}, {transform_indices = @transform_20, window_bounds = array<i64: 1, 1, 64>}, {transform_indices = @transform_21, window_bounds = array<i64: 1, 1, 64>}, {transform_indices = @transform_22, window_bounds = array<i64: 1, 1, 64>}, {transform_indices = @transform_23, window_bounds = array<i64: 1, 1, 64>}, {transform_indices = @transform_24, window_bounds = array<i64: 1, 1, 64>}, {pipeline_mode = #tpu.pipeline_mode<synchronous>, transform_indices = @transform_25, window_bounds = array<i64: 24, 64>}]} {
    %c0_i32 = arith.constant 0 : i32
    %0 = arith.cmpi eq, %arg0, %c0_i32 : i32
    %1 = arith.extui %0 : i1 to i32
    %c0_i32_0 = arith.constant 0 : i32
    %2 = arith.cmpi ne, %1, %c0_i32_0 : i32
    scf.if %2 {
      %c0_167 = arith.constant 0 : index
      %c0_168 = arith.constant 0 : index
      %336 = vector.load %arg1[%c0_167, %c0_168] : memref<24x64xf32, #tpu.memory_space<vmem>>, vector<24x64xf32>
      %c0_169 = arith.constant 0 : index
      %c0_170 = arith.constant 0 : index
      %337 = vector.load %arg26[%c0_169, %c0_170] : memref<24x64xf32, #tpu.memory_space<vmem>>, vector<24x64xf32>
      tpu.vector_store %arg26[%c0_169, %c0_170], %336 {strides = array<i32>} : memref<24x64xf32, #tpu.memory_space<vmem>>, vector<24x64xf32>,
    } else {
    }
    %c0 = arith.constant 0 : index
    %c0_1 = arith.constant 0 : index
    %3 = vector.load %arg26[%c0, %c0_1] : memref<24x64xf32, #tpu.memory_space<vmem>>, vector<24x64xf32>
    %c0_2 = arith.constant 0 : index
    %c0_3 = arith.constant 0 : index
    %4 = vector.load %arg3[%c0_2, %c0_3] : memref<48x24xf32, #tpu.memory_space<vmem>>, vector<48x24xf32>
    %cst = arith.constant dense<0.000000e+00> : vector<48x64xf32>
    %5 = tpu.matmul %4, %3, %cst {dimension_numbers = #tpu.dot_dimension_numbers<[1], [0], [0], [1], [0, 0, 1, 1], [], []>} : vector<48x24xf32>, vector<24x64xf32>, vector<48x64xf32> -> vector<48x64xf32>
    %c0_4 = arith.constant 0 : index
    %c0_5 = arith.constant 0 : index
    %6 = vector.load %arg2[%c0_4, %c0_5] : memref<48x64xf32, #tpu.memory_space<vmem>>, vector<48x64xf32>
    %7 = arith.addf %5, %6 : vector<48x64xf32>
    %cst_6 = arith.constant 0.000000e+00 : f32
    %8 = vector.broadcast %cst_6 : f32 to vector<48x64xf32>
    %9 = arith.maximumf %7, %8 : vector<48x64xf32>
    %c0_7 = arith.constant 0 : index
    %c0_8 = arith.constant 0 : index
    %10 = vector.load %arg4[%c0_7, %c0_8] : memref<24x48xf32, #tpu.memory_space<vmem>>, vector<24x48xf32>
    %cst_9 = arith.constant dense<0.000000e+00> : vector<24x64xf32>
    %11 = tpu.matmul %10, %9, %cst_9 {dimension_numbers = #tpu.dot_dimension_numbers<[1], [0], [0], [1], [0, 0, 1, 1], [], []>} : vector<24x48xf32>, vector<48x64xf32>, vector<24x64xf32> -> vector<24x64xf32>
    %12 = arith.addf %11, %3 : vector<24x64xf32>
    %c0_10 = arith.constant 0 : index
    %c0_11 = arith.constant 0 : index
    %c0_12 = arith.constant 0 : index
    %13 = vector.load %arg8[%c0_10, %c0_11, %c0_12] : memref<1x64x64xf32, #tpu.memory_space<vmem>>, vector<1x64x64xf32>
    %14 = vector.shape_cast %13 : vector<1x64x64xf32> to vector<64x64xf32>
    %cst_13 = arith.constant dense<0.000000e+00> : vector<24x64xf32>
    %15 = tpu.matmul %12, %14, %cst_13 {dimension_numbers = #tpu.dot_dimension_numbers<[1], [0], [0], [1], [0, 0, 1, 1], [], []>} : vector<24x64xf32>, vector<64x64xf32>, vector<24x64xf32> -> vector<24x64xf32>
    %c0_14 = arith.constant 0 : index
    %c0_15 = arith.constant 0 : index
    %c0_16 = arith.constant 0 : index
    %16 = vector.load %arg9[%c0_14, %c0_15, %c0_16] : memref<1x1x64xf32, #tpu.memory_space<vmem>>, vector<1x1x64xf32>
    %17 = vector.shape_cast %16 : vector<1x1x64xf32> to vector<1x64xf32>
    %18 = vector.broadcast %17 : vector<1x64xf32> to vector<24x64xf32>
    %19 = arith.addf %15, %18 : vector<24x64xf32>
    %cst_17 = arith.constant 0.000000e+00 : f32
    %20 = vector.broadcast %cst_17 : f32 to vector<24x64xf32>
    %21 = arith.maximumf %19, %20 : vector<24x64xf32>
    %c0_18 = arith.constant 0 : index
    %c0_19 = arith.constant 0 : index
    %c0_20 = arith.constant 0 : index
    %22 = vector.load %arg10[%c0_18, %c0_19, %c0_20] : memref<1x64x64xf32, #tpu.memory_space<vmem>>, vector<1x64x64xf32>
    %23 = vector.shape_cast %22 : vector<1x64x64xf32> to vector<64x64xf32>
    %cst_21 = arith.constant dense<0.000000e+00> : vector<24x64xf32>
    %24 = tpu.matmul %21, %23, %cst_21 {dimension_numbers = #tpu.dot_dimension_numbers<[1], [0], [0], [1], [0, 0, 1, 1], [], []>} : vector<24x64xf32>, vector<64x64xf32>, vector<24x64xf32> -> vector<24x64xf32>
    %c0_22 = arith.constant 0 : index
    %c0_23 = arith.constant 0 : index
    %c0_24 = arith.constant 0 : index
    %25 = vector.load %arg11[%c0_22, %c0_23, %c0_24] : memref<1x1x64xf32, #tpu.memory_space<vmem>>, vector<1x1x64xf32>
    %26 = vector.shape_cast %25 : vector<1x1x64xf32> to vector<1x64xf32>
    %27 = vector.broadcast %26 : vector<1x64xf32> to vector<24x64xf32>
    %28 = arith.addf %24, %27 : vector<24x64xf32>
    %29 = arith.addf %28, %3 : vector<24x64xf32>
    %c0_25 = arith.constant 0 : index
    %c0_26 = arith.constant 0 : index
    %c0_27 = arith.constant 0 : index
    %30 = vector.load %arg20[%c0_25, %c0_26, %c0_27] : memref<1x1x64xf32, #tpu.memory_space<vmem>>, vector<1x1x64xf32>
    %31 = vector.shape_cast %30 : vector<1x1x64xf32> to vector<1x64xf32>
    %32 = vector.broadcast %31 : vector<1x64xf32> to vector<24x64xf32>
    %33 = arith.mulf %29, %32 : vector<24x64xf32>
    %c0_28 = arith.constant 0 : index
    %c0_29 = arith.constant 0 : index
    %c0_30 = arith.constant 0 : index
    %34 = vector.load %arg21[%c0_28, %c0_29, %c0_30] : memref<1x1x64xf32, #tpu.memory_space<vmem>>, vector<1x1x64xf32>
    %35 = vector.shape_cast %34 : vector<1x1x64xf32> to vector<1x64xf32>
    %36 = vector.broadcast %35 : vector<1x64xf32> to vector<24x64xf32>
    %37 = arith.addf %33, %36 : vector<24x64xf32>
    %c0_31 = arith.constant 0 : index
    %c0_32 = arith.constant 0 : index
    %38 = vector.load %arg5[%c0_31, %c0_32] : memref<48x24xf32, #tpu.memory_space<vmem>>, vector<48x24xf32>
    %cst_33 = arith.constant dense<0.000000e+00> : vector<48x64xf32>
    %39 = tpu.matmul %38, %3, %cst_33 {dimension_numbers = #tpu.dot_dimension_numbers<[1], [0], [0], [1], [0, 0, 1, 1], [], []>} : vector<48x24xf32>, vector<24x64xf32>, vector<48x64xf32> -> vector<48x64xf32>
    %c0_34 = arith.constant 0 : index
    %c0_35 = arith.constant 0 : index
    %c0_36 = arith.constant 0 : index
    %40 = vector.load %arg12[%c0_34, %c0_35, %c0_36] : memref<1x64x192xf32, #tpu.memory_space<vmem>>, vector<1x64x192xf32>
    %41 = vector.shape_cast %40 : vector<1x64x192xf32> to vector<64x192xf32>
    %cst_37 = arith.constant dense<0.000000e+00> : vector<48x192xf32>
    %42 = tpu.matmul %39, %41, %cst_37 {dimension_numbers = #tpu.dot_dimension_numbers<[1], [0], [0], [1], [0, 0, 1, 1], [], []>} : vector<48x64xf32>, vector<64x192xf32>, vector<48x192xf32> -> vector<48x192xf32>
    %c0_38 = arith.constant 0 : index
    %c0_39 = arith.constant 0 : index
    %c0_40 = arith.constant 0 : index
    %43 = vector.load %arg13[%c0_38, %c0_39, %c0_40] : memref<1x1x192xf32, #tpu.memory_space<vmem>>, vector<1x1x192xf32>
    %44 = vector.shape_cast %43 : vector<1x1x192xf32> to vector<1x192xf32>
    %45 = vector.broadcast %44 : vector<1x192xf32> to vector<48x192xf32>
    %46 = arith.addf %42, %45 : vector<48x192xf32>
    %c0_41 = arith.constant 0 : index
    %c0_42 = arith.constant 0 : index
    %47 = vector.load %arg7[%c0_41, %c0_42] : memref<3x16xf32, #tpu.memory_space<vmem>>, vector<1x16xf32>
    %48 = vector.extract_strided_slice %46 {offsets = [0, 0], sizes = [16, 16], strides = [1, 1]} : vector<48x192xf32> to vector<16x16xf32>
    %49 = vector.extract_strided_slice %46 {offsets = [0, 64], sizes = [16, 16], strides = [1, 1]} : vector<48x192xf32> to vector<16x16xf32>
    %50 = vector.extract_strided_slice %46 {offsets = [0, 128], sizes = [16, 16], strides = [1, 1]} : vector<48x192xf32> to vector<16x16xf32>
    %cst_43 = arith.constant dense<0.000000e+00> : vector<16x16xf32>
    %51 = tpu.matmul %48, %49, %cst_43 {dimension_numbers = #tpu.dot_dimension_numbers<[1], [1], [0], [0], [0, 0, 1, 0], [], []>} : vector<16x16xf32>, vector<16x16xf32>, vector<16x16xf32> -> vector<16x16xf32>
    %cst_44 = arith.constant 2.500000e-01 : f32
    %52 = vector.broadcast %cst_44 : f32 to vector<16x16xf32>
    %53 = arith.mulf %51, %52 : vector<16x16xf32>
    %54 = vector.broadcast %47 : vector<1x16xf32> to vector<16x16xf32>
    %55 = arith.addf %53, %54 : vector<16x16xf32>
    %cst_45 = arith.constant dense<0xFF800000> : vector<16xf32>
    %56 = vector.multi_reduction <maximumf>, %55, %cst_45 [1] : vector<16x16xf32> to vector<16xf32>
    %57 = vector.shape_cast %56 : vector<16xf32> to vector<16x1xf32>
    %58 = vector.broadcast %57 : vector<16x1xf32> to vector<16x16xf32>
    %59 = arith.subf %55, %58 : vector<16x16xf32>
    %60 = math.exp %59 : vector<16x16xf32>
    %cst_46 = arith.constant dense<0.000000e+00> : vector<16xf32>
    %61 = vector.multi_reduction <add>, %60, %cst_46 [1] : vector<16x16xf32> to vector<16xf32>
    %62 = vector.shape_cast %61 : vector<16xf32> to vector<16x1xf32>
    %63 = tpu.reciprocal %62 {approx = true} : vector<16x1xf32> -> vector<16x1xf32>
    %64 = vector.broadcast %63 : vector<16x1xf32> to vector<16x16xf32>
    %65 = arith.mulf %60, %64 : vector<16x16xf32>
    %cst_47 = arith.constant dense<0.000000e+00> : vector<16x16xf32>
    %66 = tpu.matmul %65, %50, %cst_47 {dimension_numbers = #tpu.dot_dimension_numbers<[1], [0], [0], [1], [0, 0, 1, 1], [], []>} : vector<16x16xf32>, vector<16x16xf32>, vector<16x16xf32> -> vector<16x16xf32>
    %c0_48 = arith.constant 0 : index
    %c0_49 = arith.constant 0 : index
    %67 = vector.load %arg27[%c0_48, %c0_49] : memref<48x64xf32, #tpu.memory_space<vmem>>, vector<16x16xf32>
    tpu.vector_store %arg27[%c0_48, %c0_49], %66 {strides = array<i32>} : memref<48x64xf32, #tpu.memory_space<vmem>>, vector<16x16xf32>,
    %68 = vector.extract_strided_slice %46 {offsets = [0, 16], sizes = [16, 16], strides = [1, 1]} : vector<48x192xf32> to vector<16x16xf32>
    %69 = vector.extract_strided_slice %46 {offsets = [0, 80], sizes = [16, 16], strides = [1, 1]} : vector<48x192xf32> to vector<16x16xf32>
    %70 = vector.extract_strided_slice %46 {offsets = [0, 144], sizes = [16, 16], strides = [1, 1]} : vector<48x192xf32> to vector<16x16xf32>
    %cst_50 = arith.constant dense<0.000000e+00> : vector<16x16xf32>
    %71 = tpu.matmul %68, %69, %cst_50 {dimension_numbers = #tpu.dot_dimension_numbers<[1], [1], [0], [0], [0, 0, 1, 0], [], []>} : vector<16x16xf32>, vector<16x16xf32>, vector<16x16xf32> -> vector<16x16xf32>
    %cst_51 = arith.constant 2.500000e-01 : f32
    %72 = vector.broadcast %cst_51 : f32 to vector<16x16xf32>
    %73 = arith.mulf %71, %72 : vector<16x16xf32>
    %74 = vector.broadcast %47 : vector<1x16xf32> to vector<16x16xf32>
    %75 = arith.addf %73, %74 : vector<16x16xf32>
    %cst_52 = arith.constant dense<0xFF800000> : vector<16xf32>
    %76 = vector.multi_reduction <maximumf>, %75, %cst_52 [1] : vector<16x16xf32> to vector<16xf32>
    %77 = vector.shape_cast %76 : vector<16xf32> to vector<16x1xf32>
    %78 = vector.broadcast %77 : vector<16x1xf32> to vector<16x16xf32>
    %79 = arith.subf %75, %78 : vector<16x16xf32>
    %80 = math.exp %79 : vector<16x16xf32>
    %cst_53 = arith.constant dense<0.000000e+00> : vector<16xf32>
    %81 = vector.multi_reduction <add>, %80, %cst_53 [1] : vector<16x16xf32> to vector<16xf32>
    %82 = vector.shape_cast %81 : vector<16xf32> to vector<16x1xf32>
    %83 = tpu.reciprocal %82 {approx = true} : vector<16x1xf32> -> vector<16x1xf32>
    %84 = vector.broadcast %83 : vector<16x1xf32> to vector<16x16xf32>
    %85 = arith.mulf %80, %84 : vector<16x16xf32>
    %cst_54 = arith.constant dense<0.000000e+00> : vector<16x16xf32>
    %86 = tpu.matmul %85, %70, %cst_54 {dimension_numbers = #tpu.dot_dimension_numbers<[1], [0], [0], [1], [0, 0, 1, 1], [], []>} : vector<16x16xf32>, vector<16x16xf32>, vector<16x16xf32> -> vector<16x16xf32>
    %c0_55 = arith.constant 0 : index
    %c16 = arith.constant 16 : index
    %87 = vector.load %arg27[%c0_55, %c16] : memref<48x64xf32, #tpu.memory_space<vmem>>, vector<16x16xf32>
    tpu.vector_store %arg27[%c0_55, %c16], %86 {strides = array<i32>} : memref<48x64xf32, #tpu.memory_space<vmem>>, vector<16x16xf32>,
    %88 = vector.extract_strided_slice %46 {offsets = [0, 32], sizes = [16, 16], strides = [1, 1]} : vector<48x192xf32> to vector<16x16xf32>
    %89 = vector.extract_strided_slice %46 {offsets = [0, 96], sizes = [16, 16], strides = [1, 1]} : vector<48x192xf32> to vector<16x16xf32>
    %90 = vector.extract_strided_slice %46 {offsets = [0, 160], sizes = [16, 16], strides = [1, 1]} : vector<48x192xf32> to vector<16x16xf32>
    %cst_56 = arith.constant dense<0.000000e+00> : vector<16x16xf32>
    %91 = tpu.matmul %88, %89, %cst_56 {dimension_numbers = #tpu.dot_dimension_numbers<[1], [1], [0], [0], [0, 0, 1, 0], [], []>} : vector<16x16xf32>, vector<16x16xf32>, vector<16x16xf32> -> vector<16x16xf32>
    %cst_57 = arith.constant 2.500000e-01 : f32
    %92 = vector.broadcast %cst_57 : f32 to vector<16x16xf32>
    %93 = arith.mulf %91, %92 : vector<16x16xf32>
    %94 = vector.broadcast %47 : vector<1x16xf32> to vector<16x16xf32>
    %95 = arith.addf %93, %94 : vector<16x16xf32>
    %cst_58 = arith.constant dense<0xFF800000> : vector<16xf32>
    %96 = vector.multi_reduction <maximumf>, %95, %cst_58 [1] : vector<16x16xf32> to vector<16xf32>
    %97 = vector.shape_cast %96 : vector<16xf32> to vector<16x1xf32>
    %98 = vector.broadcast %97 : vector<16x1xf32> to vector<16x16xf32>
    %99 = arith.subf %95, %98 : vector<16x16xf32>
    %100 = math.exp %99 : vector<16x16xf32>
    %cst_59 = arith.constant dense<0.000000e+00> : vector<16xf32>
    %101 = vector.multi_reduction <add>, %100, %cst_59 [1] : vector<16x16xf32> to vector<16xf32>
    %102 = vector.shape_cast %101 : vector<16xf32> to vector<16x1xf32>
    %103 = tpu.reciprocal %102 {approx = true} : vector<16x1xf32> -> vector<16x1xf32>
    %104 = vector.broadcast %103 : vector<16x1xf32> to vector<16x16xf32>
    %105 = arith.mulf %100, %104 : vector<16x16xf32>
    %cst_60 = arith.constant dense<0.000000e+00> : vector<16x16xf32>
    %106 = tpu.matmul %105, %90, %cst_60 {dimension_numbers = #tpu.dot_dimension_numbers<[1], [0], [0], [1], [0, 0, 1, 1], [], []>} : vector<16x16xf32>, vector<16x16xf32>, vector<16x16xf32> -> vector<16x16xf32>
    %c0_61 = arith.constant 0 : index
    %c32 = arith.constant 32 : index
    %107 = vector.load %arg27[%c0_61, %c32] : memref<48x64xf32, #tpu.memory_space<vmem>>, vector<16x16xf32>
    tpu.vector_store %arg27[%c0_61, %c32], %106 {strides = array<i32>} : memref<48x64xf32, #tpu.memory_space<vmem>>, vector<16x16xf32>,
    %108 = vector.extract_strided_slice %46 {offsets = [0, 48], sizes = [16, 16], strides = [1, 1]} : vector<48x192xf32> to vector<16x16xf32>
    %109 = vector.extract_strided_slice %46 {offsets = [0, 112], sizes = [16, 16], strides = [1, 1]} : vector<48x192xf32> to vector<16x16xf32>
    %110 = vector.extract_strided_slice %46 {offsets = [0, 176], sizes = [16, 16], strides = [1, 1]} : vector<48x192xf32> to vector<16x16xf32>
    %cst_62 = arith.constant dense<0.000000e+00> : vector<16x16xf32>
    %111 = tpu.matmul %108, %109, %cst_62 {dimension_numbers = #tpu.dot_dimension_numbers<[1], [1], [0], [0], [0, 0, 1, 0], [], []>} : vector<16x16xf32>, vector<16x16xf32>, vector<16x16xf32> -> vector<16x16xf32>
    %cst_63 = arith.constant 2.500000e-01 : f32
    %112 = vector.broadcast %cst_63 : f32 to vector<16x16xf32>
    %113 = arith.mulf %111, %112 : vector<16x16xf32>
    %114 = vector.broadcast %47 : vector<1x16xf32> to vector<16x16xf32>
    %115 = arith.addf %113, %114 : vector<16x16xf32>
    %cst_64 = arith.constant dense<0xFF800000> : vector<16xf32>
    %116 = vector.multi_reduction <maximumf>, %115, %cst_64 [1] : vector<16x16xf32> to vector<16xf32>
    %117 = vector.shape_cast %116 : vector<16xf32> to vector<16x1xf32>
    %118 = vector.broadcast %117 : vector<16x1xf32> to vector<16x16xf32>
    %119 = arith.subf %115, %118 : vector<16x16xf32>
    %120 = math.exp %119 : vector<16x16xf32>
    %cst_65 = arith.constant dense<0.000000e+00> : vector<16xf32>
    %121 = vector.multi_reduction <add>, %120, %cst_65 [1] : vector<16x16xf32> to vector<16xf32>
    %122 = vector.shape_cast %121 : vector<16xf32> to vector<16x1xf32>
    %123 = tpu.reciprocal %122 {approx = true} : vector<16x1xf32> -> vector<16x1xf32>
    %124 = vector.broadcast %123 : vector<16x1xf32> to vector<16x16xf32>
    %125 = arith.mulf %120, %124 : vector<16x16xf32>
    %cst_66 = arith.constant dense<0.000000e+00> : vector<16x16xf32>
    %126 = tpu.matmul %125, %110, %cst_66 {dimension_numbers = #tpu.dot_dimension_numbers<[1], [0], [0], [1], [0, 0, 1, 1], [], []>} : vector<16x16xf32>, vector<16x16xf32>, vector<16x16xf32> -> vector<16x16xf32>
    %c0_67 = arith.constant 0 : index
    %c48 = arith.constant 48 : index
    %127 = vector.load %arg27[%c0_67, %c48] : memref<48x64xf32, #tpu.memory_space<vmem>>, vector<16x16xf32>
    tpu.vector_store %arg27[%c0_67, %c48], %126 {strides = array<i32>} : memref<48x64xf32, #tpu.memory_space<vmem>>, vector<16x16xf32>,
    %c1 = arith.constant 1 : index
    %c0_68 = arith.constant 0 : index
    %128 = vector.load %arg7[%c1, %c0_68] : memref<3x16xf32, #tpu.memory_space<vmem>>, vector<1x16xf32>
    %129 = vector.extract_strided_slice %46 {offsets = [16, 0], sizes = [16, 16], strides = [1, 1]} : vector<48x192xf32> to vector<16x16xf32>
    %130 = vector.extract_strided_slice %46 {offsets = [16, 64], sizes = [16, 16], strides = [1, 1]} : vector<48x192xf32> to vector<16x16xf32>
    %131 = vector.extract_strided_slice %46 {offsets = [16, 128], sizes = [16, 16], strides = [1, 1]} : vector<48x192xf32> to vector<16x16xf32>
    %cst_69 = arith.constant dense<0.000000e+00> : vector<16x16xf32>
    %132 = tpu.matmul %129, %130, %cst_69 {dimension_numbers = #tpu.dot_dimension_numbers<[1], [1], [0], [0], [0, 0, 1, 0], [], []>} : vector<16x16xf32>, vector<16x16xf32>, vector<16x16xf32> -> vector<16x16xf32>
    %cst_70 = arith.constant 2.500000e-01 : f32
    %133 = vector.broadcast %cst_70 : f32 to vector<16x16xf32>
    %134 = arith.mulf %132, %133 : vector<16x16xf32>
    %135 = vector.broadcast %128 : vector<1x16xf32> to vector<16x16xf32>
    %136 = arith.addf %134, %135 : vector<16x16xf32>
    %cst_71 = arith.constant dense<0xFF800000> : vector<16xf32>
    %137 = vector.multi_reduction <maximumf>, %136, %cst_71 [1] : vector<16x16xf32> to vector<16xf32>
    %138 = vector.shape_cast %137 : vector<16xf32> to vector<16x1xf32>
    %139 = vector.broadcast %138 : vector<16x1xf32> to vector<16x16xf32>
    %140 = arith.subf %136, %139 : vector<16x16xf32>
    %141 = math.exp %140 : vector<16x16xf32>
    %cst_72 = arith.constant dense<0.000000e+00> : vector<16xf32>
    %142 = vector.multi_reduction <add>, %141, %cst_72 [1] : vector<16x16xf32> to vector<16xf32>
    %143 = vector.shape_cast %142 : vector<16xf32> to vector<16x1xf32>
    %144 = tpu.reciprocal %143 {approx = true} : vector<16x1xf32> -> vector<16x1xf32>
    %145 = vector.broadcast %144 : vector<16x1xf32> to vector<16x16xf32>
    %146 = arith.mulf %141, %145 : vector<16x16xf32>
    %cst_73 = arith.constant dense<0.000000e+00> : vector<16x16xf32>
    %147 = tpu.matmul %146, %131, %cst_73 {dimension_numbers = #tpu.dot_dimension_numbers<[1], [0], [0], [1], [0, 0, 1, 1], [], []>} : vector<16x16xf32>, vector<16x16xf32>, vector<16x16xf32> -> vector<16x16xf32>
    %c16_74 = arith.constant 16 : index
    %c0_75 = arith.constant 0 : index
    %148 = vector.load %arg27[%c16_74, %c0_75] : memref<48x64xf32, #tpu.memory_space<vmem>>, vector<16x16xf32>
    tpu.vector_store %arg27[%c16_74, %c0_75], %147 {strides = array<i32>} : memref<48x64xf32, #tpu.memory_space<vmem>>, vector<16x16xf32>,
    %149 = vector.extract_strided_slice %46 {offsets = [16, 16], sizes = [16, 16], strides = [1, 1]} : vector<48x192xf32> to vector<16x16xf32>
    %150 = vector.extract_strided_slice %46 {offsets = [16, 80], sizes = [16, 16], strides = [1, 1]} : vector<48x192xf32> to vector<16x16xf32>
    %151 = vector.extract_strided_slice %46 {offsets = [16, 144], sizes = [16, 16], strides = [1, 1]} : vector<48x192xf32> to vector<16x16xf32>
    %cst_76 = arith.constant dense<0.000000e+00> : vector<16x16xf32>
    %152 = tpu.matmul %149, %150, %cst_76 {dimension_numbers = #tpu.dot_dimension_numbers<[1], [1], [0], [0], [0, 0, 1, 0], [], []>} : vector<16x16xf32>, vector<16x16xf32>, vector<16x16xf32> -> vector<16x16xf32>
    %cst_77 = arith.constant 2.500000e-01 : f32
    %153 = vector.broadcast %cst_77 : f32 to vector<16x16xf32>
    %154 = arith.mulf %152, %153 : vector<16x16xf32>
    %155 = vector.broadcast %128 : vector<1x16xf32> to vector<16x16xf32>
    %156 = arith.addf %154, %155 : vector<16x16xf32>
    %cst_78 = arith.constant dense<0xFF800000> : vector<16xf32>
    %157 = vector.multi_reduction <maximumf>, %156, %cst_78 [1] : vector<16x16xf32> to vector<16xf32>
    %158 = vector.shape_cast %157 : vector<16xf32> to vector<16x1xf32>
    %159 = vector.broadcast %158 : vector<16x1xf32> to vector<16x16xf32>
    %160 = arith.subf %156, %159 : vector<16x16xf32>
    %161 = math.exp %160 : vector<16x16xf32>
    %cst_79 = arith.constant dense<0.000000e+00> : vector<16xf32>
    %162 = vector.multi_reduction <add>, %161, %cst_79 [1] : vector<16x16xf32> to vector<16xf32>
    %163 = vector.shape_cast %162 : vector<16xf32> to vector<16x1xf32>
    %164 = tpu.reciprocal %163 {approx = true} : vector<16x1xf32> -> vector<16x1xf32>
    %165 = vector.broadcast %164 : vector<16x1xf32> to vector<16x16xf32>
    %166 = arith.mulf %161, %165 : vector<16x16xf32>
    %cst_80 = arith.constant dense<0.000000e+00> : vector<16x16xf32>
    %167 = tpu.matmul %166, %151, %cst_80 {dimension_numbers = #tpu.dot_dimension_numbers<[1], [0], [0], [1], [0, 0, 1, 1], [], []>} : vector<16x16xf32>, vector<16x16xf32>, vector<16x16xf32> -> vector<16x16xf32>
    %c16_81 = arith.constant 16 : index
    %c16_82 = arith.constant 16 : index
    %168 = vector.load %arg27[%c16_81, %c16_82] : memref<48x64xf32, #tpu.memory_space<vmem>>, vector<16x16xf32>
    tpu.vector_store %arg27[%c16_81, %c16_82], %167 {strides = array<i32>} : memref<48x64xf32, #tpu.memory_space<vmem>>, vector<16x16xf32>,
    %169 = vector.extract_strided_slice %46 {offsets = [16, 32], sizes = [16, 16], strides = [1, 1]} : vector<48x192xf32> to vector<16x16xf32>
    %170 = vector.extract_strided_slice %46 {offsets = [16, 96], sizes = [16, 16], strides = [1, 1]} : vector<48x192xf32> to vector<16x16xf32>
    %171 = vector.extract_strided_slice %46 {offsets = [16, 160], sizes = [16, 16], strides = [1, 1]} : vector<48x192xf32> to vector<16x16xf32>
    %cst_83 = arith.constant dense<0.000000e+00> : vector<16x16xf32>
    %172 = tpu.matmul %169, %170, %cst_83 {dimension_numbers = #tpu.dot_dimension_numbers<[1], [1], [0], [0], [0, 0, 1, 0], [], []>} : vector<16x16xf32>, vector<16x16xf32>, vector<16x16xf32> -> vector<16x16xf32>
    %cst_84 = arith.constant 2.500000e-01 : f32
    %173 = vector.broadcast %cst_84 : f32 to vector<16x16xf32>
    %174 = arith.mulf %172, %173 : vector<16x16xf32>
    %175 = vector.broadcast %128 : vector<1x16xf32> to vector<16x16xf32>
    %176 = arith.addf %174, %175 : vector<16x16xf32>
    %cst_85 = arith.constant dense<0xFF800000> : vector<16xf32>
    %177 = vector.multi_reduction <maximumf>, %176, %cst_85 [1] : vector<16x16xf32> to vector<16xf32>
    %178 = vector.shape_cast %177 : vector<16xf32> to vector<16x1xf32>
    %179 = vector.broadcast %178 : vector<16x1xf32> to vector<16x16xf32>
    %180 = arith.subf %176, %179 : vector<16x16xf32>
    %181 = math.exp %180 : vector<16x16xf32>
    %cst_86 = arith.constant dense<0.000000e+00> : vector<16xf32>
    %182 = vector.multi_reduction <add>, %181, %cst_86 [1] : vector<16x16xf32> to vector<16xf32>
    %183 = vector.shape_cast %182 : vector<16xf32> to vector<16x1xf32>
    %184 = tpu.reciprocal %183 {approx = true} : vector<16x1xf32> -> vector<16x1xf32>
    %185 = vector.broadcast %184 : vector<16x1xf32> to vector<16x16xf32>
    %186 = arith.mulf %181, %185 : vector<16x16xf32>
    %cst_87 = arith.constant dense<0.000000e+00> : vector<16x16xf32>
    %187 = tpu.matmul %186, %171, %cst_87 {dimension_numbers = #tpu.dot_dimension_numbers<[1], [0], [0], [1], [0, 0, 1, 1], [], []>} : vector<16x16xf32>, vector<16x16xf32>, vector<16x16xf32> -> vector<16x16xf32>
    %c16_88 = arith.constant 16 : index
    %c32_89 = arith.constant 32 : index
    %188 = vector.load %arg27[%c16_88, %c32_89] : memref<48x64xf32, #tpu.memory_space<vmem>>, vector<16x16xf32>
    tpu.vector_store %arg27[%c16_88, %c32_89], %187 {strides = array<i32>} : memref<48x64xf32, #tpu.memory_space<vmem>>, vector<16x16xf32>,
    %189 = vector.extract_strided_slice %46 {offsets = [16, 48], sizes = [16, 16], strides = [1, 1]} : vector<48x192xf32> to vector<16x16xf32>
    %190 = vector.extract_strided_slice %46 {offsets = [16, 112], sizes = [16, 16], strides = [1, 1]} : vector<48x192xf32> to vector<16x16xf32>
    %191 = vector.extract_strided_slice %46 {offsets = [16, 176], sizes = [16, 16], strides = [1, 1]} : vector<48x192xf32> to vector<16x16xf32>
    %cst_90 = arith.constant dense<0.000000e+00> : vector<16x16xf32>
    %192 = tpu.matmul %189, %190, %cst_90 {dimension_numbers = #tpu.dot_dimension_numbers<[1], [1], [0], [0], [0, 0, 1, 0], [], []>} : vector<16x16xf32>, vector<16x16xf32>, vector<16x16xf32> -> vector<16x16xf32>
    %cst_91 = arith.constant 2.500000e-01 : f32
    %193 = vector.broadcast %cst_91 : f32 to vector<16x16xf32>
    %194 = arith.mulf %192, %193 : vector<16x16xf32>
    %195 = vector.broadcast %128 : vector<1x16xf32> to vector<16x16xf32>
    %196 = arith.addf %194, %195 : vector<16x16xf32>
    %cst_92 = arith.constant dense<0xFF800000> : vector<16xf32>
    %197 = vector.multi_reduction <maximumf>, %196, %cst_92 [1] : vector<16x16xf32> to vector<16xf32>
    %198 = vector.shape_cast %197 : vector<16xf32> to vector<16x1xf32>
    %199 = vector.broadcast %198 : vector<16x1xf32> to vector<16x16xf32>
    %200 = arith.subf %196, %199 : vector<16x16xf32>
    %201 = math.exp %200 : vector<16x16xf32>
    %cst_93 = arith.constant dense<0.000000e+00> : vector<16xf32>
    %202 = vector.multi_reduction <add>, %201, %cst_93 [1] : vector<16x16xf32> to vector<16xf32>
    %203 = vector.shape_cast %202 : vector<16xf32> to vector<16x1xf32>
    %204 = tpu.reciprocal %203 {approx = true} : vector<16x1xf32> -> vector<16x1xf32>
    %205 = vector.broadcast %204 : vector<16x1xf32> to vector<16x16xf32>
    %206 = arith.mulf %201, %205 : vector<16x16xf32>
    %cst_94 = arith.constant dense<0.000000e+00> : vector<16x16xf32>
    %207 = tpu.matmul %206, %191, %cst_94 {dimension_numbers = #tpu.dot_dimension_numbers<[1], [0], [0], [1], [0, 0, 1, 1], [], []>} : vector<16x16xf32>, vector<16x16xf32>, vector<16x16xf32> -> vector<16x16xf32>
    %c16_95 = arith.constant 16 : index
    %c48_96 = arith.constant 48 : index
    %208 = vector.load %arg27[%c16_95, %c48_96] : memref<48x64xf32, #tpu.memory_space<vmem>>, vector<16x16xf32>
    tpu.vector_store %arg27[%c16_95, %c48_96], %207 {strides = array<i32>} : memref<48x64xf32, #tpu.memory_space<vmem>>, vector<16x16xf32>,
    %c2 = arith.constant 2 : index
    %c0_97 = arith.constant 0 : index
    %209 = vector.load %arg7[%c2, %c0_97] : memref<3x16xf32, #tpu.memory_space<vmem>>, vector<1x16xf32>
    %210 = vector.extract_strided_slice %46 {offsets = [32, 0], sizes = [16, 16], strides = [1, 1]} : vector<48x192xf32> to vector<16x16xf32>
    %211 = vector.extract_strided_slice %46 {offsets = [32, 64], sizes = [16, 16], strides = [1, 1]} : vector<48x192xf32> to vector<16x16xf32>
    %212 = vector.extract_strided_slice %46 {offsets = [32, 128], sizes = [16, 16], strides = [1, 1]} : vector<48x192xf32> to vector<16x16xf32>
    %cst_98 = arith.constant dense<0.000000e+00> : vector<16x16xf32>
    %213 = tpu.matmul %210, %211, %cst_98 {dimension_numbers = #tpu.dot_dimension_numbers<[1], [1], [0], [0], [0, 0, 1, 0], [], []>} : vector<16x16xf32>, vector<16x16xf32>, vector<16x16xf32> -> vector<16x16xf32>
    %cst_99 = arith.constant 2.500000e-01 : f32
    %214 = vector.broadcast %cst_99 : f32 to vector<16x16xf32>
    %215 = arith.mulf %213, %214 : vector<16x16xf32>
    %216 = vector.broadcast %209 : vector<1x16xf32> to vector<16x16xf32>
    %217 = arith.addf %215, %216 : vector<16x16xf32>
    %cst_100 = arith.constant dense<0xFF800000> : vector<16xf32>
    %218 = vector.multi_reduction <maximumf>, %217, %cst_100 [1] : vector<16x16xf32> to vector<16xf32>
    %219 = vector.shape_cast %218 : vector<16xf32> to vector<16x1xf32>
    %220 = vector.broadcast %219 : vector<16x1xf32> to vector<16x16xf32>
    %221 = arith.subf %217, %220 : vector<16x16xf32>
    %222 = math.exp %221 : vector<16x16xf32>
    %cst_101 = arith.constant dense<0.000000e+00> : vector<16xf32>
    %223 = vector.multi_reduction <add>, %222, %cst_101 [1] : vector<16x16xf32> to vector<16xf32>
    %224 = vector.shape_cast %223 : vector<16xf32> to vector<16x1xf32>
    %225 = tpu.reciprocal %224 {approx = true} : vector<16x1xf32> -> vector<16x1xf32>
    %226 = vector.broadcast %225 : vector<16x1xf32> to vector<16x16xf32>
    %227 = arith.mulf %222, %226 : vector<16x16xf32>
    %cst_102 = arith.constant dense<0.000000e+00> : vector<16x16xf32>
    %228 = tpu.matmul %227, %212, %cst_102 {dimension_numbers = #tpu.dot_dimension_numbers<[1], [0], [0], [1], [0, 0, 1, 1], [], []>} : vector<16x16xf32>, vector<16x16xf32>, vector<16x16xf32> -> vector<16x16xf32>
    %c32_103 = arith.constant 32 : index
    %c0_104 = arith.constant 0 : index
    %229 = vector.load %arg27[%c32_103, %c0_104] : memref<48x64xf32, #tpu.memory_space<vmem>>, vector<16x16xf32>
    tpu.vector_store %arg27[%c32_103, %c0_104], %228 {strides = array<i32>} : memref<48x64xf32, #tpu.memory_space<vmem>>, vector<16x16xf32>,
    %230 = vector.extract_strided_slice %46 {offsets = [32, 16], sizes = [16, 16], strides = [1, 1]} : vector<48x192xf32> to vector<16x16xf32>
    %231 = vector.extract_strided_slice %46 {offsets = [32, 80], sizes = [16, 16], strides = [1, 1]} : vector<48x192xf32> to vector<16x16xf32>
    %232 = vector.extract_strided_slice %46 {offsets = [32, 144], sizes = [16, 16], strides = [1, 1]} : vector<48x192xf32> to vector<16x16xf32>
    %cst_105 = arith.constant dense<0.000000e+00> : vector<16x16xf32>
    %233 = tpu.matmul %230, %231, %cst_105 {dimension_numbers = #tpu.dot_dimension_numbers<[1], [1], [0], [0], [0, 0, 1, 0], [], []>} : vector<16x16xf32>, vector<16x16xf32>, vector<16x16xf32> -> vector<16x16xf32>
    %cst_106 = arith.constant 2.500000e-01 : f32
    %234 = vector.broadcast %cst_106 : f32 to vector<16x16xf32>
    %235 = arith.mulf %233, %234 : vector<16x16xf32>
    %236 = vector.broadcast %209 : vector<1x16xf32> to vector<16x16xf32>
    %237 = arith.addf %235, %236 : vector<16x16xf32>
    %cst_107 = arith.constant dense<0xFF800000> : vector<16xf32>
    %238 = vector.multi_reduction <maximumf>, %237, %cst_107 [1] : vector<16x16xf32> to vector<16xf32>
    %239 = vector.shape_cast %238 : vector<16xf32> to vector<16x1xf32>
    %240 = vector.broadcast %239 : vector<16x1xf32> to vector<16x16xf32>
    %241 = arith.subf %237, %240 : vector<16x16xf32>
    %242 = math.exp %241 : vector<16x16xf32>
    %cst_108 = arith.constant dense<0.000000e+00> : vector<16xf32>
    %243 = vector.multi_reduction <add>, %242, %cst_108 [1] : vector<16x16xf32> to vector<16xf32>
    %244 = vector.shape_cast %243 : vector<16xf32> to vector<16x1xf32>
    %245 = tpu.reciprocal %244 {approx = true} : vector<16x1xf32> -> vector<16x1xf32>
    %246 = vector.broadcast %245 : vector<16x1xf32> to vector<16x16xf32>
    %247 = arith.mulf %242, %246 : vector<16x16xf32>
    %cst_109 = arith.constant dense<0.000000e+00> : vector<16x16xf32>
    %248 = tpu.matmul %247, %232, %cst_109 {dimension_numbers = #tpu.dot_dimension_numbers<[1], [0], [0], [1], [0, 0, 1, 1], [], []>} : vector<16x16xf32>, vector<16x16xf32>, vector<16x16xf32> -> vector<16x16xf32>
    %c32_110 = arith.constant 32 : index
    %c16_111 = arith.constant 16 : index
    %249 = vector.load %arg27[%c32_110, %c16_111] : memref<48x64xf32, #tpu.memory_space<vmem>>, vector<16x16xf32>
    tpu.vector_store %arg27[%c32_110, %c16_111], %248 {strides = array<i32>} : memref<48x64xf32, #tpu.memory_space<vmem>>, vector<16x16xf32>,
    %250 = vector.extract_strided_slice %46 {offsets = [32, 32], sizes = [16, 16], strides = [1, 1]} : vector<48x192xf32> to vector<16x16xf32>
    %251 = vector.extract_strided_slice %46 {offsets = [32, 96], sizes = [16, 16], strides = [1, 1]} : vector<48x192xf32> to vector<16x16xf32>
    %252 = vector.extract_strided_slice %46 {offsets = [32, 160], sizes = [16, 16], strides = [1, 1]} : vector<48x192xf32> to vector<16x16xf32>
    %cst_112 = arith.constant dense<0.000000e+00> : vector<16x16xf32>
    %253 = tpu.matmul %250, %251, %cst_112 {dimension_numbers = #tpu.dot_dimension_numbers<[1], [1], [0], [0], [0, 0, 1, 0], [], []>} : vector<16x16xf32>, vector<16x16xf32>, vector<16x16xf32> -> vector<16x16xf32>
    %cst_113 = arith.constant 2.500000e-01 : f32
    %254 = vector.broadcast %cst_113 : f32 to vector<16x16xf32>
    %255 = arith.mulf %253, %254 : vector<16x16xf32>
    %256 = vector.broadcast %209 : vector<1x16xf32> to vector<16x16xf32>
    %257 = arith.addf %255, %256 : vector<16x16xf32>
    %cst_114 = arith.constant dense<0xFF800000> : vector<16xf32>
    %258 = vector.multi_reduction <maximumf>, %257, %cst_114 [1] : vector<16x16xf32> to vector<16xf32>
    %259 = vector.shape_cast %258 : vector<16xf32> to vector<16x1xf32>
    %260 = vector.broadcast %259 : vector<16x1xf32> to vector<16x16xf32>
    %261 = arith.subf %257, %260 : vector<16x16xf32>
    %262 = math.exp %261 : vector<16x16xf32>
    %cst_115 = arith.constant dense<0.000000e+00> : vector<16xf32>
    %263 = vector.multi_reduction <add>, %262, %cst_115 [1] : vector<16x16xf32> to vector<16xf32>
    %264 = vector.shape_cast %263 : vector<16xf32> to vector<16x1xf32>
    %265 = tpu.reciprocal %264 {approx = true} : vector<16x1xf32> -> vector<16x1xf32>
    %266 = vector.broadcast %265 : vector<16x1xf32> to vector<16x16xf32>
    %267 = arith.mulf %262, %266 : vector<16x16xf32>
    %cst_116 = arith.constant dense<0.000000e+00> : vector<16x16xf32>
    %268 = tpu.matmul %267, %252, %cst_116 {dimension_numbers = #tpu.dot_dimension_numbers<[1], [0], [0], [1], [0, 0, 1, 1], [], []>} : vector<16x16xf32>, vector<16x16xf32>, vector<16x16xf32> -> vector<16x16xf32>
    %c32_117 = arith.constant 32 : index
    %c32_118 = arith.constant 32 : index
    %269 = vector.load %arg27[%c32_117, %c32_118] : memref<48x64xf32, #tpu.memory_space<vmem>>, vector<16x16xf32>
    tpu.vector_store %arg27[%c32_117, %c32_118], %268 {strides = array<i32>} : memref<48x64xf32, #tpu.memory_space<vmem>>, vector<16x16xf32>,
    %270 = vector.extract_strided_slice %46 {offsets = [32, 48], sizes = [16, 16], strides = [1, 1]} : vector<48x192xf32> to vector<16x16xf32>
    %271 = vector.extract_strided_slice %46 {offsets = [32, 112], sizes = [16, 16], strides = [1, 1]} : vector<48x192xf32> to vector<16x16xf32>
    %272 = vector.extract_strided_slice %46 {offsets = [32, 176], sizes = [16, 16], strides = [1, 1]} : vector<48x192xf32> to vector<16x16xf32>
    %cst_119 = arith.constant dense<0.000000e+00> : vector<16x16xf32>
    %273 = tpu.matmul %270, %271, %cst_119 {dimension_numbers = #tpu.dot_dimension_numbers<[1], [1], [0], [0], [0, 0, 1, 0], [], []>} : vector<16x16xf32>, vector<16x16xf32>, vector<16x16xf32> -> vector<16x16xf32>
    %cst_120 = arith.constant 2.500000e-01 : f32
    %274 = vector.broadcast %cst_120 : f32 to vector<16x16xf32>
    %275 = arith.mulf %273, %274 : vector<16x16xf32>
    %276 = vector.broadcast %209 : vector<1x16xf32> to vector<16x16xf32>
    %277 = arith.addf %275, %276 : vector<16x16xf32>
    %cst_121 = arith.constant dense<0xFF800000> : vector<16xf32>
    %278 = vector.multi_reduction <maximumf>, %277, %cst_121 [1] : vector<16x16xf32> to vector<16xf32>
    %279 = vector.shape_cast %278 : vector<16xf32> to vector<16x1xf32>
    %280 = vector.broadcast %279 : vector<16x1xf32> to vector<16x16xf32>
    %281 = arith.subf %277, %280 : vector<16x16xf32>
    %282 = math.exp %281 : vector<16x16xf32>
    %cst_122 = arith.constant dense<0.000000e+00> : vector<16xf32>
    %283 = vector.multi_reduction <add>, %282, %cst_122 [1] : vector<16x16xf32> to vector<16xf32>
    %284 = vector.shape_cast %283 : vector<16xf32> to vector<16x1xf32>
    %285 = tpu.reciprocal %284 {approx = true} : vector<16x1xf32> -> vector<16x1xf32>
    %286 = vector.broadcast %285 : vector<16x1xf32> to vector<16x16xf32>
    %287 = arith.mulf %282, %286 : vector<16x16xf32>
    %cst_123 = arith.constant dense<0.000000e+00> : vector<16x16xf32>
    %288 = tpu.matmul %287, %272, %cst_123 {dimension_numbers = #tpu.dot_dimension_numbers<[1], [0], [0], [1], [0, 0, 1, 1], [], []>} : vector<16x16xf32>, vector<16x16xf32>, vector<16x16xf32> -> vector<16x16xf32>
    %c32_124 = arith.constant 32 : index
    %c48_125 = arith.constant 48 : index
    %289 = vector.load %arg27[%c32_124, %c48_125] : memref<48x64xf32, #tpu.memory_space<vmem>>, vector<16x16xf32>
    tpu.vector_store %arg27[%c32_124, %c48_125], %288 {strides = array<i32>} : memref<48x64xf32, #tpu.memory_space<vmem>>, vector<16x16xf32>,
    %c0_126 = arith.constant 0 : index
    %c0_127 = arith.constant 0 : index
    %290 = vector.load %arg6[%c0_126, %c0_127] : memref<24x48xf32, #tpu.memory_space<vmem>>, vector<24x48xf32>
    %c0_128 = arith.constant 0 : index
    %c0_129 = arith.constant 0 : index
    %291 = vector.load %arg27[%c0_128, %c0_129] : memref<48x64xf32, #tpu.memory_space<vmem>>, vector<48x64xf32>
    %cst_130 = arith.constant dense<0.000000e+00> : vector<24x64xf32>
    %292 = tpu.matmul %290, %291, %cst_130 {dimension_numbers = #tpu.dot_dimension_numbers<[1], [0], [0], [1], [0, 0, 1, 1], [], []>} : vector<24x48xf32>, vector<48x64xf32>, vector<24x64xf32> -> vector<24x64xf32>
    %c0_131 = arith.constant 0 : index
    %c0_132 = arith.constant 0 : index
    %c0_133 = arith.constant 0 : index
    %293 = vector.load %arg14[%c0_131, %c0_132, %c0_133] : memref<1x64x64xf32, #tpu.memory_space<vmem>>, vector<1x64x64xf32>
    %294 = vector.shape_cast %293 : vector<1x64x64xf32> to vector<64x64xf32>
    %cst_134 = arith.constant dense<0.000000e+00> : vector<24x64xf32>
    %295 = tpu.matmul %292, %294, %cst_134 {dimension_numbers = #tpu.dot_dimension_numbers<[1], [0], [0], [1], [0, 0, 1, 1], [], []>} : vector<24x64xf32>, vector<64x64xf32>, vector<24x64xf32> -> vector<24x64xf32>
    %c0_135 = arith.constant 0 : index
    %c0_136 = arith.constant 0 : index
    %c0_137 = arith.constant 0 : index
    %296 = vector.load %arg15[%c0_135, %c0_136, %c0_137] : memref<1x1x64xf32, #tpu.memory_space<vmem>>, vector<1x1x64xf32>
    %297 = vector.shape_cast %296 : vector<1x1x64xf32> to vector<1x64xf32>
    %298 = vector.broadcast %297 : vector<1x64xf32> to vector<24x64xf32>
    %299 = arith.addf %295, %298 : vector<24x64xf32>
    %300 = arith.addf %299, %3 : vector<24x64xf32>
    %c0_138 = arith.constant 0 : index
    %c0_139 = arith.constant 0 : index
    %c0_140 = arith.constant 0 : index
    %301 = vector.load %arg22[%c0_138, %c0_139, %c0_140] : memref<1x1x64xf32, #tpu.memory_space<vmem>>, vector<1x1x64xf32>
    %302 = vector.shape_cast %301 : vector<1x1x64xf32> to vector<1x64xf32>
    %303 = vector.broadcast %302 : vector<1x64xf32> to vector<24x64xf32>
    %304 = arith.mulf %300, %303 : vector<24x64xf32>
    %c0_141 = arith.constant 0 : index
    %c0_142 = arith.constant 0 : index
    %c0_143 = arith.constant 0 : index
    %305 = vector.load %arg23[%c0_141, %c0_142, %c0_143] : memref<1x1x64xf32, #tpu.memory_space<vmem>>, vector<1x1x64xf32>
    %306 = vector.shape_cast %305 : vector<1x1x64xf32> to vector<1x64xf32>
    %307 = vector.broadcast %306 : vector<1x64xf32> to vector<24x64xf32>
    %308 = arith.addf %304, %307 : vector<24x64xf32>
    %309 = arith.addf %37, %308 : vector<24x64xf32>
    %c0_144 = arith.constant 0 : index
    %c0_145 = arith.constant 0 : index
    %c0_146 = arith.constant 0 : index
    %310 = vector.load %arg16[%c0_144, %c0_145, %c0_146] : memref<1x64x128xf32, #tpu.memory_space<vmem>>, vector<1x64x128xf32>
    %311 = vector.shape_cast %310 : vector<1x64x128xf32> to vector<64x128xf32>
    %cst_147 = arith.constant dense<0.000000e+00> : vector<24x128xf32>
    %312 = tpu.matmul %309, %311, %cst_147 {dimension_numbers = #tpu.dot_dimension_numbers<[1], [0], [0], [1], [0, 0, 1, 1], [], []>} : vector<24x64xf32>, vector<64x128xf32>, vector<24x128xf32> -> vector<24x128xf32>
    %c0_148 = arith.constant 0 : index
    %c0_149 = arith.constant 0 : index
    %c0_150 = arith.constant 0 : index
    %313 = vector.load %arg17[%c0_148, %c0_149, %c0_150] : memref<1x1x128xf32, #tpu.memory_space<vmem>>, vector<1x1x128xf32>
    %314 = vector.shape_cast %313 : vector<1x1x128xf32> to vector<1x128xf32>
    %315 = vector.broadcast %314 : vector<1x128xf32> to vector<24x128xf32>
    %316 = arith.addf %312, %315 : vector<24x128xf32>
    %cst_151 = arith.constant 0.000000e+00 : f32
    %317 = vector.broadcast %cst_151 : f32 to vector<24x128xf32>
    %318 = arith.maximumf %316, %317 : vector<24x128xf32>
    %c0_152 = arith.constant 0 : index
    %c0_153 = arith.constant 0 : index
    %c0_154 = arith.constant 0 : index
    %319 = vector.load %arg18[%c0_152, %c0_153, %c0_154] : memref<1x128x64xf32, #tpu.memory_space<vmem>>, vector<1x128x64xf32>
    %320 = vector.shape_cast %319 : vector<1x128x64xf32> to vector<128x64xf32>
    %cst_155 = arith.constant dense<0.000000e+00> : vector<24x64xf32>
    %321 = tpu.matmul %318, %320, %cst_155 {dimension_numbers = #tpu.dot_dimension_numbers<[1], [0], [0], [1], [0, 0, 1, 1], [], []>} : vector<24x128xf32>, vector<128x64xf32>, vector<24x64xf32> -> vector<24x64xf32>
    %c0_156 = arith.constant 0 : index
    %c0_157 = arith.constant 0 : index
    %c0_158 = arith.constant 0 : index
    %322 = vector.load %arg19[%c0_156, %c0_157, %c0_158] : memref<1x1x64xf32, #tpu.memory_space<vmem>>, vector<1x1x64xf32>
    %323 = vector.shape_cast %322 : vector<1x1x64xf32> to vector<1x64xf32>
    %324 = vector.broadcast %323 : vector<1x64xf32> to vector<24x64xf32>
    %325 = arith.addf %321, %324 : vector<24x64xf32>
    %326 = arith.addf %309, %325 : vector<24x64xf32>
    %c0_159 = arith.constant 0 : index
    %c0_160 = arith.constant 0 : index
    %c0_161 = arith.constant 0 : index
    %327 = vector.load %arg24[%c0_159, %c0_160, %c0_161] : memref<1x1x64xf32, #tpu.memory_space<vmem>>, vector<1x1x64xf32>
    %328 = vector.shape_cast %327 : vector<1x1x64xf32> to vector<1x64xf32>
    %329 = vector.broadcast %328 : vector<1x64xf32> to vector<24x64xf32>
    %330 = arith.mulf %326, %329 : vector<24x64xf32>
    %c0_162 = arith.constant 0 : index
    %c0_163 = arith.constant 0 : index
    %c0_164 = arith.constant 0 : index
    %331 = vector.load %arg25[%c0_162, %c0_163, %c0_164] : memref<1x1x64xf32, #tpu.memory_space<vmem>>, vector<1x1x64xf32>
    %332 = vector.shape_cast %331 : vector<1x1x64xf32> to vector<1x64xf32>
    %333 = vector.broadcast %332 : vector<1x64xf32> to vector<24x64xf32>
    %334 = arith.addf %330, %333 : vector<24x64xf32>
    %c0_165 = arith.constant 0 : index
    %c0_166 = arith.constant 0 : index
    %335 = vector.load %arg26[%c0_165, %c0_166] : memref<24x64xf32, #tpu.memory_space<vmem>>, vector<24x64xf32>
    tpu.vector_store %arg26[%c0_165, %c0_166], %334 {strides = array<i32>} : memref<24x64xf32, #tpu.memory_space<vmem>>, vector<24x64xf32>,
    return
  }
  func.func @transform_0(%arg0: i32) -> (i32, i32) {
    %c0_i32 = arith.constant 0 : i32
    %c0_i32_0 = arith.constant 0 : i32
    %c0_i32_1 = arith.constant 0 : i32
    return %c0_i32, %c0_i32_0 : i32, i32
  }
  func.func @transform_1(%arg0: i32) -> (i32, i32) {
    %c0_i32 = arith.constant 0 : i32
    %c0_i32_0 = arith.constant 0 : i32
    %c0_i32_1 = arith.constant 0 : i32
    return %c0_i32, %c0_i32_0 : i32, i32
  }
  func.func @transform_2(%arg0: i32) -> (i32, i32) {
    %c0_i32 = arith.constant 0 : i32
    %c0_i32_0 = arith.constant 0 : i32
    %c0_i32_1 = arith.constant 0 : i32
    return %c0_i32, %c0_i32_0 : i32, i32
  }
  func.func @transform_3(%arg0: i32) -> (i32, i32) {
    %c0_i32 = arith.constant 0 : i32
    %c0_i32_0 = arith.constant 0 : i32
    %c0_i32_1 = arith.constant 0 : i32
    return %c0_i32, %c0_i32_0 : i32, i32
  }
  func.func @transform_4(%arg0: i32) -> (i32, i32) {
    %c0_i32 = arith.constant 0 : i32
    %c0_i32_0 = arith.constant 0 : i32
    %c0_i32_1 = arith.constant 0 : i32
    return %c0_i32, %c0_i32_0 : i32, i32
  }
  func.func @transform_5(%arg0: i32) -> (i32, i32) {
    %c0_i32 = arith.constant 0 : i32
    %c0_i32_0 = arith.constant 0 : i32
    %c0_i32_1 = arith.constant 0 : i32
    return %c0_i32, %c0_i32_0 : i32, i32
  }
  func.func @transform_6(%arg0: i32) -> (i32, i32) {
    %c0_i32 = arith.constant 0 : i32
    %c0_i32_0 = arith.constant 0 : i32
    %c0_i32_1 = arith.constant 0 : i32
    return %c0_i32, %c0_i32_0 : i32, i32
  }
  func.func @transform_7(%arg0: i32) -> (i32, i32, i32) {
    %c0_i32 = arith.constant 0 : i32
    %c0_i32_0 = arith.constant 0 : i32
    %c0_i32_1 = arith.constant 0 : i32
    return %arg0, %c0_i32, %c0_i32_0 : i32, i32, i32
  }
  func.func @transform_8(%arg0: i32) -> (i32, i32, i32) {
    %c0_i32 = arith.constant 0 : i32
    %c0_i32_0 = arith.constant 0 : i32
    %c0_i32_1 = arith.constant 0 : i32
    return %arg0, %c0_i32, %c0_i32_0 : i32, i32, i32
  }
  func.func @transform_9(%arg0: i32) -> (i32, i32, i32) {
    %c0_i32 = arith.constant 0 : i32
    %c0_i32_0 = arith.constant 0 : i32
    %c0_i32_1 = arith.constant 0 : i32
    return %arg0, %c0_i32, %c0_i32_0 : i32, i32, i32
  }
  func.func @transform_10(%arg0: i32) -> (i32, i32, i32) {
    %c0_i32 = arith.constant 0 : i32
    %c0_i32_0 = arith.constant 0 : i32
    %c0_i32_1 = arith.constant 0 : i32
    return %arg0, %c0_i32, %c0_i32_0 : i32, i32, i32
  }
  func.func @transform_11(%arg0: i32) -> (i32, i32, i32) {
    %c0_i32 = arith.constant 0 : i32
    %c0_i32_0 = arith.constant 0 : i32
    %c0_i32_1 = arith.constant 0 : i32
    return %arg0, %c0_i32, %c0_i32_0 : i32, i32, i32
  }
  func.func @transform_12(%arg0: i32) -> (i32, i32, i32) {
    %c0_i32 = arith.constant 0 : i32
    %c0_i32_0 = arith.constant 0 : i32
    %c0_i32_1 = arith.constant 0 : i32
    return %arg0, %c0_i32, %c0_i32_0 : i32, i32, i32
  }
  func.func @transform_13(%arg0: i32) -> (i32, i32, i32) {
    %c0_i32 = arith.constant 0 : i32
    %c0_i32_0 = arith.constant 0 : i32
    %c0_i32_1 = arith.constant 0 : i32
    return %arg0, %c0_i32, %c0_i32_0 : i32, i32, i32
  }
  func.func @transform_14(%arg0: i32) -> (i32, i32, i32) {
    %c0_i32 = arith.constant 0 : i32
    %c0_i32_0 = arith.constant 0 : i32
    %c0_i32_1 = arith.constant 0 : i32
    return %arg0, %c0_i32, %c0_i32_0 : i32, i32, i32
  }
  func.func @transform_15(%arg0: i32) -> (i32, i32, i32) {
    %c0_i32 = arith.constant 0 : i32
    %c0_i32_0 = arith.constant 0 : i32
    %c0_i32_1 = arith.constant 0 : i32
    return %arg0, %c0_i32, %c0_i32_0 : i32, i32, i32
  }
  func.func @transform_16(%arg0: i32) -> (i32, i32, i32) {
    %c0_i32 = arith.constant 0 : i32
    %c0_i32_0 = arith.constant 0 : i32
    %c0_i32_1 = arith.constant 0 : i32
    return %arg0, %c0_i32, %c0_i32_0 : i32, i32, i32
  }
  func.func @transform_17(%arg0: i32) -> (i32, i32, i32) {
    %c0_i32 = arith.constant 0 : i32
    %c0_i32_0 = arith.constant 0 : i32
    %c0_i32_1 = arith.constant 0 : i32
    return %arg0, %c0_i32, %c0_i32_0 : i32, i32, i32
  }
  func.func @transform_18(%arg0: i32) -> (i32, i32, i32) {
    %c0_i32 = arith.constant 0 : i32
    %c0_i32_0 = arith.constant 0 : i32
    %c0_i32_1 = arith.constant 0 : i32
    return %arg0, %c0_i32, %c0_i32_0 : i32, i32, i32
  }
  func.func @transform_19(%arg0: i32) -> (i32, i32, i32) {
    %c0_i32 = arith.constant 0 : i32
    %c0_i32_0 = arith.constant 0 : i32
    %c0_i32_1 = arith.constant 0 : i32
    return %arg0, %c0_i32, %c0_i32_0 : i32, i32, i32
  }
  func.func @transform_20(%arg0: i32) -> (i32, i32, i32) {
    %c0_i32 = arith.constant 0 : i32
    %c0_i32_0 = arith.constant 0 : i32
    %c0_i32_1 = arith.constant 0 : i32
    return %arg0, %c0_i32, %c0_i32_0 : i32, i32, i32
  }
  func.func @transform_21(%arg0: i32) -> (i32, i32, i32) {
    %c0_i32 = arith.constant 0 : i32
    %c0_i32_0 = arith.constant 0 : i32
    %c0_i32_1 = arith.constant 0 : i32
    return %arg0, %c0_i32, %c0_i32_0 : i32, i32, i32
  }
  func.func @transform_22(%arg0: i32) -> (i32, i32, i32) {
    %c0_i32 = arith.constant 0 : i32
    %c0_i32_0 = arith.constant 0 : i32
    %c0_i32_1 = arith.constant 0 : i32
    return %arg0, %c0_i32, %c0_i32_0 : i32, i32, i32
  }
  func.func @transform_23(%arg0: i32) -> (i32, i32, i32) {
    %c0_i32 = arith.constant 0 : i32
    %c0_i32_0 = arith.constant 0 : i32
    %c0_i32_1 = arith.constant 0 : i32
    return %arg0, %c0_i32, %c0_i32_0 : i32, i32, i32
  }
  func.func @transform_24(%arg0: i32) -> (i32, i32, i32) {
    %c0_i32 = arith.constant 0 : i32
    %c0_i32_0 = arith.constant 0 : i32
    %c0_i32_1 = arith.constant 0 : i32
    return %arg0, %c0_i32, %c0_i32_0 : i32, i32, i32
  }
  func.func @transform_25(%arg0: i32) -> (i32, i32) {
    %c0_i32 = arith.constant 0 : i32
    %c0_i32_0 = arith.constant 0 : i32
    %c0_i32_1 = arith.constant 0 : i32
    return %c0_i32, %c0_i32_0 : i32, i32
  }
}

</mosaic_0001>

<bundles_post_ra>
// kernel: forward.3
= control target key start
LH: loop header
LB: loop body
LE: loop exit
PB: predicated region body
PF: predicated region fallthrough
CT: control target
= control target key end

     0   :  { %v492_v0 = vmov 0.0|0.0   ;;  %vm45_vm0 = vcmask 1043456   ;;  %vm493_vm1 = vmmov 0   ;;  %v494_v6 = vmov 0.0   ;;  %s673_s1 = inlined_call_operand.vmem [shape: f32[28,56], index: 1, kind: input, shape index: {}]   ;;  %s674_s3 = inlined_call_operand.vmem [shape: f32[20,8], index: 3, kind: input, shape index: {}]   ;;  %s675_s0 = inlined_call_operand.vmem [shape: f32[24,28], index: 0, kind: input, shape index: {}]   ;;  %s676_s2 = inlined_call_operand.vmem [shape: f32[24,20], index: 2, kind: input, shape index: {}]   ;;  %s677_s6 = inlined_call_operand.vmem [shape: f32[4,64], index: 6, kind: input, shape index: {}]   ;;  %s678_s5 = inlined_call_operand.vmem [shape: f32[48,4], index: 5, kind: input, shape index: {}]   ;;  %s679_s7 = inlined_call_operand.vmem [shape: f32[24,64], index: 7, kind: output, shape index: {0}]   ;;  %s680_s4 = inlined_call_operand.vmem [shape: f32[1,8], index: 4, kind: input, shape index: {}]   ;;  %s681_s8 = inlined_call_operand.vmem [shape: f32[48,64], index: 8, kind: output, shape index: {1}]  }
   0x1   :  { %473 = vmatprep.subr.bf16.mxu0 %v492_v0  ;;  %v31_v1 = vld [vmem:[%s673_s1] sm:$0xff]  ;;  %v32_v2 = vld [vmem:[%s673_s1 + $0x8] sm:$0xff]  ;;  %v33_v3 = vld [vmem:[%s673_s1 + $0x10] sm:$0xff]  ;;  %483 = vmatprep.subr.bf16.mxu1 %v492_v0  ;;  %vm495_vm2 = vmmov 1   ;;  %vm35_vm4 = vcmask 228352   ;;  %vm146_vm5 = vcmask 162816  }
   0x2   :  { %v474_v4 = vpack.c.bf16 %v32_v2, %v31_v1  ;;  %v34_v5 = vld [vmem:[%s673_s1 + $0x18] sm:$0xf]  ;;  %438 = vmatprep.mubr.msk.f32.mxu0 %vm493_vm1, %v494_v6  ;;  %456 = vmatprep.mubr.msk.f32.mxu1 %vm493_vm1, %v494_v6  ;;  %v136_v7 = vld [vmem:[%s674_s3] sm:$0xff]  ;;  %v137_v8 = vld [vmem:[%s674_s3 + $0x8] sm:$0xff]  ;;  %vm262_vm6 = vcmask 31744   ;;  %vm129_vm7 = vcmask 457728  }
   0x3   :  { %v477_v9 = vpack.c.bf16 %v34_v5, %v33_v3  ;;  %v481_v10 = vpack.c.bf16 %v137_v8, %v136_v7  ;;  %vm478_vm3 = vmpackc.low %vm45_vm0, %vm495_vm2  ;;  %v138_v11 = vld [vmem:[%s674_s3 + $0x10] sm:$0xf]  ;;  %v28_v12 = vld [vmem:[%s675_s0] sm:$0xff]  ;;  %vm379_vm8 = vcmask 523264   ;;  %s496_s3 = smov 56   ;;  %vm251_vm9 = vcmask 523712  }
   0x4   :  { %475 = vmatpush3.bf16.msra.mxu0 %v474_v4  ;;  %v134_v13 = vld [vmem:[%s676_s2 + $0x8] sm:$0xff]  ;;  %v261_v14 = vld [vmem:[%s677_s6] sm:$0xf]  ;;  %v135_v16 = vld [vmem:[%s676_s2 + $0x10] sm:$0xff] }
   0x5   :  { %476 = vmatprep.subr.bf16.mxu0 %v492_v0  ;;  %485 = vmatpush3.bf16.msra.mxu1 %v481_v10  ;;  %v29_v15 = vld [vmem:[%s675_s0 + $0x8] sm:$0xff]  ;;  %v255_v17 = vld [vmem:[%s678_s5] sm:$0xff]  ;;  %v30_v18 = vld [vmem:[%s675_s0 + $0x10] sm:$0xff] }
   0x6   :  { %484 = vmatprep.subr.mxu1 %v494_v6  ;;  %v256_v19 = vld [vmem:[%s678_s5 + $0x8] sm:$0xff]  ;;  %v257_v20 = vld [vmem:[%s678_s5 + $0x10] sm:$0xff]  ;;  %v133_v21 = vld [vmem:[%s676_s2] sm:$0xff] }
   0x7   :  { %v258_v22 = vld [vmem:[%s678_s5 + $0x18] sm:$0xff]  ;;  %v259_v23 = vld [vmem:[%s678_s5 + $0x20] sm:$0xff]  ;;  %v260_v24 = vld [vmem:[%s678_s5 + $0x28] sm:$0xff] }
   0x8   :  { %479 = vmatpush3.bf16.msk.msra.mxu0 %vm478_vm3, %v477_v9  ;;  %v398_v30 = vld [vmem:[%s680_s4] ss:$0 sm:$0xff] }
   0x9   :  { %480 = vmatprep.subr.bf16.mxu0 %v492_v0  ;;  %486 = vmatpush3.msk.msra.mxu1 %vm45_vm0, %v138_v11 }
   0xa   :  { %457 = vmatmul.mubr.msk.f32.vlgmr.msra.gmra.mrb[0].mxu1 %vm146_vm5, %v134_v13  ;;  %462 = vmatprep.subr.msk.mxu1 %vm45_vm0, %v261_v14 }
   0xb   :  { %439 = vmatmul.mubr.msk.f32.vlgmr.msra.gmra.mrb[0].mxu0 %vm35_vm4, %v28_v12  ;;  %459 = vmatprep.mubr.msk.f32.mxu1 %vm493_vm1, %v494_v6 }
   0xc   :  { %482 = vmatpush3.bf16.msra.mxu0 %v481_v10  ;;  %441 = vmatprep.mubr.msk.f32.mxu0 %vm493_vm1, %v494_v6 }
   0xd   :  { %451 = vmatprep.subr.mxu0 %v494_v6  ;;  %463 = vmatpush3.msk.msra.mxu1 %vm45_vm0, %v261_v14 }
   0xe   :  { %460 = vmatmul.mubr.msk.f32.gmra.mrb[2].mxu1 %vm146_vm5, %v135_v16 }
   0xf   :  { %442 = vmatmul.mubr.msk.f32.gmra.mrb[2].mxu0 %vm35_vm4, %v29_v15  ;;  %464 = vmatprep.mubr.msk.f32.mxu1 %vm262_vm6, %v255_v17 }
  0x10   :  { %444 = vmatprep.mubr.msk.f32.mxu0 %vm493_vm1, %v494_v6  ;;  %452 = vmatpush3.msk.msra.mxu0 %vm45_vm0, %v138_v11 }
  0x12   :  { %465 = vmatmul.mubr.msk.f32.vlgmr.msra.gmra.mrb[4].mxu1 %vm262_vm6, %v256_v19 }
  0x13   :  { %445 = vmatmul.mubr.msk.f32.gmra.mrb[4].mxu0 %vm35_vm4, %v30_v18  ;;  %467 = vmatprep.mubr.msk.f32.mxu1 %vm262_vm6, %v257_v20 }
  0x14   :  { %453 = vmatprep.mubr.msk.f32.mxu0 %vm493_vm1, %v494_v6 }
  0x16   :  { %468 = vmatmul.mubr.msk.f32.gmra.mrb[6].mxu1 %vm262_vm6, %v258_v22 }
  0x17   :  { %454 = vmatmul.mubr.msk.f32.vlgmr.msra.gmra.mrb[6].mxu0 %vm146_vm5, %v133_v21  ;;  %470 = vmatprep.mubr.msk.f32.mxu1 %vm262_vm6, %v259_v23 }
  0x1a   :  { %471 = vmatmul.mubr.msk.f32.gmra.mrb[8].mxu1 %vm262_vm6, %v260_v24 }
  0xdd   :  { %v230_v26 = vpop.f32.mrb[0].mxu1 }
  0xde   :  { %v115_v25 = vpop.f32.mrb[0].mxu0  ;;  %v458_v28 = vpop.f32.mrb[1].mxu1  ;;  %v231_v45 = vadd.f32 %v398_v30, %v230_v26 }
  0xdf   :  { %130 = vst.msk [vmem:[%s679_s7] sm:$0xff] %vm129_vm7, %v115_v25  ;;  %v440_v27 = vpop.f32.mrb[1].mxu0 }
  0xe1   :  { %v235_v31 = vpop.f32.mrb[2].mxu1 }
  0xe2   :  { %v120_v29 = vpop.f32.mrb[2].mxu0  ;;  %v236_v33 = vadd.f32 %v398_v30, %v235_v31  ;;  %v461_v34 = vpop.f32.mrb[3].mxu1 }
  0xe3   :  { %131 = vst.msk [vmem:[%s679_s7 + $0x8] sm:$0xff] %vm129_vm7, %v120_v29  ;;  %v443_v32 = vpop.f32.mrb[3].mxu0 }
  0xe4   :  { %246 = vrot.lane.b32.xlu1 %v236_v33, %s496_s3 }
  0xe5   :  { %v466_v36 = vpop.f32.mrb[4].mxu1 }
  0xe6   :  { %v125_v35 = vpop.f32.mrb[4].mxu0  ;;  %381 = vst.msk [vmem:[%s681_s8 + $0x8] sm:$0xff] %vm379_vm8, %v466_v36  ;;  %v350_v38 = vpop.f32.mrb[5].mxu1 }
  0xe7   :  { %132 = vst.msk [vmem:[%s679_s7 + $0x10] sm:$0xff] %vm129_vm7, %v125_v35  ;;  %v446_v37 = vpop.f32.mrb[5].mxu0 }
  0xe8   :  { %380 = vst.msk [vmem:[%s681_s8] sm:$0xff] %vm379_vm8, %v350_v38 }
  0xe9   :  { %v469_v40 = vpop.f32.mrb[6].mxu1 }
  0xea   :  { %v225_v39 = vpop.f32.mrb[6].mxu0  ;;  %383 = vst.msk [vmem:[%s681_s8 + $0x18] sm:$0xff] %vm379_vm8, %v469_v40  ;;  %v360_v43 = vpop.f32.mrb[7].mxu1 }
  0xeb   :  { %v226_v41 = vadd.f32 %v398_v30, %v225_v39  ;;  %v455_v42 = vpop.f32.mrb[7].mxu0  ;;  %382 = vst.msk [vmem:[%s681_s8 + $0x10] sm:$0xff] %vm379_vm8, %v360_v43 }
  0xed   :  { %242 = vrot.lane.b32.xlu0 %v226_v41, %s496_s3  ;;  %v472_v44 = vpop.f32.mrb[8].mxu1 }
  0xee   :  { %385 = vst.msk [vmem:[%s681_s8 + $0x28] sm:$0xff] %vm379_vm8, %v472_v44  ;;  %v370_v46 = vpop.f32.mrb[9].mxu1 }
  0xef   :  { %384 = vst.msk [vmem:[%s681_s8 + $0x20] sm:$0xff] %vm379_vm8, %v370_v46 }
  0xf1   :  { %244 = vrot.lane.b32.xlu0 %v231_v45, %s496_s3 }
 0x156   :  { %v247_v47 = vpop.permute.xlu1 %246 }
 0x157   :  { %254 = vst.msk [vmem:[%s679_s7 + $0x10] sm:$0xff] %vm251_vm9, %v247_v47 }
 0x15f   :  { %v243_v48 = vpop.permute.xlu0 %242 }
 0x160   :  { %252 = vst.msk [vmem:[%s679_s7] sm:$0xff] %vm251_vm9, %v243_v48 }
 0x163   :  { %v245_v49 = vpop.permute.xlu0 %244 }
 0x164   :  { %253 = vst.msk [vmem:[%s679_s7 + $0x8] sm:$0xff] %vm251_vm9, %v245_v49 }

// kernel: forward.5
= control target key start
LH: loop header
LB: loop body
LE: loop exit
PB: predicated region body
PF: predicated region fallthrough
CT: control target
= control target key end

     0   :  { %v475_v0 = vmov 0.0|0.0   ;;  %vm476_vm0 = vmmov 0   ;;  %v477_v3 = vmov 0.0   ;;  %vm35_vm1 = vcmask 195584   ;;  %s593_s1 = inlined_call_operand.vmem [shape: f32[24,64], index: 1, kind: input, shape index: {}]   ;;  %s594_s2 = inlined_call_operand.vmem [shape: f32[64,32], index: 2, kind: input, shape index: {}]   ;;  %s595_s0 = inlined_call_operand.vmem [shape: f32[3,24], index: 0, kind: input, shape index: {}]   ;;  %s596_s4 = inlined_call_operand.vmem [shape: f32[32,16], index: 4, kind: input, shape index: {}]   ;;  %s597_s3 = inlined_call_operand.vmem [shape: f32[1,32], index: 3, kind: input, shape index: {}]   ;;  %s598_s6 = inlined_call_operand.vmem [shape: f32[16,1], index: 6, kind: input, shape index: {}]   ;;  %s599_s7 = inlined_call_operand.<no memory space> [shape: f32[1,1], index: 7, kind: input, shape index: {}]   ;;  %s600_s5 = inlined_call_operand.vmem [shape: f32[1,16], index: 5, kind: input, shape index: {}]   ;;  %s601_s8 = inlined_call_operand.vmem [shape: f32[3,1], index: 8, kind: output, shape index: {}]  }
   0x1   :  { %448 = vmatprep.subr.bf16.mxu0 %v475_v0  ;;  %v32_v1 = vld [vmem:[%s593_s1] sm:$0xff]  ;;  %v33_v2 = vld [vmem:[%s593_s1 + $0x8] sm:$0xff]  ;;  %408 = vmatprep.mubr.msk.f32.mxu0 %vm476_vm0, %v477_v3  ;;  %v111_v8 = vld [vmem:[%s594_s2 + $0x10] sm:$0xff]  ;;  %vm124_vm2 = vcmask 523264   ;;  %vm210_vm3 = vcmask 261120   ;;  %v13_v35 = vstv %s599_s7  ;;  %vm294_vm4 = vcmask 130048  }
   0x2   :  { %v449_v4 = vpack.c.bf16 %v33_v2, %v32_v1  ;;  %451 = vmatprep.subr.bf16.mxu1 %v475_v0  ;;  %v109_v5 = vld [vmem:[%s594_s2] sm:$0xff]  ;;  %v110_v6 = vld [vmem:[%s594_s2 + $0x8] sm:$0xff]  ;;  %427 = vmatprep.mubr.msk.f32.mxu1 %vm476_vm0, %v477_v3  ;;  %v112_v9 = vld [vmem:[%s594_s2 + $0x18] sm:$0xff]  ;;  %14 = vst [vmem:[#allocation2] sm:$0x1] %v13_v35  ;;  %vm368_vm5 = vcmask 2048  }
   0x3   :  { %v452_v7 = vpack.c.bf16 %v110_v6, %v109_v5  ;;  %v34_v10 = vld [vmem:[%s593_s1 + $0x10] sm:$0xff]  ;;  %v455_v11 = vpack.c.bf16 %v112_v9, %v111_v8  ;;  %v31_v12 = vld [vmem:[%s595_s0] sm:$0x7]  ;;  %v114_v14 = vld [vmem:[%s594_s2 + $0x28] sm:$0xff] }
   0x4   :  { %450 = vmatpush3.bf16.msra.mxu0 %v449_v4  ;;  %v113_v13 = vld [vmem:[%s594_s2 + $0x20] sm:$0xff]  ;;  %v115_v16 = vld [vmem:[%s594_s2 + $0x30] sm:$0xff]  ;;  %v116_v17 = vld [vmem:[%s594_s2 + $0x38] sm:$0xff] }
   0x5   :  { %406 = vmatprep.subr.mxu0 %v477_v3  ;;  %453 = vmatpush3.bf16.msra.mxu1 %v452_v7  ;;  %v458_v15 = vpack.c.bf16 %v114_v14, %v113_v13  ;;  %v461_v18 = vpack.c.bf16 %v116_v17, %v115_v16  ;;  %v199_v19 = vld [vmem:[%s596_s4] sm:$0xff]  ;;  %v200_v20 = vld [vmem:[%s596_s4 + $0x8] sm:$0xff]  ;;  %v201_v24 = vld [vmem:[%s596_s4 + $0x10] sm:$0xff] }
   0x6   :  { %454 = vmatprep.subr.bf16.mxu1 %v475_v0  ;;  %v464_v21 = vpack.c.bf16 %v200_v20, %v199_v19  ;;  %v202_v25 = vld [vmem:[%s596_s4 + $0x18] sm:$0xff]  ;;  %v375_v27 = vld [vmem:[%s597_s3] ss:$0 sm:$0xff]  ;;  %v286_v33 = vld [vmem:[%s598_s6 + $0x8] sm:$0xff] }
   0x7   :  { %v467_v26 = vpack.c.bf16 %v202_v25, %v201_v24  ;;  %v285_v32 = vld [vmem:[%s598_s6] sm:$0xff] }
   0x8   :  { %407 = vmatpush3.msra.mxu0 %v34_v10  ;;  %v470_v34 = vpack.c.bf16 %v286_v33, %v285_v32  ;;  %v377_v36 = vld [vmem:[%s600_s5] ss:$0 sm:$0xff] }
   0x9   :  { %409 = vmatmul.mubr.msk.f32.vlgmr.msra.gmra.mrb[0].mxu0 %vm35_vm1, %v31_v12  ;;  %456 = vmatpush3.bf16.msra.mxu1 %v455_v11  ;;  %v379_v41 = vld [vmem:[#allocation2] ss:$0 sm:$0xff] }
   0xa   :  { %457 = vmatprep.subr.bf16.mxu1 %v475_v0  ;;  %463 = vmatprep.subr.bf16.mxu0 %v475_v0 }
   0xb   :  { %438 = vmatprep.mubr.msk.f32.mxu0 %vm476_vm0, %v477_v3  ;;  %465 = vmatpush3.bf16.msra.mxu0 %v464_v21 }
   0xc   :  { %466 = vmatprep.subr.bf16.mxu0 %v475_v0 }
   0xd   :  { %459 = vmatpush3.bf16.msra.mxu1 %v458_v15 }
   0xe   :  { %460 = vmatprep.subr.bf16.mxu1 %v475_v0 }
   0xf   :  { %468 = vmatpush3.bf16.msra.mxu0 %v467_v26 }
  0x10   :  { %469 = vmatprep.subr.bf16.mxu0 %v475_v0 }
  0x11   :  { %462 = vmatpush3.bf16.msra.mxu1 %v461_v18 }
  0xdc   :  { %v105_v22 = vpop.f32.mrb[0].mxu0 }
  0xdd   :  { %v410_v23 = vpop.f32.mrb[1].mxu0  ;;  %428 = vmatmul.mubr.msk.f32.vlgmr.msra.gmra.mrb[0].mxu1 %vm124_vm2, %v105_v22 }
 0x1b0   :  { %v194_v28 = vpop.f32.mrb[0].mxu1 }
 0x1b1   :  { %v195_v29 = vadd.f32 %v375_v27, %v194_v28  ;;  %v429_v30 = vpop.f32.mrb[1].mxu1 }
 0x1b3   :  { %v198_v31 = vmax.f32 %v195_v29, 0.0 }
 0x1b5   :  { %439 = vmatmul.mubr.msk.f32.vlgmr.msra.gmra.mrb[2].mxu0 %vm210_vm3, %v198_v31 }
 0x1b6   :  { %445 = vmatprep.mubr.msk.f32.mxu0 %vm476_vm0, %v477_v3  ;;  %471 = vmatpush3.bf16.msra.mxu0 %v470_v34 }
 0x288   :  { %v280_v37 = vpop.f32.mrb[2].mxu0 }
 0x289   :  { %v281_v38 = vadd.f32 %v377_v36, %v280_v37  ;;  %v440_v39 = vpop.f32.mrb[3].mxu0 }
 0x28b   :  { %v284_v40 = vmax.f32 %v281_v38, 0.0 }
 0x28d   :  { %446 = vmatmul.mubr.msk.f32.vlgmr.msra.gmra.mrb[4].mxu0 %vm294_vm4, %v284_v40 }
 0x360   :  { %v364_v42 = vpop.f32.mrb[4].mxu0 }
 0x361   :  { %v365_v43 = vadd.f32 %v379_v41, %v364_v42  ;;  %v447_v44 = vpop.f32.mrb[5].mxu0 }
 0x363   :  { %369 = vst.msk [vmem:[%s601_s8] sm:$0x7] %vm368_vm5, %v365_v43 }

// kernel: forward.4
= control target key start
LH: loop header
LB: loop body
LE: loop exit
PB: predicated region body
PF: predicated region fallthrough
CT: control target
= control target key end

     0   :  { %s7926_s0 = inlined_call_operand.vmem [shape: f32[24,64], index: 0, kind: input, shape index: {}]   ;;  %s7927_s1 = inlined_call_operand.vmem [shape: f32[48,64], index: 1, kind: input, shape index: {}]   ;;  %s7928_s2 = inlined_call_operand.vmem [shape: f32[48,24], index: 2, kind: input, shape index: {}]   ;;  %s7929_s3 = inlined_call_operand.vmem [shape: f32[24,48], index: 3, kind: input, shape index: {}]   ;;  %s7930_s4 = inlined_call_operand.vmem [shape: f32[48,24], index: 4, kind: input, shape index: {}]   ;;  %s7931_s5 = inlined_call_operand.vmem [shape: f32[24,48], index: 5, kind: input, shape index: {}]   ;;  %s7932_s6 = inlined_call_operand.vmem [shape: f32[3,16], index: 6, kind: input, shape index: {}]   ;;  %s7933_s7 = inlined_call_operand.vmem [shape: f32[10,64,64], index: 7, kind: input, shape index: {}]   ;;  %s7934_s8 = inlined_call_operand.vmem [shape: f32[10,1,64], index: 8, kind: input, shape index: {}]   ;;  %s7935_s9 = inlined_call_operand.hbm [shape: f32[10,64,64], index: 9, kind: input, shape index: {}]   ;;  %s7936_s10 = inlined_call_operand.vmem [shape: f32[10,1,64], index: 10, kind: input, shape index: {}]   ;;  %s7937_s11 = inlined_call_operand.vmem [shape: f32[10,64,192], index: 11, kind: input, shape index: {}]   ;;  %s7938_s12 = inlined_call_operand.vmem [shape: f32[10,1,192], index: 12, kind: input, shape index: {}]   ;;  %s7939_s13 = inlined_call_operand.hbm [shape: f32[10,64,64], index: 13, kind: input, shape index: {}]   ;;  %s7940_s14 = inlined_call_operand.vmem [shape: f32[10,1,64], index: 14, kind: input, shape index: {}]   ;;  %s7941_s15 = inlined_call_operand.hbm [shape: f32[10,64,128], index: 15, kind: input, shape index: {}]   ;;  %s7942_s16 = inlined_call_operand.vmem [shape: f32[10,1,128], index: 16, kind: input, shape index: {}]   ;;  %s7943_s17 = inlined_call_operand.vmem [shape: f32[10,128,64], index: 17, kind: input, shape index: {}]   ;;  %s7944_s18 = inlined_call_operand.vmem [shape: f32[10,1,64], index: 18, kind: input, shape index: {}]   ;;  %s7945_s19 = inlined_call_operand.vmem [shape: f32[10,1,64], index: 19, kind: input, shape index: {}]   ;;  %s7946_s20 = inlined_call_operand.vmem [shape: f32[10,1,64], index: 20, kind: input, shape index: {}]   ;;  %s7947_s21 = inlined_call_operand.vmem [shape: f32[10,1,64], index: 21, kind: input, shape index: {}]   ;;  %s7948_s22 = inlined_call_operand.hbm [shape: f32[10,1,64], index: 22, kind: input, shape index: {}]   ;;  %s7949_s23 = inlined_call_operand.hbm [shape: f32[10,1,64], index: 23, kind: input, shape index: {}]   ;;  %s7950_s24 = inlined_call_operand.hbm [shape: f32[10,1,64], index: 24, kind: input, shape index: {}]   ;;  %s7951_s25 = inlined_call_operand.vmem [shape: f32[24,64], index: 25, kind: output, shape index: {}]  }
   0x1   :  { %7978 = sst [smem:[#allocation22_spill]] %s7926_s0 }
   0x2   :  { %7979 = sst [smem:[#allocation23_spill]] %s7927_s1 }
   0x3   :  { %7980 = sst [smem:[#allocation24_spill]] %s7928_s2 }
   0x4   :  { %7981 = sst [smem:[#allocation25_spill]] %s7929_s3 }
   0x5   :  { %7982 = sst [smem:[#allocation26_spill]] %s7930_s4 }
   0x6   :  { %7983 = sst [smem:[#allocation27_spill]] %s7931_s5 }
   0x7   :  { %7984 = sst [smem:[#allocation28_spill]] %s7932_s6 }
   0x8   :  { %7985 = sst [smem:[#allocation29_spill]] %s7933_s7 }
   0x9   :  { %7986 = sst [smem:[#allocation30_spill]] %s7934_s8 }
   0xa   :  { %7987 = sst [smem:[#allocation31_spill]] %s7935_s9 }
   0xb   :  { %7988 = sst [smem:[#allocation32_spill]] %s7937_s11 }
   0xc   :  { %7989 = sst [smem:[#allocation33_spill]] %s7938_s12 }
   0xd   :  { %7990 = sst [smem:[#allocation34_spill]] %s7939_s13 }
   0xe   :  { %7991 = sst [smem:[#allocation35_spill]] %s7940_s14 }
   0xf   :  { %7992 = sst [smem:[#allocation36_spill]] %s7941_s15 }
  0x10   :  { %7993 = sst [smem:[#allocation37_spill]] %s7942_s16 }
  0x11   :  { %7994 = sst [smem:[#allocation38_spill]] %s7943_s17 }
  0x12   :  { %7995 = sst [smem:[#allocation39_spill]] %s7944_s18 }
  0x13   :  { %7996 = sst [smem:[#allocation40_spill]] %s7945_s19 }
  0x14   :  { %7997 = sst [smem:[#allocation41_spill]] %s7946_s20 }
  0x15   :  { %7998 = sst [smem:[#allocation42_spill]] %s7947_s21 }
  0x16   :  { %7999 = sst [smem:[#allocation43_spill]] %s7948_s22 }
  0x17   :  { %8000 = sst [smem:[#allocation44_spill]] %s7949_s23 }
  0x18   :  { %8001 = sst [smem:[#allocation45_spill]] %s7950_s24 }
  0x19   :  { %8002 = sst [smem:[#allocation46_spill]] %s7951_s25 }
  0x1a   :  { %30 = vsyncpa [#allocation4], 0 }
  0x1b   :  { %32 = vsyncpa [#allocation4 + $0x1], 0 }
  0x1c   :  { %33 = vsyncpa [#allocation6], 0 }
  0x1d   :  { %35 = vsyncpa [#allocation6 + $0x1], 0 }
  0x1e   :  { %36 = vsyncpa [#allocation9], 0 }
  0x1f   :  { %38 = vsyncpa [#allocation9 + $0x1], 0 }
  0x20   :  { %39 = vsyncpa [#allocation12], 0 }
  0x21   :  { %41 = vsyncpa [#allocation12 + $0x1], 0  ;;  %s6766_s29 = smov 0   ;;  %s6768_s2 = smov 0  }
  0x22   :  { %s6770_s6 = smov 0   ;;  %s6772_s30 = smov 0  }
  0x23 LB: > { %8003 = sst [smem:[#allocation17_spill]] %s6608_s2  ;;  %s6785_s7 = sadd.s32 4294967295, %s6616_s30   ;;  %s6616_s30 = sphi %s6772_s30, %s8067_s30   ;;  %s6612_s6 = sphi %s6770_s6, %s8070_s6   ;;  %s6608_s2 = sphi %s6768_s2, %s8069_s2   ;;  %s6604_s29 = sphi %s6766_s29, %s8068_s29  }
  0x24   : > { %8004 = sst [smem:[#allocation18_spill]] %s6612_s6  ;;  %s6788_s3 = sadd.s32 1, %s6616_s30  }
  0x25   : > { %8005 = sst [smem:[#allocation19_spill]] %s6788_s3  ;;  %s250_s26 = ssub.s32 %s6616_s30, %s6788_s3 }
  0x26   : > { %s253_s1 = sadd.s32 1, %s6612_s6  ;;  %p251_p0 = scmp.eq.s32.totalorder %s250_s26, 0 }
  0x27   : > { %p260_p1 = scmp.ne.s32.totalorder %s6612_s6, %s6608_s2  ;;  %p261_p2 = scmp.eq.s32.totalorder %s6616_s30, 0 }
  0x28   : > { %p266_p3 = scmp.ne.s32.totalorder %s6608_s2, %s6604_s29  ;;  %p267_p5 = scmp.eq.s32.totalorder %s6785_s7, 0 }
  0x29   : > { %s6798_s8 = scalar_select %p251_p0, %s6612_s6, %s253_s1  }
  0x2a   : > { %p262_p4 = por %p261_p2, %p260_p1  ;;  %p6141_p6 = scmp.lt.s32.totalorder %s6616_s30, 10 }
  0x2b   : > { %8006 = sst [smem:[#allocation20_spill]] %s6798_s8  ;;  %p6802_p7 = por %p267_p5, %p266_p3 }
  0x2c   : > { %s6807_s4 = sand.u32 1, %s6612_s6   ;;  %s6813_s9 = sshll.u32 %s6616_s30, 10 }
  0x2d   : > { %s8007_s27 = scalar_select %p6802_p7, 1, 0 }
  0x2e   : > { %s6810_s28 = sshll.u32 %s6807_s4, 6  ;;  %p6815_p8 = pnand %p6141_p6, %p262_p4 }
  0x2f   : > { %s7965_s0 = sand.u32 1, %s6616_s30   ;;  %s8009_s13 = sld [smem:[#allocation34_spill]] }
  0x30   : > { %s8008_s5 = scalar_select %p6815_p8, 1, 0 }
  0x31   : > { %s782_s8 = scalar_lea.vmem [#allocation5], %s6810_s28  ;;  %s6833_s3 = scalar_lea.sflag [#allocation6], %s7965_s0 }
  0x32   : > { %s789_s6 = sshll.u32 %s782_s8, 4  ;;  %p6839_p12 = pneg %p6815_p8  ;;  %s6828_s6 = int_to_ptr.vmem [resolvable:$true] %s789_s6 }
  0x35   : > { %s6824_s1 = scalar_lea.hbm %s8009_s13, %s6813_s9  ;;  %s6395_s21 = scalar_lea.hbm %s8009_s13, 10240 }
  0x36   : > { %s6390_s25 = scalar_lea.hbm %s6824_s1, 1024  ;;  %p6396_p1 = scmp.lt.u32.totalorder %s6824_s1, %s8009_s13 }
  0x37   : > { %p6391_p11 = scmp.ne.s32.totalorder %s6824_s1, %s6390_s25  ;;  %p6397_p2 = scmp.lt.u32.totalorder %s6395_s21, %s6390_s25 }
  0x38   : > { %p6399_p4 = scmp.lt.u32.totalorder %s6390_s25, %s6824_s1 }
  0x39   : > { %p6393_p13 = pnand %p6839_p12, %p6391_p11  ;;  %p6398_p3 = por %p6397_p2, %p6396_p1 }
  0x3b   : > { %p6394_p0 = pneg %p6393_p13  ;;  %p6400_p5 = por %p6399_p4, %p6398_p3 }
  0x3d   : > { %p6401_p6 = pnand %p6400_p5, %p6394_p0 }
  0x3f   : > { %6404 = shalt.err (!%p6401_p6)
}
  0x40   : > { %s6405_s0 = scalar_lea.vmem %s6828_s6, 1024  ;;  %s6618_s26 = smov [#allocation5]  }
  0x41   : > { %p6406_p11 = scmp.ne.s32.totalorder %s6828_s6, %s6405_s0  ;;  %s6410_s8 = sshll.u32 %s6618_s26, 4  ;;  %s6411_s8 = int_to_ptr.vmem [resolvable:$false] %s6410_s8 }
  0x42   : > { %s6412_s19 = scalar_lea.vmem %s6411_s8, 2048  ;;  %p6413_p10 = scmp.lt.s32.totalorder %s6828_s6, %s6411_s8 }
  0x43   : > { %p6408_p13 = pnand %p6406_p11, %p6839_p12  ;;  %p6414_p7 = scmp.lt.s32.totalorder %s6412_s19, %s6405_s0 }
  0x45   : > { %p6409_p9 = pneg %p6408_p13  ;;  %p6415_p1 = por %p6414_p7, %p6413_p10 }
  0x47   : > { %p6416_p2 = pnand %p6415_p1, %p6409_p9 }
  0x49   : > { %6419 = shalt.err (!%p6416_p2)
}
  0x4a   : > { %s7967_s20 = smov 128   ;;  %s7969_s21 = smov 8  }
  0x4b   : > { %6128 = dma.hbm_to_vmem [thread:$0]  (!%p6815_p8), %s6824_s1, 1024, %s6828_s6, %s6833_s3, %s7967_s20, %s7967_s20, %s7969_s21  }
  0x4c   : > { %p8011_p7 = scmp.lt.s32.totalorder %s6616_s30, 11  ;;  %p8012_p9 = scmp.ge.s32.totalorder %s6616_s30, 1 }
  0x4d   : > { %s6875_s0 = sshll.u32 %s6616_s30, 4  ;;  %s8014_s22 = sld [smem:[#allocation43_spill]] }
  0x4e   : > { %p6870_p10 = pnand %p8012_p9, %p8011_p7  ;;  %s867_s13 = scalar_lea.vmem [#allocation8], %s6807_s4 }
  0x4f   : > { %s874_s6 = sshll.u32 %s867_s13, 4  ;;  %s8015_s1 = sand.u32 1, %s6616_s30   ;;  %s875_s6 = int_to_ptr.vmem [resolvable:$true] %s874_s6 }
  0x50   : > { %s8013_s25 = scalar_select %p6870_p10, 1, 0 }
  0x51   : > { %s6886_s20 = scalar_lea.sflag [#allocation9], %s8015_s1 }
  0x53   : > { %s6881_s19 = scalar_lea.hbm %s8014_s22, %s6875_s0  ;;  %s6425_s26 = scalar_lea.hbm %s8014_s22, 160 }
  0x54   : > { %s6420_s21 = scalar_lea.hbm %s6881_s19, 16  ;;  %p6426_p5 = scmp.lt.u32.totalorder %s6881_s19, %s8014_s22 }
  0x55   : > { %p6421_p0 = scmp.ne.s32.totalorder %s6881_s19, %s6420_s21  ;;  %p6427_p6 = scmp.lt.u32.totalorder %s6425_s26, %s6420_s21 }
  0x56   : > { %p6429_p13 = scmp.lt.u32.totalorder %s6420_s21, %s6881_s19 }
  0x57   : > { %p6423_p3 = pnand %p6421_p0, %p6839_p12  ;;  %p6428_p11 = por %p6427_p6, %p6426_p5 }
  0x59   : > { %p6424_p4 = pneg %p6423_p3  ;;  %p6430_p1 = por %p6429_p13, %p6428_p11 }
  0x5b   : > { %p6431_p2 = pnand %p6430_p1, %p6424_p4 }
  0x5d   : > { %6434 = shalt.err (!%p6431_p2)
}
  0x5e   : > { %s6435_s13 = scalar_lea.vmem %s875_s6, 16  ;;  %s6621_s30 = smov [#allocation8]  }
  0x5f   : > { %p6436_p7 = scmp.ne.s32.totalorder %s875_s6, %s6435_s13  ;;  %s6440_s1 = sshll.u32 %s6621_s30, 4  ;;  %s6441_s1 = int_to_ptr.vmem [resolvable:$false] %s6440_s1 }
  0x60   : > { %s6442_s17 = scalar_lea.vmem %s6441_s1, 32  ;;  %p6443_p3 = scmp.lt.s32.totalorder %s875_s6, %s6441_s1 }
  0x61   : > { %p6438_p9 = pnand %p6436_p7, %p6839_p12  ;;  %p6444_p10 = scmp.lt.s32.totalorder %s6442_s17, %s6435_s13 }
  0x63   : > { %p6439_p0 = pneg %p6438_p9  ;;  %p6445_p8 = por %p6444_p10, %p6443_p3 }
  0x65   : > { %p6446_p5 = pnand %p6445_p8, %p6439_p0 }
  0x67   : > { %6449 = shalt.err (!%p6446_p5)
}
  0x68   : > { %p8016_p6 = scmp.ne.s32.totalorder %s8008_s5, 0  ;;  %s8017_s21 = sld [smem:[#allocation31_spill]] }
  0x69   : > { %s740_s8 = scalar_lea.vmem [#allocation3], %s6810_s28  ;;  %s8018_s15 = sld [smem:[#allocation36_spill]] }
  0x6a   : > { %6134 = dma.hbm_to_vmem [thread:$0]  (!%p8016_p6), %s6881_s19, 16, %s875_s6, %s6886_s20  }
  0x6b   : > { %s747_s13 = sshll.u32 %s740_s8, 4  ;;  %s737_s22 = scalar_lea.sflag [#allocation4], %s6807_s4  ;;  %s6913_s13 = int_to_ptr.vmem [resolvable:$true] %s747_s13 }
  0x6e   : > { %s6910_s26 = scalar_lea.hbm %s8017_s21, %s6813_s9  ;;  %s6455_s18 = scalar_lea.hbm %s8017_s21, 10240 }
  0x6f   : > { %s6919_s17 = scalar_lea.hbm %s8018_s15, %s6813_s9  ;;  %s6450_s19 = scalar_lea.hbm %s6910_s26, 1024 }
  0x70   : > { %p6451_p8 = scmp.ne.s32.totalorder %s6910_s26, %s6450_s19  ;;  %p6456_p11 = scmp.lt.u32.totalorder %s6910_s26, %s8017_s21 }
  0x71   : > { %p6457_p13 = scmp.lt.u32.totalorder %s6455_s18, %s6450_s19  ;;  %p6459_p2 = scmp.lt.u32.totalorder %s6450_s19, %s6910_s26 }
  0x72   : > { %p6453_p10 = pnand %p6451_p8, %p6839_p12 }
  0x73   : > { %p6458_p1 = por %p6457_p13, %p6456_p11 }
  0x74   : > { %p6454_p4 = pneg %p6453_p10 }
  0x75   : > { %p6460_p7 = por %p6459_p2, %p6458_p1 }
  0x77   : > { %p6461_p9 = pnand %p6460_p7, %p6454_p4 }
  0x79   : > { %6464 = shalt.err (!%p6461_p9)
}
  0x7a   : > { %s6465_s9 = scalar_lea.vmem %s6913_s13, 1024  ;;  %s6622_s8 = smov [#allocation3]  }
  0x7b   : > { %p6466_p0 = scmp.ne.s32.totalorder %s6913_s13, %s6465_s9  ;;  %s6470_s30 = sshll.u32 %s6622_s8, 4  ;;  %s6471_s30 = int_to_ptr.vmem [resolvable:$false] %s6470_s30 }
  0x7c   : > { %s6472_s12 = scalar_lea.vmem %s6471_s30, 2048  ;;  %p6473_p8 = scmp.lt.s32.totalorder %s6913_s13, %s6471_s30 }
  0x7d   : > { %p6468_p3 = pnand %p6466_p0, %p6839_p12  ;;  %p6474_p10 = scmp.lt.s32.totalorder %s6472_s12, %s6465_s9 }
  0x7f   : > { %p6469_p5 = pneg %p6468_p3  ;;  %p6475_p11 = por %p6474_p10, %p6473_p8 }
  0x81   : > { %p6476_p13 = pnand %p6475_p11, %p6469_p5 }
  0x83   : > { %6479 = shalt.err (!%p6476_p13)
}
  0x84   : > { %s8019_s14 = smov 8   ;;  %s8020_s1 = smov 128  }
  0x85   : > { %6125 = dma.hbm_to_vmem [thread:$0]  (!%p8016_p6), %s6910_s26, 1024, %s6913_s13, %s737_s22, %s8020_s1, %s8020_s1, %s8019_s14  }
  0x86   : > { %s809_s19 = scalar_lea.vmem [#allocation7], %s6810_s28  ;;  %s8021_s23 = sld [smem:[#allocation44_spill]] }
  0x87   : > { %s816_s6 = sshll.u32 %s809_s19, 4  ;;  %s6480_s8 = scalar_lea.hbm %s6919_s17, 1024  ;;  %s6949_s6 = int_to_ptr.vmem [resolvable:$true] %s816_s6 }
  0x88   : > { %p6481_p4 = scmp.ne.s32.totalorder %s6919_s17, %s6480_s8  ;;  %s6485_s21 = scalar_lea.hbm %s8018_s15, 10240 }
  0x89   : > { %p6486_p7 = scmp.lt.u32.totalorder %s6919_s17, %s8018_s15  ;;  %p6487_p9 = scmp.lt.u32.totalorder %s6485_s21, %s6480_s8 }
  0x8a   : > { %p6483_p1 = pnand %p6481_p4, %p6839_p12  ;;  %p6489_p3 = scmp.lt.u32.totalorder %s6480_s8, %s6919_s17 }
  0x8b   : > { %p6488_p0 = por %p6487_p9, %p6486_p7 }
  0x8c   : > { %s6955_s9 = scalar_lea.hbm %s8021_s23, %s6875_s0  ;;  %p6484_p2 = pneg %p6483_p1 }
  0x8d   : > { %p6490_p5 = por %p6489_p3, %p6488_p0 }
  0x8f   : > { %p6491_p8 = pnand %p6490_p5, %p6484_p2 }
  0x91   : > { %6494 = shalt.err (!%p6491_p8)
}
  0x92   : > { %s6495_s28 = scalar_lea.vmem %s6949_s6, 1024  ;;  %s6623_s26 = smov [#allocation7]  }
  0x93   : > { %p6496_p10 = scmp.ne.s32.totalorder %s6949_s6, %s6495_s28  ;;  %s6500_s13 = sshll.u32 %s6623_s26, 4  ;;  %s6501_s13 = int_to_ptr.vmem [resolvable:$false] %s6500_s13 }
  0x94   : > { %s6502_s11 = scalar_lea.vmem %s6501_s13, 2048  ;;  %p6503_p4 = scmp.lt.s32.totalorder %s6949_s6, %s6501_s13 }
  0x95   : > { %p6498_p11 = pnand %p6496_p10, %p6839_p12  ;;  %p6504_p1 = scmp.lt.s32.totalorder %s6502_s11, %s6495_s28 }
  0x97   : > { %p6499_p13 = pneg %p6498_p11  ;;  %p6505_p7 = por %p6504_p1, %p6503_p4 }
  0x99   : > { %p6506_p9 = pnand %p6505_p7, %p6499_p13 }
  0x9b   : > { %6509 = shalt.err (!%p6506_p9)
}
  0x9c   : > { %6131 = dma.hbm_to_vmem [thread:$0]  (!%p8016_p6), %s6919_s17, 1024, %s6949_s6, %s6833_s3, %s8020_s1, %s8020_s1, %s8019_s14  }
  0x9d   : > { %s884_s21 = scalar_lea.vmem [#allocation10], %s6807_s4  ;;  %s6510_s16 = scalar_lea.hbm %s6955_s9, 16 }
  0x9e   : > { %s891_s19 = sshll.u32 %s884_s21, 4  ;;  %p6511_p2 = scmp.ne.s32.totalorder %s6955_s9, %s6510_s16  ;;  %s892_s19 = int_to_ptr.vmem [resolvable:$true] %s891_s19 }
  0x9f   : > { %s6515_s30 = scalar_lea.hbm %s8021_s23, 160  ;;  %p6516_p5 = scmp.lt.u32.totalorder %s6955_s9, %s8021_s23 }
  0xa0   : > { %p6513_p0 = pnand %p6511_p2, %p6839_p12  ;;  %p6517_p8 = scmp.lt.u32.totalorder %s6515_s30, %s6510_s16 }
  0xa1   : > { %p6519_p11 = scmp.lt.u32.totalorder %s6510_s16, %s6955_s9 }
  0xa2   : > { %p6514_p3 = pneg %p6513_p0  ;;  %p6518_p10 = por %p6517_p8, %p6516_p5 }
  0xa4   : > { %p6520_p13 = por %p6519_p11, %p6518_p10 }
  0xa6   : > { %p6521_p4 = pnand %p6520_p13, %p6514_p3 }
  0xa8   : > { %6524 = shalt.err (!%p6521_p4)
}
  0xa9   : > { %s6525_s3 = scalar_lea.vmem %s892_s19, 16  ;;  %s6624_s17 = smov [#allocation10]  }
  0xaa   : > { %p6526_p1 = scmp.ne.s32.totalorder %s892_s19, %s6525_s3  ;;  %s6530_s14 = sshll.u32 %s6624_s17, 4  ;;  %s6531_s14 = int_to_ptr.vmem [resolvable:$false] %s6530_s14 }
  0xab   : > { %s6532_s1 = scalar_lea.vmem %s6531_s14, 32  ;;  %p6533_p2 = scmp.lt.s32.totalorder %s892_s19, %s6531_s14 }
  0xac   : > { %p6528_p7 = pnand %p6526_p1, %p6839_p12  ;;  %p6534_p0 = scmp.lt.s32.totalorder %s6532_s1, %s6525_s3 }
  0xae   : > { %p6529_p9 = pneg %p6528_p7  ;;  %p6535_p6 = por %p6534_p0, %p6533_p2 }
  0xb0   : > { %p6536_p5 = pnand %p6535_p6, %p6529_p9 }
  0xb2   : > { %6539 = shalt.err (!%p6536_p5)
}
  0xb3   : > { %p8022_p8 = scmp.ne.s32.totalorder %s8008_s5, 0  ;;  %s8023_s24 = sld [smem:[#allocation45_spill]] }
  0xb4   : > { %s901_s13 = scalar_lea.vmem [#allocation11], %s6807_s4  ;;  %s899_s21 = scalar_lea.sflag [#allocation12], %s6807_s4 }
  0xb5   : > { %6137 = dma.hbm_to_vmem [thread:$0]  (!%p8022_p8), %s6955_s9, 16, %s892_s19, %s6886_s20  }
  0xb6   : > { %s908_s11 = sshll.u32 %s901_s13, 4  ;;  %s909_s11 = int_to_ptr.vmem [resolvable:$true] %s908_s11 }
  0xb9   : > { %s7005_s26 = scalar_lea.hbm %s8023_s24, %s6875_s0  ;;  %s6545_s9 = scalar_lea.hbm %s8023_s24, 160 }
  0xba   : > { %s6540_s16 = scalar_lea.hbm %s7005_s26, 16  ;;  %p6546_p11 = scmp.lt.u32.totalorder %s7005_s26, %s8023_s24 }
  0xbb   : > { %p6541_p6 = scmp.ne.s32.totalorder %s7005_s26, %s6540_s16  ;;  %p6547_p13 = scmp.lt.u32.totalorder %s6545_s9, %s6540_s16 }
  0xbc   : > { %p6549_p1 = scmp.lt.u32.totalorder %s6540_s16, %s7005_s26 }
  0xbd   : > { %p6543_p3 = pnand %p6541_p6, %p6839_p12  ;;  %p6548_p4 = por %p6547_p13, %p6546_p11 }
  0xbf   : > { %p6544_p10 = pneg %p6543_p3  ;;  %p6550_p7 = por %p6549_p1, %p6548_p4 }
  0xc1   : > { %p6551_p9 = pnand %p6550_p7, %p6544_p10 }
  0xc3   : > { %6554 = shalt.err (!%p6551_p9)
}
  0xc4   : > { %s6555_s4 = scalar_lea.vmem %s909_s11, 16  ;;  %s6625_s8 = smov [#allocation11]  }
  0xc5   : > { %p6556_p2 = scmp.ne.s32.totalorder %s909_s11, %s6555_s4  ;;  %s6560_s30 = sshll.u32 %s6625_s8, 4  ;;  %s6561_s30 = int_to_ptr.vmem [resolvable:$false] %s6560_s30 }
  0xc6   : > { %s6562_s12 = scalar_lea.vmem %s6561_s30, 32  ;;  %p6563_p6 = scmp.lt.s32.totalorder %s909_s11, %s6561_s30 }
  0xc7   : > { %p6558_p0 = pnand %p6556_p2, %p6839_p12  ;;  %p6564_p3 = scmp.lt.s32.totalorder %s6562_s12, %s6555_s4 }
  0xc9   : > { %p6559_p5 = pneg %p6558_p0  ;;  %p6565_p8 = por %p6564_p3, %p6563_p6 }
  0xcb   : > { %p6566_p11 = pnand %p6565_p8, %p6559_p5 }
  0xcd   : > { %6569 = shalt.err (!%p6566_p11)
}
  0xce   : > { %p8024_p13 = scmp.ne.s32.totalorder %s8008_s5, 0  ;;  %p8025_p10 = scmp.ne.s32.totalorder %s8013_s25, 0 }
  0xd0   : > { %6140 = dma.hbm_to_vmem [thread:$0]  (!%p8024_p13), %s7005_s26, 16, %s909_s11, %s899_s21  }
  0xd1   : > { %917 = sbr.rel (%p8025_p10) target bundleno = 8691 (0x21f3), region = 120 }
  0xd8   : > { %s7029_s29 = sand.u32 1, %s6608_s2   ;;  %p8027_p12 = scmp.ne.s32.totalorder %s8007_s27, 0 }
  0xd9   : > { %8026 = sst [smem:[#allocation21_spill]] %s7029_s29  ;;  %s5159_s22 = sshll.u32 %s7029_s29, 6 }
  0xda   : > { %s920_s3 = scalar_lea.sflag [#allocation4], %s7029_s29  ;;  %s7033_s17 = scalar_lea.vmem [#allocation3], %s5159_s22 }
  0xdb   : > { %6587 = dma.done.wait (%p8027_p12), %s920_s3, 1024  }
  0xdc   : > { %6589 = vsyncadd (%p8027_p12), %s920_s3, 4294966272  ;;  %s928_s5 = sand.u32 1, %s6785_s7   ;;  %s7040_s14 = scalar_lea.vmem [#allocation5], %s5159_s22 }
  0xdd   : > { %s929_s25 = scalar_lea.sflag [#allocation6], %s928_s5 }
  0xde   : > { %6591 = dma.done.wait (%p8027_p12), %s929_s25, 2048  }
  0xdf   : > { %6593 = vsyncadd (%p8027_p12), %s929_s25, 4294965248  ;;  %s7046_s1 = scalar_lea.vmem [#allocation7], %s5159_s22  ;;  %s947_s6 = scalar_lea.sflag [#allocation9], %s928_s5 }
  0xe0   : > { %6595 = dma.done.wait (%p8027_p12), %s947_s6, 32  }
  0xe1   : > { %6597 = vsyncadd (%p8027_p12), %s947_s6, 4294967264  ;;  %s963_s13 = scalar_lea.sflag [#allocation12], %s7029_s29 }
  0xe2   : > { %6599 = dma.done.wait (%p8027_p12), %s963_s13, 16  }
  0xe3   : > { %6601 = vsyncadd (%p8027_p12), %s963_s13, 4294967280  ;;  %p1092_p8 = scmp.lt.s32.totalorder %s6785_s7, 9  ;;  %s8029_s4 = sld [smem:[#allocation29_spill]] }
  0xe4   : > { %s8030_s13 = sld [smem:[#allocation32_spill]]  ;;  %s8031_s18 = sld [smem:[#allocation33_spill]] }
  0xe5   : > { %s7062_s21 = scalar_select %p1092_p8, %s6785_s7, 9 }
  0xe6   : > { %s8033_s30 = sld [smem:[#allocation37_spill]]  ;;  %s8034_s23 = sld [smem:[#allocation38_spill]] }
  0xe7   : > { %s5297_s16 = sshll.u32 %s7062_s21, 6  ;;  %s5298_s3 = sshll.u32 %s7062_s21, 7 }
  0xe8   : > { %s5166_s5 = sshll.u32 %s7062_s21, 1  ;;  %s8037_s19 = sld [smem:[#allocation41_spill]] }
  0xe9   : > { %s7072_s8 = scalar_lea.vmem %s8029_s4, %s5297_s16  ;;  %s8038_s4 = sld [smem:[#allocation42_spill]] }
  0xea   : > { %s7083_s11 = scalar_lea.vmem %s8030_s13, %s5298_s3  ;;  %s7088_s27 = scalar_lea.vmem %s8031_s18, %s5166_s5 }
  0xeb   : > { %s8035_s13 = sld [smem:[#allocation39_spill]]  ;;  %s8036_s5 = sld [smem:[#allocation40_spill]] }
  0xec   : > { %s1117_s12 = scalar_lea.vmem %s8033_s30, %s7062_s21  ;;  %s7101_s24 = scalar_lea.vmem %s8034_s23, %s5298_s3 }
  0xed   : > { %p5169_p4 = scmp.ne.s32.totalorder %s6785_s7, 0 }
  0xee   : > { %s1131_s16 = scalar_lea.vmem %s8037_s19, %s7062_s21  ;;  %s8039_s22 = sld [smem:[#allocation22_spill]] (!%p5169_p4)  ;;  %vm1142_vm0 = vcmask (!%p5169_p4), 523264  }
  0xef   : > { %s1134_s30 = scalar_lea.vmem %s8038_s4, %s7062_s21  ;;  %1138 = sbr.rel (%p5169_p4) target bundleno = 248 (0xf8), region = 148 }
  0xf0   : > { %s8040_s0 = sld [smem:[#allocation46_spill]] (!%p5169_p4) }
  0xf1   : > { %s1125_s2 = scalar_lea.vmem %s8035_s13, %s7062_s21  ;;  %s1128_s18 = scalar_lea.vmem %s8036_s5, %s7062_s21 }
  0xf4   : > { %v1139_v0 = vld [vmem:[%s8039_s22] sm:$0xff] (!%p5169_p4)  ;;  %v1140_v1 = vld [vmem:[%s8039_s22 + $0x8] sm:$0xff] (!%p5169_p4)  ;;  %v1141_v2 = vld [vmem:[%s8039_s22 + $0x10] sm:$0xff] (!%p5169_p4) }
  0xf6   : > { %1143 = vst.msk [vmem:[%s8040_s0] sm:$0xff] %vm1142_vm0, %v1139_v0  ;;  %1144 = vst.msk [vmem:[%s8040_s0 + $0x8] sm:$0xff] %vm1142_vm0, %v1140_v1 }
  0xf7   : > { %1145 = vst.msk [vmem:[%s8040_s0 + $0x10] sm:$0xff] %vm1142_vm0, %v1141_v2 }
  0xf8 PF: > { %s8041_s4 = sld [smem:[#allocation46_spill]]  ;;  %vm1161_vm1 = vcmask 195584   ;;  %s8042_s6 = sld [smem:[#allocation24_spill]]  ;;  %v6626_v13 = vmov 0.0|0.0   ;;  %vm6627_vm2 = vmmov 0   ;;  %v6628_v14 = vmov 0.0  }
  0xf9   : > { %5880 = vmatprep.subr.bf16.mxu1 %v6626_v13  ;;  %5522 = vmatprep.mubr.msk.f32.mxu1 %vm6627_vm2, %v6628_v14  ;;  %v1374_v15 = vld [vmem:[%s7072_s8] sm:$0xff]  ;;  %v1375_v16 = vld [vmem:[%s7072_s8 + $0x8] sm:$0xff]  ;;  %v1376_v17 = vld [vmem:[%s7072_s8 + $0x10] sm:$0xff]  ;;  %s8044_s29 = sld [smem:[#allocation23_spill]]  ;;  %vm1284_vm3 = vcmask 392192   ;;  %vm1389_vm4 = vcmask 523264  }
  0xfa   : > { %v5890_v18 = vpack.c.bf16 %v1375_v16, %v1374_v15  ;;  %v1377_v19 = vld [vmem:[%s7072_s8 + $0x18] sm:$0xff]  ;;  %v1378_v21 = vld [vmem:[%s7072_s8 + $0x20] sm:$0xff]  ;;  %v1379_v22 = vld [vmem:[%s7072_s8 + $0x28] sm:$0xff]  ;;  %s8048_s9 = sld [smem:[#allocation30_spill]]  ;;  %s8050_s3 = sld [smem:[#allocation26_spill]]  ;;  %vm1882_vm5 = vcmask 130048  }
  0xfb   : > { %v5893_v20 = vpack.c.bf16 %v1377_v19, %v1376_v17  ;;  %v5896_v23 = vpack.c.bf16 %v1379_v22, %v1378_v21  ;;  %v1380_v54 = vld [vmem:[%s7072_s8 + $0x30] sm:$0xff]  ;;  %v1381_v55 = vld [vmem:[%s7072_s8 + $0x38] sm:$0xff]  ;;  %v1484_v59 = vld [vmem:[%s7033_s17 + $0x10] sm:$0xff]  ;;  %s6630_s23 = smov 48   ;;  %s6631_s25 = smov 112   ;;  %vm2293_vm7 = vcmask 261248  }
  0xfc   : > { %v5899_v56 = vpack.c.bf16 %v1381_v55, %v1380_v54  ;;  %v1482_v57 = vld [vmem:[%s7033_s17] sm:$0xff]  ;;  %v1483_v58 = vld [vmem:[%s7033_s17 + $0x8] sm:$0xff]  ;;  %v1485_v61 = vld [vmem:[%s7033_s17 + $0x18] sm:$0xff]  ;;  %s6634_s26 = smov 16   ;;  %s6635_s7 = smov 80   ;;  %vm2508_vm8 = vcmask 392448  }
  0xfd   : > { %v5902_v60 = vpack.c.bf16 %v1483_v58, %v1482_v57  ;;  %v5905_v62 = vpack.c.bf16 %v1485_v61, %v1484_v59  ;;  %v1486_v63 = vld [vmem:[%s7033_s17 + $0x20] sm:$0xff]  ;;  %v1487_v0 = vld [vmem:[%s7033_s17 + $0x28] sm:$0xff]  ;;  %v1488_v16 = vld [vmem:[%s7033_s17 + $0x30] sm:$0xff]  ;;  %vm2723_vm9 = vcmask 523648   ;;  %s8056_s5 = sld [smem:[#allocation21_spill]] }
  0xfe   : > { %v7141_v3 = vld [vmem:[%s8041_s4] sm:$0xff]  ;;  %v7146_v4 = vld [vmem:[%s8041_s4 + $0x8] sm:$0xff]  ;;  %s8043_s13 = smov %s8042_s6  ;;  %v7158_v7 = vld [vmem:[%s8041_s4 + $0x10] sm:$0xff]  ;;  %v5908_v1 = vpack.c.bf16 %v1487_v0, %v1486_v63  ;;  %s8057_s19 = sld [smem:[#allocation35_spill]] }
  0xff   : > { %v7150_v5 = vpack.c.bf16 %v7146_v4, %v7141_v3  ;;  %v1149_v6 = vld [vmem:[%s8042_s6] sm:$0xff]  ;;  %v1150_v8 = vld [vmem:[%s8043_s13 + $0x8] sm:$0xff]  ;;  %v1151_v9 = vld [vmem:[%s8043_s13 + $0x10] sm:$0xff]  ;;  %s8045_s28 = smov %s8044_s29  ;;  %s6632_s6 = smov 32  }
 0x100   : > { %5501 = vmatprep.mubr.msk.f32.mxu0 %vm1161_vm1, %v1149_v6  ;;  %v1152_v10 = vld [vmem:[%s8043_s13 + $0x18] sm:$0xff]  ;;  %v1153_v11 = vld [vmem:[%s8043_s13 + $0x20] sm:$0xff]  ;;  %v1154_v12 = vld [vmem:[%s8043_s13 + $0x28] sm:$0xff]  ;;  %s8049_s15 = scalar_lea.vmem %s8048_s9, %s7062_s21 }
 0x101   : > { %5877 = vmatprep.subr.bf16.mxu0 %v7150_v5  ;;  %v1156_v24 = vld [vmem:[%s8044_s29 + $0x8] sm:$0xff]  ;;  %v1155_v25 = vld [vmem:[%s8045_s28] sm:$0xff]  ;;  %v1158_v30 = vld [vmem:[%s8045_s28 + $0x18] sm:$0xff]  ;;  %s8046_s29 = sld [smem:[#allocation25_spill]] }
 0x102   : > { %5879 = vmatpush3.bf16.msra.mxu0 %v7150_v5  ;;  %v1157_v32 = vld [vmem:[%s8045_s28 + $0x10] sm:$0xff]  ;;  %v1160_v38 = vld [vmem:[%s8045_s28 + $0x28] sm:$0xff]  ;;  %v1159_v41 = vld [vmem:[%s8045_s28 + $0x20] sm:$0xff] }
 0x103   : > { %5499 = vmatprep.subr.mxu0 %v7158_v7  ;;  %v1489_v17 = vld [vmem:[%s7033_s17 + $0x38] sm:$0xff]  ;;  %v1743_v54 = vld [vmem:[%s7083_s11 + $0x78] sm:$0xff]  ;;  %v1742_v57 = vld [vmem:[%s7083_s11 + $0x70] sm:$0xff]  ;;  %s8053_s17 = sld [smem:[#allocation28_spill]] }
 0x104   : > { %vm7373_vm6 = vmpackc.low %vm1882_vm5, %vm1882_vm5 }
 0x106   : > { %5500 = vmatpush3.msra.mxu0 %v7158_v7 }
 0x107   : > { %5502 = vmatmul.mubr.msk.f32.vlgmr.msra.gmra.mrb[0].mxu0 %vm1161_vm1, %v1150_v8  ;;  %5889 = vmatprep.subr.bf16.mxu0 %v6626_v13  ;;  %s8047_s0 = smov %s8046_s29  ;;  %v1281_v51 = vld [vmem:[%s8046_s29] sm:$0xff]  ;;  %s6633_s29 = smov 96  }
 0x108   : > { %5504 = vmatprep.mubr.msk.f32.mxu0 %vm1161_vm1, %v1151_v9  ;;  %5891 = vmatpush3.bf16.msra.mxu0 %v5890_v18  ;;  %v1282_v52 = vld [vmem:[%s8047_s0 + $0x8] sm:$0xff]  ;;  %v1283_v53 = vld [vmem:[%s8047_s0 + $0x10] sm:$0xff]  ;;  %v5911_v18 = vpack.c.bf16 %v1489_v17, %v1488_v16 }
 0x109   : > { %5892 = vmatprep.subr.bf16.mxu0 %v6626_v13 }
 0x10b   : > { %5505 = vmatmul.mubr.msk.f32.gmra.mrb[2].mxu0 %vm1161_vm1, %v1152_v10 }
 0x10c   : > { %5507 = vmatprep.mubr.msk.f32.mxu0 %vm1161_vm1, %v1153_v11  ;;  %5894 = vmatpush3.bf16.msra.mxu0 %v5893_v20 }
 0x10d   : > { %5895 = vmatprep.subr.bf16.mxu0 %v6626_v13 }
 0x10f   : > { %5508 = vmatmul.mubr.msk.f32.gmra.mrb[4].mxu0 %vm1161_vm1, %v1154_v12 }
 0x110   : > { %5547 = vmatprep.mubr.msk.f32.mxu0 %vm6627_vm2, %v6628_v14  ;;  %5897 = vmatpush3.bf16.msra.mxu0 %v5896_v23 }
 0x111   : > { %5898 = vmatprep.subr.bf16.mxu0 %v6626_v13 }
 0x114   : > { %5900 = vmatpush3.bf16.msra.mxu0 %v5899_v56  ;;  %v1740_v56 = vld [vmem:[%s7083_s11 + $0x60] sm:$0xff] }
 0x115   : > { %v5931_v58 = vpack.c.bf16 %v1742_v57, %v1740_v56 }
 0x1da   : > { %v5503_v26 = vpop.f32.mrb[0].mxu0 }
 0x1db   : > { %v1252_v27 = vadd.f32 %v5503_v26, %v1156_v24  ;;  %v1246_v28 = vpop.f32.mrb[1].mxu0  ;;  %v1729_v24 = vld [vmem:[%s7083_s11 + $0x8] sm:$0xff] }
 0x1dc   : > { %v1247_v29 = vadd.f32 %v1246_v28, %v1155_v25  ;;  %v1731_v25 = vld [vmem:[%s7083_s11 + $0x18] sm:$0xff] }
 0x1dd   : > { %v1276_v31 = vmax.f32 %v1252_v27, 0.0 }
 0x1de   : > { %v1275_v33 = vmax.f32 %v1247_v29, 0.0  ;;  %v5506_v34 = vpop.f32.mrb[2].mxu0  ;;  %v5917_v29 = vpack.c.bf16 %v1731_v25, %v1729_v24 }
 0x1df   : > { %v1262_v35 = vadd.f32 %v5506_v34, %v1158_v30  ;;  %v1256_v36 = vpop.f32.mrb[3].mxu0  ;;  %v1728_v34 = vld [vmem:[%s7083_s11] sm:$0xff] }
 0x1e0   : > { %v1257_v37 = vadd.f32 %v1256_v36, %v1157_v32  ;;  %v5881_v39 = vpack.c.bf16 %v1276_v31, %v1275_v33 }
 0x1e1   : > { %v1278_v40 = vmax.f32 %v1262_v35, 0.0  ;;  %v1730_v35 = vld [vmem:[%s7083_s11 + $0x10] sm:$0xff] }
 0x1e2   : > { %v1277_v42 = vmax.f32 %v1257_v37, 0.0  ;;  %v5509_v43 = vpop.f32.mrb[4].mxu0  ;;  %5882 = vmatpush3.bf16.msra.mxu1 %v5881_v39  ;;  %v5919_v36 = vpack.c.bf16 %v1730_v35, %v1728_v34  ;;  %v1611_v37 = vld [vmem:[%s8050_s3 + $0x10] sm:$0xff]  ;;  %v1733_v39 = vld [vmem:[%s7083_s11 + $0x28] sm:$0xff] }
 0x1e3   : > { %v1272_v44 = vadd.f32 %v5509_v43, %v1160_v38  ;;  %v1266_v45 = vpop.f32.mrb[5].mxu0  ;;  %5883 = vmatprep.subr.bf16.mxu1 %v6626_v13  ;;  %v1612_v38 = vld [vmem:[%s8050_s3 + $0x18] sm:$0xff]  ;;  %v1734_v43 = vld [vmem:[%s7083_s11 + $0x30] sm:$0xff] }
 0x1e4   : > { %v5884_v46 = vpack.c.bf16 %v1278_v40, %v1277_v42  ;;  %v1267_v47 = vadd.f32 %v1266_v45, %v1159_v41  ;;  %v1735_v40 = vld [vmem:[%s7083_s11 + $0x38] sm:$0xff]  ;;  %v1732_v42 = vld [vmem:[%s7083_s11 + $0x20] sm:$0xff] }
 0x1e5   : > { %v1280_v48 = vmax.f32 %v1272_v44, 0.0  ;;  %v5921_v41 = vpack.c.bf16 %v1735_v40, %v1733_v39  ;;  %v5923_v44 = vpack.c.bf16 %v1734_v43, %v1732_v42  ;;  %v1613_v45 = vld [vmem:[%s8050_s3 + $0x20] sm:$0xff] }
 0x1e6   : > { %v1279_v49 = vmax.f32 %v1267_v47, 0.0  ;;  %5885 = vmatpush3.bf16.msra.mxu1 %v5884_v46  ;;  %v1614_v46 = vld [vmem:[%s8050_s3 + $0x28] sm:$0xff] }
 0x1e7   : > { %5886 = vmatprep.subr.bf16.mxu1 %v6626_v13  ;;  %v1737_v47 = vld [vmem:[%s7083_s11 + $0x48] sm:$0xff] }
 0x1e8   : > { %v5887_v50 = vpack.c.bf16 %v1280_v48, %v1279_v49  ;;  %v1739_v48 = vld [vmem:[%s7083_s11 + $0x58] sm:$0xff]  ;;  %v1736_v49 = vld [vmem:[%s7083_s11 + $0x40] sm:$0xff] }
 0x1ea   : > { %5888 = vmatpush3.bf16.msra.mxu1 %v5887_v50  ;;  %v1738_v50 = vld [vmem:[%s7083_s11 + $0x50] sm:$0xff] }
 0x1eb   : > { %5901 = vmatprep.subr.bf16.mxu1 %v6626_v13 }
 0x1ed   : > { %5523 = vmatmul.mubr.msk.f32.vlgmr.msra.gmra.mrb[0].mxu1 %vm1284_vm3, %v1281_v51  ;;  %v5925_v51 = vpack.c.bf16 %v1739_v48, %v1737_v47 }
 0x1ee   : > { %5525 = vmatprep.mubr.msk.f32.mxu1 %vm6627_vm2, %v6628_v14  ;;  %5903 = vmatpush3.bf16.msra.mxu1 %v5902_v60 }
 0x1ef   : > { %5904 = vmatprep.subr.bf16.mxu1 %v6626_v13 }
 0x1f1   : > { %5526 = vmatmul.mubr.msk.f32.gmra.mrb[2].mxu1 %vm1284_vm3, %v1282_v52  ;;  %v5927_v52 = vpack.c.bf16 %v1738_v50, %v1736_v49  ;;  %v7386_v49 = vld [vmem:[%s8053_s17] ss:$0 sm:$0xff] }
 0x1f2   : > { %5528 = vmatprep.mubr.msk.f32.mxu1 %vm6627_vm2, %v6628_v14  ;;  %5906 = vmatpush3.bf16.msra.mxu1 %v5905_v62 }
 0x1f3   : > { %5907 = vmatprep.subr.bf16.mxu1 %v6626_v13 }
 0x1f5   : > { %5529 = vmatmul.mubr.msk.f32.gmra.mrb[4].mxu1 %vm1284_vm3, %v1283_v53  ;;  %v1741_v53 = vld [vmem:[%s7083_s11 + $0x68] sm:$0xff]  ;;  %s6629_s11 = smov 64  }
 0x1f6   : > { %5572 = vmatprep.mubr.msk.f32.mxu1 %vm6627_vm2, %v6628_v14  ;;  %5909 = vmatpush3.bf16.msra.mxu1 %v5908_v1  ;;  %v5929_v55 = vpack.c.bf16 %v1743_v54, %v1741_v53 }
 0x1f7   : > { %5910 = vmatprep.subr.bf16.mxu1 %v6626_v13 }
 0x1fa   : > { %5912 = vmatpush3.bf16.msra.mxu1 %v5911_v18 }
 0x1fb   : > { %5914 = vmatprep.subr.bf16.mxu1 %v7150_v5 }
 0x2c0   : > { %v1360_v2 = vpop.f32.mrb[0].mxu1 }
 0x2c1   : > { %v1361_v6 = vadd.f32 %v1360_v2, %v7141_v3  ;;  %v5524_v8 = vpop.f32.mrb[1].mxu1 }
 0x2c3   : > { %5548 = vmatmul.mubr.msk.f32.vlgmr.msra.gmra.mrb[6].mxu0 %vm1389_vm4, %v1361_v6 }
 0x2c4   : > { %v1365_v9 = vpop.f32.mrb[2].mxu1  ;;  %5550 = vmatprep.mubr.msk.f32.mxu0 %vm6627_vm2, %v6628_v14 }
 0x2c5   : > { %v1366_v10 = vadd.f32 %v1365_v9, %v7146_v4  ;;  %v5527_v11 = vpop.f32.mrb[3].mxu1  ;;  %v5179_v4 = vld [vmem:[%s8049_s15] ss:$0 sm:$0xff]  ;;  %s8066_s15 = scalar_lea.vmem [#allocation11], %s8056_s5 }
 0x2c6   : > { %v1746_v11 = vlaneseq }
 0x2c7   : > { %5551 = vmatmul.mubr.msk.f32.gmra.mrb[8].mxu0 %vm1389_vm4, %v1366_v10 }
 0x2c8   : > { %v1370_v12 = vpop.f32.mrb[4].mxu1  ;;  %5553 = vmatprep.mubr.msk.f32.mxu0 %vm6627_vm2, %v6628_v14 }
 0x2c9   : > { %v1371_v3 = vadd.f32 %v1370_v12, %v7158_v7  ;;  %v5530_v15 = vpop.f32.mrb[5].mxu1  ;;  %v1747_v12 = vshrl.u32 %v1746_v11, 7 }
 0x2ca   : > { %v1744_v15 = vld [vmem:[%s7088_s27] sm:$0x3]  ;;  %s8065_s27 = scalar_lea.vmem [#allocation10], %s8056_s5 }
 0x2cb   : > { %5554 = vmatmul.mubr.msk.f32.gmra.mrb[10].mxu0 %vm1389_vm4, %v1371_v3  ;;  %v1748_v3 = vsub.s32 0, %v1747_v12  ;;  %v1752_v17 = vsub.s32 1, %v1747_v12 }
 0x2cd   : > { %v7337_v16 = vrot.slane %v1744_v15, %v1748_v3 }
 0x396   : > { %v1465_v19 = vpop.f32.mrb[6].mxu0 }
 0x397   : > { %v1466_v20 = vadd.f32 %v5179_v4, %v1465_v19  ;;  %v5549_v21 = vpop.f32.mrb[7].mxu0 }
 0x399   : > { %v1479_v22 = vmax.f32 %v1466_v20, 0.0  ;;  %v1753_v20 = vrot.slane %v1744_v15, %v1752_v17 }
 0x39a   : > { %v1470_v23 = vpop.f32.mrb[8].mxu0 }
 0x39b   : > { %v1471_v26 = vadd.f32 %v5179_v4, %v1470_v23  ;;  %v5552_v27 = vpop.f32.mrb[9].mxu0  ;;  %5573 = vmatmul.mubr.msk.f32.vlgmr.msra.gmra.mrb[6].mxu1 %vm1389_vm4, %v1479_v22 }
 0x39c   : > { %5575 = vmatprep.mubr.msk.f32.mxu1 %vm6627_vm2, %v6628_v14  ;;  %5916 = vmatpush3.bf16.msra.mxu1 %v7150_v5  ;;  %v1609_v5 = vld [vmem:[%s8050_s3] sm:$0xff] }
 0x39d   : > { %v1480_v28 = vmax.f32 %v1471_v26, 0.0  ;;  %5585 = vmatprep.subr.mxu1 %v7158_v7 }
 0x39e   : > { %v1475_v30 = vpop.f32.mrb[10].mxu0 }
 0x39f   : > { %v1476_v31 = vadd.f32 %v5179_v4, %v1475_v30  ;;  %v5555_v32 = vpop.f32.mrb[11].mxu0  ;;  %5576 = vmatmul.mubr.msk.f32.gmra.mrb[8].mxu1 %vm1389_vm4, %v1480_v28 }
 0x3a0   : > { %5578 = vmatprep.mubr.msk.f32.mxu1 %vm6627_vm2, %v6628_v14  ;;  %5586 = vmatpush3.msra.mxu1 %v7158_v7  ;;  %v1610_v7 = vld [vmem:[%s8050_s3 + $0x8] sm:$0xff] }
 0x3a1   : > { %v1481_v33 = vmax.f32 %v1476_v31, 0.0  ;;  %5918 = vmatprep.subr.bf16.mxu1 %v5917_v29 }
 0x3a3   : > { %5579 = vmatmul.mubr.msk.f32.gmra.mrb[10].mxu1 %vm1389_vm4, %v1481_v33 }
 0x3a4   : > { %5587 = vmatprep.mubr.msk.f32.mxu1 %vm1161_vm1, %v1609_v5 }
 0x3a7   : > { %5588 = vmatmul.mubr.msk.f32.vlgmr.msra.gmra.mrb[12].mxu1 %vm1161_vm1, %v1610_v7 }
 0x3a8   : > { %5590 = vmatprep.mubr.msk.f32.mxu1 %vm1161_vm1, %v1611_v37  ;;  %5920 = vmatpush1.bf16.msra.mxu1 %v5919_v36 }
 0x3a9   : > { %5922 = vmatprep.subr.bf16.mxu1 %v5921_v41 }
 0x3ab   : > { %5591 = vmatmul.mubr.msk.f32.gmra.mrb[14].mxu1 %vm1161_vm1, %v1612_v38 }
 0x3ac   : > { %5593 = vmatprep.mubr.msk.f32.mxu1 %vm1161_vm1, %v1613_v45  ;;  %5924 = vmatpush1.bf16.msra.mxu1 %v5923_v44 }
 0x3ad   : > { %5926 = vmatprep.subr.bf16.mxu1 %v5925_v51 }
 0x3af   : > { %5594 = vmatmul.mubr.msk.f32.gmra.mrb[16].mxu1 %vm1161_vm1, %v1614_v46 }
 0x3b0   : > { %1838 = vmatprep.mubr.f32.mxu1 %v6628_v14  ;;  %5928 = vmatpush1.bf16.msra.mxu1 %v5927_v52 }
 0x3b1   : > { %5930 = vmatprep.subr.bf16.mxu1 %v5929_v55 }
 0x3b4   : > { %5932 = vmatpush1.bf16.msra.mxu1 %v5931_v58 }
 0x46e   : > { %v7319_v59 = vpop.f32.mrb[6].mxu1 }
 0x46f   : > { %v5574_v60 = vpop.f32.mrb[7].mxu1 }
 0x472   : > { %v7321_v61 = vpop.f32.mrb[8].mxu1 }
 0x473   : > { %v5577_v62 = vpop.f32.mrb[9].mxu1 }
 0x476   : > { %v7323_v63 = vpop.f32.mrb[10].mxu1 }
 0x477   : > { %v5580_v0 = vpop.f32.mrb[11].mxu1 }
 0x47a   : > { %v5589_v1 = vpop.f32.mrb[12].mxu1 }
 0x47b   : > { %v1699_v2 = vpop.f32.mrb[13].mxu1 }
 0x47c   : > { %5195 = vmatmul.mubr.msk.f32.vlgmr.msra.gmra.mrb[18].mxu1 %vm1389_vm4, %v1699_v2 }
 0x47d   : > { %1844 = vmatprep.mubr.f32.mxu1 %v6628_v14 }
 0x47e   : > { %v5592_v6 = vpop.f32.mrb[14].mxu1 }
 0x47f   : > { %v1709_v8 = vpop.f32.mrb[15].mxu1 }
 0x480   : > { %5196 = vmatmul.mubr.msk.f32.gmra.mrb[20].mxu1 %vm1389_vm4, %v5589_v1 }
 0x481   : > { %1850 = vmatprep.mubr.f32.mxu1 %v6628_v14 }
 0x482   : > { %v5595_v9 = vpop.f32.mrb[16].mxu1 }
 0x483   : > { %v1719_v10 = vpop.f32.mrb[17].mxu1 }
 0x484   : > { %5197 = vmatmul.mubr.msk.f32.gmra.mrb[22].mxu1 %vm1389_vm4, %v1709_v8 }
 0x485   : > { %1856 = vmatprep.mubr.f32.mxu1 %v6628_v14 }
 0x488   : > { %5198 = vmatmul.mubr.msk.f32.gmra.mrb[24].mxu1 %vm1389_vm4, %v5592_v6 }
 0x489   : > { %1862 = vmatprep.mubr.f32.mxu1 %v6628_v14 }
 0x48c   : > { %5199 = vmatmul.mubr.msk.f32.gmra.mrb[26].mxu1 %vm1389_vm4, %v1719_v10 }
 0x48d   : > { %1868 = vmatprep.mubr.f32.mxu1 %v6628_v14 }
 0x490   : > { %5200 = vmatmul.mubr.msk.f32.gmra.mrb[28].mxu1 %vm1389_vm4, %v5595_v9 }
 0x54f   : > { %v1840_v18 = vpop.f32.mrb[18].mxu1 }
 0x550   : > { %v7340_v4 = vadd.f32 %v1840_v18, %v7337_v16  ;;  %v1842_v19 = vpop.f32.mrb[19].mxu1 }
 0x551   : > { %v1843_v24 = vadd.f32 %v1842_v19, %v1753_v20 }
 0x552   : > { %5600 = vmatprep.mubr.msk.f32.mxu0 %vm1882_vm5, %v7340_v4 }
 0x553   : > { %v1846_v21 = vpop.f32.mrb[20].mxu1 }
 0x554   : > { %v7345_v22 = vadd.f32 %v1846_v21, %v7337_v16  ;;  %v1848_v23 = vpop.f32.mrb[21].mxu1 }
 0x555   : > { %v1849_v25 = vadd.f32 %v1848_v23, %v1753_v20 }
 0x556   : > { %v7349_v26 = vpack.i.bf16 %v7345_v22, %v7340_v4 }
 0x557   : > { %v5939_v27 = vpack.c.bf16 %v1849_v25, %v1843_v24  ;;  %v7351_v28 = vpack.i.bf16 %v1849_v25, %v1843_v24  ;;  %v7355_v29 = vpop.f32.mrb[22].mxu1 }
 0x558   : > { %6187 = vrot.lane.b32.xlu0 %v7349_v26, %s6629_s11  ;;  %v1854_v30 = vpop.f32.mrb[23].mxu1 }
 0x559   : > { %v1855_v34 = vadd.f32 %v1854_v30, %v1753_v20 }
 0x55b   : > { %v7357_v31 = vpop.f32.mrb[24].mxu1 }
 0x55c   : > { %v1860_v32 = vpop.f32.mrb[25].mxu1 }
 0x55d   : > { %v1861_v35 = vadd.f32 %v1860_v32, %v1753_v20 }
 0x55f   : > { %v7359_v33 = vpop.f32.mrb[26].mxu1  ;;  %v7363_v37 = vpack.c.bf16 %v1861_v35, %v1855_v34  ;;  %v7365_v40 = vpack.i.bf16 %v1861_v35, %v1855_v34 }
 0x560   : > { %v1866_v5 = vpop.f32.mrb[27].mxu1 }
 0x561   : > { %v1867_v38 = vadd.f32 %v1866_v5, %v1753_v20 }
 0x563   : > { %v7361_v7 = vpop.f32.mrb[28].mxu1 }
 0x564   : > { %v1872_v36 = vpop.f32.mrb[29].mxu1 }
 0x565   : > { %v1873_v39 = vadd.f32 %v1872_v36, %v1753_v20 }
 0x567   : > { %v7367_v41 = vpack.c.bf16 %v1873_v39, %v1867_v38  ;;  %v7369_v42 = vpack.i.bf16 %v1873_v39, %v1867_v38 }
 0x5ca   : > { %v6188_v43 = vpop.permute.xlu0 %6187 }
 0x5cb   : > { %v6190_v44 = vunpack.i.h.bf16 %v6188_v43  ;;  %v6189_v45 = vunpack.i.l.bf16 %v6188_v43 }
 0x5cd   : > { %v5933_v47 = vpack.c.bf16 %v6190_v44, %v6189_v45 }
 0x5cf   : > { %5935 = vmatprep.subr.msk.bf16.mxu0 %vm7373_vm6, %v5933_v47 }
 0x5d0   : > { %5938 = vmatpush3.bf16.xpose.msk.msra.mxu0 %vm7373_vm6, %v5933_v47 }
 0x5d1   : > { %5940 = vmatprep.subr.bf16.mxu0 %v5939_v27 }
 0x5d7   : > { %5601 = vmatmul.mubr.msk.f32.vlgmr.msra.gmra.mrb[12].mxu0 %vm1882_vm5, %v7345_v22 }
 0x5d8   : > { %5942 = vmatpush3.bf16.msra.mxu0 %v5939_v27 }
 0x6aa   : > { %v5602_v48 = vpop.f32.mrb[12].mxu0 }
 0x6ab   : > { %v1967_v50 = vmul.f32 0.25, %v5602_v48  ;;  %v1957_v51 = vpop.f32.mrb[13].mxu0 }
 0x6ac   : > { %v1966_v52 = vmul.f32 0.25, %v1957_v51 }
 0x6ad   : > { %v1973_v53 = vadd.f32 %v7386_v49, %v1967_v50 }
 0x6ae   : > { %v1972_v54 = vadd.f32 %v7386_v49, %v1966_v52 }
 0x6af   : > { %v1977_v55 = vsel %vm1882_vm5, %v1973_v53, -inf }
 0x6b0   : > { %1978 = vmax.xlane.f32.xlu1 %v1977_v55  ;;  %v1974_v56 = vsel %vm1882_vm5, %v1972_v54, -inf }
 0x6b1   : > { %1975 = vmax.xlane.f32.xlu0 %v1974_v56 }
 0x6c1   : > { %6192 = vrot.lane.b32.xlu1 %v7349_v26, %s6630_s23 }
 0x6c5   : > { %2079 = vrot.lane.b32.xlu1 %v7340_v4, %s6631_s25 }
 0x6c7   : > { %2081 = vrot.lane.b32.xlu0 %v7345_v22, %s6631_s25 }
 0x73d   : > { %v1979_v57 = vpop.xlane.xlu1 %1978 }
 0x73e   : > { %v1981_v58 = vsub.f32 %v1973_v53, %v1979_v57  ;;  %v1976_v60 = vpop.xlane.xlu0 %1975 }
 0x73f   : > { %v1980_v62 = vsub.f32 %v1972_v54, %v1976_v60 }
 0x740   : > { %v1984_v0 = vmul.f32 1.442695, %v1981_v58 }
 0x741   : > { %v1982_v1 = vmul.f32 1.442695, %v1980_v62  ;;  %v6193_v2 = vpop.permute.xlu1 %6192 }
 0x742   : > { %6291 = vpow2.f32 %v1984_v0  ;;  %v6195_v6 = vunpack.i.h.bf16 %v6193_v2  ;;  %v6194_v8 = vunpack.i.l.bf16 %v6193_v2  ;;  %v2082_v34 = vpop.permute.xlu0 %2081 }
 0x743   : > { %6293 = vpow2.f32 %v1982_v1 }
 0x744   : > { %v5943_v9 = vpack.c.bf16 %v6195_v6, %v6194_v8 }
 0x745   : > { %v2080_v15 = vpop.permute.xlu1 %2079 }
 0x746   : > { %5945 = vmatprep.subr.msk.bf16.mxu0 %vm7373_vm6, %v5943_v9 }
 0x74c   : > { %v6292_v10 = vpop.eup %6291 }
 0x74d   : > { %v1989_v11 = vsel %vm1882_vm5, %v6292_v10, 0.0  ;;  %v6294_v12 = vpop.eup %6293 }
 0x74e   : > { %1990 = vadd.xlane.f32.xlu1 %v1989_v11  ;;  %v1986_v3 = vsel %vm1882_vm5, %v6294_v12, 0.0 }
 0x752   : > { %1987 = vadd.xlane.f32.xlu1 %v1986_v3 }
 0x763   : > { %6197 = vrot.lane.b32.xlu1 %v7349_v26, %s6632_s6 }
 0x767   : > { %2296 = vrot.lane.b32.xlu1 %v7340_v4, %s6633_s29 }
 0x76b   : > { %2298 = vrot.lane.b32.xlu1 %v7345_v22, %s6633_s29 }
 0x7db   : > { %v1991_v17 = vpop.xlane.xlu1 %1990 }
 0x7dc   : > { %6295 = vrcp.f32 %v1991_v17 }
 0x7df   : > { %v1988_v18 = vpop.xlane.xlu1 %1987 }
 0x7e0   : > { %6297 = vrcp.f32 %v1988_v18 }
 0x7e3   : > { %v6198_v19 = vpop.permute.xlu1 %6197 }
 0x7e4   : > { %v6200_v20 = vunpack.i.h.bf16 %v6198_v19  ;;  %v6199_v21 = vunpack.i.l.bf16 %v6198_v19 }
 0x7e6   : > { %v5953_v23 = vpack.c.bf16 %v6200_v20, %v6199_v21  ;;  %v6296_v25 = vpop.eup %6295 }
 0x7e7   : > { %v2297_v24 = vpop.permute.xlu1 %2296  ;;  %v1995_v32 = vmul.f32 %v6296_v25, %v6292_v10 }
 0x7e8   : > { %5955 = vmatprep.subr.msk.bf16.mxu1 %vm7373_vm6, %v5953_v23  ;;  %5628 = vmatprep.mubr.msk.f32.mxu1 %vm1882_vm5, %v2297_v24 }
 0x7e9   : > { %5958 = vmatpush3.bf16.xpose.msk.msra.mxu1 %vm7373_vm6, %v5953_v23 }
 0x7ea   : > { %v6298_v27 = vpop.eup %6297 }
 0x7eb   : > { %v1994_v30 = vmul.f32 %v6298_v27, %v6294_v12  ;;  %v2299_v5 = vpop.permute.xlu1 %2298 }
 0x7ed   : > { %5607 = vmatprep.mubr.msk.f32.mxu0 %vm1882_vm5, %v1994_v30 }
 0x7ee   : > { %5608 = vmatmul.mubr.msk.f32.vlgmr.msra.gmra.mrb[14].mxu0 %vm1882_vm5, %v1995_v32 }
 0x7ef   : > { %5948 = vmatpush3.bf16.xpose.msk.msra.mxu0 %vm7373_vm6, %v5943_v9  ;;  %5614 = vmatprep.mubr.msk.f32.mxu0 %vm1882_vm5, %v2080_v15 }
 0x7f0   : > { %5629 = vmatmul.mubr.msk.f32.vlgmr.msra.gmra.mrb[30].mxu1 %vm1882_vm5, %v2299_v5 }
 0x7f6   : > { %5615 = vmatmul.mubr.msk.f32.vlgmr.msra.gmra.mrb[16].mxu0 %vm1882_vm5, %v2082_v34 }
 0x8c1   : > { %v5609_v35 = vpop.f32.mrb[14].mxu0 }
 0x8c2   : > { %2078 = vst.msk [vmem:[#allocation2 + $0x8] sm:$0xff] %vm1882_vm5, %v5609_v35  ;;  %v2068_v36 = vpop.f32.mrb[15].mxu0 }
 0x8c3   : > { %2077 = vst.msk [vmem:[#allocation2] sm:$0xff] %vm1882_vm5, %v2068_v36  ;;  %v5630_v38 = vpop.f32.mrb[30].mxu1 }
 0x8c4   : > { %v2378_v39 = vpop.f32.mrb[31].mxu1  ;;  %v2388_v53 = vmul.f32 0.25, %v5630_v38 }
 0x8c5   : > { %v2387_v47 = vmul.f32 0.25, %v2378_v39 }
 0x8c6   : > { %v2390_v57 = vadd.f32 %v7386_v49, %v2388_v53 }
 0x8c7   : > { %v2389_v55 = vadd.f32 %v7386_v49, %v2387_v47 }
 0x8c8   : > { %v2394_v58 = vsel %vm1882_vm5, %v2390_v57, -inf }
 0x8c9   : > { %v5616_v43 = vpop.f32.mrb[16].mxu0  ;;  %v2391_v56 = vsel %vm1882_vm5, %v2389_v55, -inf }
 0x8ca   : > { %v2171_v44 = vmul.f32 0.25, %v5616_v43  ;;  %v2161_v45 = vpop.f32.mrb[17].mxu0 }
 0x8cb   : > { %v2170_v48 = vmul.f32 0.25, %v2161_v45 }
 0x8cc   : > { %v2173_v50 = vadd.f32 %v7386_v49, %v2171_v44 }
 0x8cd   : > { %v2172_v51 = vadd.f32 %v7386_v49, %v2170_v48 }
 0x8ce   : > { %v2177_v52 = vsel %vm1882_vm5, %v2173_v50, -inf }
 0x8cf   : > { %2178 = vmax.xlane.f32.xlu0 %v2177_v52  ;;  %v2174_v54 = vsel %vm1882_vm5, %v2172_v51, -inf }
 0x8d0   : > { %2175 = vmax.xlane.f32.xlu1 %v2174_v54 }
 0x8d4   : > { %2392 = vmax.xlane.f32.xlu1 %v2391_v56 }
 0x8d8   : > { %2395 = vmax.xlane.f32.xlu1 %v2394_v58 }
 0x95c   : > { %v2179_v0 = vpop.xlane.xlu0 %2178 }
 0x95d   : > { %v2176_v60 = vpop.xlane.xlu1 %2175  ;;  %v2181_v6 = vsub.f32 %v2173_v50, %v2179_v0 }
 0x95e   : > { %v2180_v62 = vsub.f32 %v2172_v51, %v2176_v60 }
 0x95f   : > { %v2184_v12 = vmul.f32 1.442695, %v2181_v6 }
 0x960   : > { %v2182_v8 = vmul.f32 1.442695, %v2180_v62 }
 0x961   : > { %v2393_v1 = vpop.xlane.xlu1 %2392 }
 0x962   : > { %v2397_v2 = vsub.f32 %v2389_v55, %v2393_v1 }
 0x964   : > { %v2399_v9 = vmul.f32 1.442695, %v2397_v2 }
 0x965   : > { %v2396_v10 = vpop.xlane.xlu1 %2395 }
 0x966   : > { %6299 = vpow2.f32 %v2399_v9  ;;  %v2398_v11 = vsub.f32 %v2390_v57, %v2396_v10 }
 0x967   : > { %6301 = vpow2.f32 %v2182_v8 }
 0x968   : > { %v2401_v3 = vmul.f32 1.442695, %v2398_v11 }
 0x96a   : > { %6303 = vpow2.f32 %v2401_v3 }
 0x96b   : > { %6305 = vpow2.f32 %v2184_v12 }
 0x970   : > { %v6300_v15 = vpop.eup %6299 }
 0x971   : > { %v2403_v17 = vsel %vm1882_vm5, %v6300_v15, 0.0  ;;  %v6302_v18 = vpop.eup %6301 }
 0x972   : > { %2404 = vadd.xlane.f32.xlu0 %v2403_v17  ;;  %v2186_v20 = vsel %vm1882_vm5, %v6302_v18, 0.0 }
 0x974   : > { %v6304_v19 = vpop.eup %6303 }
 0x975   : > { %v2406_v21 = vsel %vm1882_vm5, %v6304_v19, 0.0  ;;  %v6306_v23 = vpop.eup %6305 }
 0x976   : > { %2187 = vadd.xlane.f32.xlu0 %v2186_v20  ;;  %2407 = vadd.xlane.f32.xlu1 %v2406_v21  ;;  %v2189_v24 = vsel %vm1882_vm5, %v6306_v23, 0.0 }
 0x97a   : > { %2190 = vadd.xlane.f32.xlu1 %v2189_v24 }
 0x98b   : > { %6207 = vrot.lane.b32.xlu1 %v7351_v28, %s6633_s29 }
 0x98c   : > { %6202 = vrot.lane.b32.xlu0 %v7351_v28, %s6631_s25 }
 0x98f   : > { %6212 = vrot.lane.b32.xlu1 %v7349_v26, %s6634_s26 }
 0x990   : > { %2511 = vrot.lane.b32.xlu0 %v7340_v4, %s6635_s7 }
 0x993   : > { %2513 = vrot.lane.b32.xlu1 %v7345_v22, %s6635_s7 }
 0x9ff   : > { %v2405_v25 = vpop.xlane.xlu0 %2404 }
 0xa03   : > { %v2188_v27 = vpop.xlane.xlu0 %2187  ;;  %v2408_v30 = vpop.xlane.xlu1 %2407 }
 0xa04   : > { %6307 = vrcp.f32 %v2188_v27 }
 0xa05   : > { %6309 = vrcp.f32 %v2405_v25 }
 0xa07   : > { %v6203_v32 = vpop.permute.xlu0 %6202  ;;  %v2191_v5 = vpop.xlane.xlu1 %2190 }
 0xa08   : > { %v6205_v34 = vunpack.i.h.bf16 %v6203_v32  ;;  %v6204_v35 = vunpack.i.l.bf16 %v6203_v32  ;;  %6311 = vrcp.f32 %v2191_v5  ;;  %v7478_v32 = vadd.f32 %v7357_v31, %v7337_v16 }
 0xa09   : > { %6313 = vrcp.f32 %v2408_v30  ;;  %v7474_v30 = vadd.f32 %v7355_v29, %v7337_v16 }
 0xa0a   : > { %v5949_v36 = vpack.c.bf16 %v6205_v34, %v6204_v35 }
 0xa0b   : > { %v6208_v26 = vpop.permute.xlu1 %6207  ;;  %v2512_v56 = vpop.permute.xlu0 %2511  ;;  %v7482_v5 = vpack.i.bf16 %v7478_v32, %v7474_v30 }
 0xa0c   : > { %v6210_v38 = vunpack.i.h.bf16 %v6208_v26  ;;  %v6209_v39 = vunpack.i.l.bf16 %v6208_v26  ;;  %5950 = vmatprep.subr.bf16.mxu0 %v5949_v36 }
 0xa0d   : > { %5952 = vmatpush3.bf16.msra.mxu0 %v5949_v36 }
 0xa0e   : > { %v6308_v4 = vpop.eup %6307  ;;  %v5959_v43 = vpack.c.bf16 %v6210_v38, %v6209_v39 }
 0xa0f   : > { %v6213_v22 = vpop.permute.xlu1 %6212  ;;  %v2194_v44 = vmul.f32 %v6308_v4, %v6302_v18  ;;  %v6310_v45 = vpop.eup %6309 }
 0xa10   : > { %5960 = vmatprep.subr.bf16.mxu0 %v5959_v43  ;;  %v6215_v47 = vunpack.i.h.bf16 %v6213_v22  ;;  %v6214_v48 = vunpack.i.l.bf16 %v6213_v22  ;;  %v2411_v53 = vmul.f32 %v6310_v45, %v6300_v15 }
 0xa11   : > { %5621 = vmatprep.mubr.msk.f32.mxu0 %vm1882_vm5, %v2194_v44 }
 0xa12   : > { %v6312_v50 = vpop.eup %6311  ;;  %v5963_v54 = vpack.c.bf16 %v6215_v47, %v6214_v48  ;;  %v7503_v47 = vld [vmem:[%s8053_s17 + $0x1] ss:$0 sm:$0xff] }
 0xa13   : > { %v2195_v51 = vmul.f32 %v6312_v50, %v6306_v23  ;;  %v6314_v52 = vpop.eup %6313  ;;  %v2514_v57 = vpop.permute.xlu1 %2513 }
 0xa14   : > { %v2412_v55 = vmul.f32 %v6314_v52, %v6304_v19 }
 0xa15   : > { %5622 = vmatmul.mubr.msk.f32.vlgmr.msra.gmra.mrb[18].mxu0 %vm1882_vm5, %v2195_v51 }
 0xa16   : > { %5962 = vmatpush3.bf16.msra.mxu0 %v5959_v43  ;;  %5635 = vmatprep.mubr.msk.f32.mxu0 %vm1882_vm5, %v2411_v53 }
 0xa17   : > { %5965 = vmatprep.subr.msk.bf16.mxu0 %vm7373_vm6, %v5963_v54 }
 0xa19   : > { %5636 = vmatmul.mubr.msk.f32.vlgmr.msra.gmra.mrb[20].mxu0 %vm1882_vm5, %v2412_v55 }
 0xa1a   : > { %5642 = vmatprep.mubr.msk.f32.mxu0 %vm1882_vm5, %v2512_v56 }
 0xa1f   : > { %5968 = vmatpush3.bf16.xpose.msk.msra.mxu0 %vm7373_vm6, %v5963_v54 }
 0xa20   : > { %5980 = vmatprep.subr.bf16.mxu0 %v7363_v37 }
 0xa26   : > { %5643 = vmatmul.mubr.msk.f32.vlgmr.msra.gmra.mrb[22].mxu0 %vm1882_vm5, %v2514_v57 }
 0xa27   : > { %5982 = vmatpush3.bf16.msra.mxu0 %v7363_v37 }
 0xae8   : > { %v7456_v58 = vpop.f32.mrb[18].mxu0 }
 0xae9   : > { %v7458_v60 = vpop.f32.mrb[19].mxu0 }
 0xaec   : > { %v7460_v62 = vpop.f32.mrb[20].mxu0 }
 0xaed   : > { %v7462_v0 = vpop.f32.mrb[21].mxu0 }
 0xaf9   : > { %v5644_v1 = vpop.f32.mrb[22].mxu0 }
 0xafa   : > { %v2603_v2 = vmul.f32 0.25, %v5644_v1  ;;  %v2593_v6 = vpop.f32.mrb[23].mxu0 }
 0xafb   : > { %v2602_v8 = vmul.f32 0.25, %v2593_v6 }
 0xafc   : > { %v2605_v9 = vadd.f32 %v7386_v49, %v2603_v2 }
 0xafd   : > { %v2604_v10 = vadd.f32 %v7386_v49, %v2602_v8 }
 0xafe   : > { %v2609_v11 = vsel %vm1882_vm5, %v2605_v9, -inf }
 0xaff   : > { %2610 = vmax.xlane.f32.xlu1 %v2609_v11  ;;  %v2606_v37 = vsel %vm1882_vm5, %v2604_v10, -inf }
 0xb00   : > { %2607 = vmax.xlane.f32.xlu0 %v2606_v37 }
 0xb10   : > { %6217 = vrot.lane.b32.xlu1 %v7351_v28, %s6635_s7 }
 0xb8c   : > { %v2611_v12 = vpop.xlane.xlu1 %2610 }
 0xb8d   : > { %v2613_v3 = vsub.f32 %v2605_v9, %v2611_v12  ;;  %v2608_v15 = vpop.xlane.xlu0 %2607 }
 0xb8e   : > { %v2612_v17 = vsub.f32 %v2604_v10, %v2608_v15 }
 0xb8f   : > { %v2616_v18 = vmul.f32 1.442695, %v2613_v3 }
 0xb90   : > { %v2614_v19 = vmul.f32 1.442695, %v2612_v17  ;;  %v6218_v20 = vpop.permute.xlu1 %6217 }
 0xb91   : > { %6315 = vpow2.f32 %v2616_v18  ;;  %v6220_v21 = vunpack.i.h.bf16 %v6218_v20  ;;  %v6219_v23 = vunpack.i.l.bf16 %v6218_v20 }
 0xb92   : > { %6317 = vpow2.f32 %v2614_v19 }
 0xb93   : > { %v5969_v49 = vpack.c.bf16 %v6220_v21, %v6219_v23 }
 0xb95   : > { %5970 = vmatprep.subr.bf16.mxu1 %v5969_v49 }
 0xb96   : > { %5972 = vmatpush3.bf16.msra.mxu1 %v5969_v49 }
 0xb9b   : > { %v6316_v24 = vpop.eup %6315 }
 0xb9c   : > { %v2621_v25 = vsel %vm1882_vm5, %v6316_v24, 0.0  ;;  %v6318_v27 = vpop.eup %6317 }
 0xb9d   : > { %2622 = vadd.xlane.f32.xlu0 %v2621_v25  ;;  %v2618_v28 = vsel %vm1882_vm5, %v6318_v27, 0.0 }
 0xba1   : > { %2619 = vadd.xlane.f32.xlu0 %v2618_v28 }
 0xbb7   : > { %6222 = vrot.lane.b32.xlu0 %v7482_v5, %s6629_s11 }
 0xc2a   : > { %v2623_v34 = vpop.xlane.xlu0 %2622 }
 0xc2b   : > { %6319 = vrcp.f32 %v2623_v34 }
 0xc2e   : > { %v2620_v35 = vpop.xlane.xlu0 %2619 }
 0xc2f   : > { %6321 = vrcp.f32 %v2620_v35 }
 0xc32   : > { %v6223_v36 = vpop.permute.xlu0 %6222 }
 0xc33   : > { %v6225_v26 = vunpack.i.h.bf16 %v6223_v36  ;;  %v6224_v38 = vunpack.i.l.bf16 %v6223_v36 }
 0xc35   : > { %v5973_v29 = vpack.c.bf16 %v6225_v26, %v6224_v38  ;;  %v6320_v31 = vpop.eup %6319 }
 0xc36   : > { %v2627_v43 = vmul.f32 %v6320_v31, %v6316_v24 }
 0xc37   : > { %5975 = vmatprep.subr.msk.bf16.mxu1 %vm7373_vm6, %v5973_v29 }
 0xc39   : > { %v6322_v39 = vpop.eup %6321 }
 0xc3a   : > { %v2626_v4 = vmul.f32 %v6322_v39, %v6318_v27 }
 0xc3c   : > { %5649 = vmatprep.mubr.msk.f32.mxu1 %vm1882_vm5, %v2626_v4 }
 0xc3d   : > { %5650 = vmatmul.mubr.msk.f32.vlgmr.msra.gmra.mrb[32].mxu1 %vm1882_vm5, %v2627_v43 }
 0xc3e   : > { %5978 = vmatpush3.bf16.xpose.msk.msra.mxu1 %vm7373_vm6, %v5973_v29  ;;  %5656 = vmatprep.mubr.msk.f32.mxu1 %vm1882_vm5, %v7474_v30 }
 0xc45   : > { %5657 = vmatmul.mubr.msk.f32.vlgmr.msra.gmra.mrb[34].mxu1 %vm1882_vm5, %v7478_v32 }
 0xd10   : > { %v7496_v22 = vpop.f32.mrb[32].mxu1 }
 0xd11   : > { %v7498_v44 = vpop.f32.mrb[33].mxu1 }
 0xd18   : > { %v5658_v45 = vpop.f32.mrb[34].mxu1 }
 0xd19   : > { %v2817_v48 = vmul.f32 0.25, %v5658_v45  ;;  %v2807_v50 = vpop.f32.mrb[35].mxu1 }
 0xd1a   : > { %v2816_v51 = vmul.f32 0.25, %v2807_v50 }
 0xd1b   : > { %v2823_v52 = vadd.f32 %v7503_v47, %v2817_v48 }
 0xd1c   : > { %v2822_v53 = vadd.f32 %v7503_v47, %v2816_v51 }
 0xd1d   : > { %v2827_v54 = vsel %vm1882_vm5, %v2823_v52, -inf }
 0xd1e   : > { %2828 = vmax.xlane.f32.xlu0 %v2827_v54  ;;  %v2824_v55 = vsel %vm1882_vm5, %v2822_v53, -inf }
 0xd1f   : > { %2825 = vmax.xlane.f32.xlu1 %v2824_v55 }
 0xd30   : > { %6227 = vrot.lane.b32.xlu1 %v7482_v5, %s6630_s23 }
 0xdab   : > { %v2829_v56 = vpop.xlane.xlu0 %2828 }
 0xdac   : > { %v2831_v57 = vsub.f32 %v2823_v52, %v2829_v56  ;;  %v2826_v1 = vpop.xlane.xlu1 %2825 }
 0xdad   : > { %v2830_v2 = vsub.f32 %v2822_v53, %v2826_v1 }
 0xdae   : > { %v2834_v6 = vmul.f32 1.442695, %v2831_v57 }
 0xdaf   : > { %v2832_v8 = vmul.f32 1.442695, %v2830_v2 }
 0xdb0   : > { %6323 = vpow2.f32 %v2834_v6  ;;  %v6228_v9 = vpop.permute.xlu1 %6227 }
 0xdb1   : > { %6325 = vpow2.f32 %v2832_v8  ;;  %v6230_v10 = vunpack.i.h.bf16 %v6228_v9  ;;  %v6229_v11 = vunpack.i.l.bf16 %v6228_v9 }
 0xdb3   : > { %v5983_v37 = vpack.c.bf16 %v6230_v10, %v6229_v11 }
 0xdb5   : > { %5985 = vmatprep.subr.msk.bf16.mxu0 %vm7373_vm6, %v5983_v37 }
 0xdba   : > { %v6324_v12 = vpop.eup %6323 }
 0xdbb   : > { %v6326_v3 = vpop.eup %6325  ;;  %v2839_v15 = vsel %vm1882_vm5, %v6324_v12, 0.0 }
 0xdbc   : > { %2840 = vadd.xlane.f32.xlu0 %v2839_v15  ;;  %v2836_v17 = vsel %vm1882_vm5, %v6326_v3, 0.0 }
 0xdbd   : > { %2837 = vadd.xlane.f32.xlu1 %v2836_v17 }
 0xdce   : > { %2931 = vrot.lane.b32.xlu1 %v7478_v32, %s6631_s25 }
 0xdd2   : > { %2929 = vrot.lane.b32.xlu0 %v7474_v30, %s6631_s25 }
 0xe49   : > { %v2841_v18 = vpop.xlane.xlu0 %2840 }
 0xe4a   : > { %6327 = vrcp.f32 %v2841_v18  ;;  %v2838_v19 = vpop.xlane.xlu1 %2837 }
 0xe4b   : > { %6329 = vrcp.f32 %v2838_v19 }
 0xe4d   : > { %v2930_v24 = vpop.permute.xlu0 %2929 }
 0xe4e   : > { %v2932_v25 = vpop.permute.xlu1 %2931 }
 0xe54   : > { %v6328_v20 = vpop.eup %6327 }
 0xe55   : > { %v6330_v21 = vpop.eup %6329  ;;  %v2845_v49 = vmul.f32 %v6328_v20, %v6324_v12 }
 0xe56   : > { %v2844_v23 = vmul.f32 %v6330_v21, %v6326_v3 }
 0xe58   : > { %5663 = vmatprep.mubr.msk.f32.mxu0 %vm1882_vm5, %v2844_v23 }
 0xe59   : > { %5664 = vmatmul.mubr.msk.f32.vlgmr.msra.gmra.mrb[24].mxu0 %vm1882_vm5, %v2845_v49 }
 0xe5a   : > { %5988 = vmatpush3.bf16.xpose.msk.msra.mxu0 %vm7373_vm6, %v5983_v37  ;;  %5670 = vmatprep.mubr.msk.f32.mxu0 %vm1882_vm5, %v2930_v24 }
 0xe61   : > { %5671 = vmatmul.mubr.msk.f32.vlgmr.msra.gmra.mrb[26].mxu0 %vm1882_vm5, %v2932_v25 }
 0xf2c   : > { %v5665_v27 = vpop.f32.mrb[24].mxu0 }
 0xf2d   : > { %2928 = vst.msk [vmem:[#allocation2 + $0x18] sm:$0xff] %vm1882_vm5, %v5665_v27  ;;  %v2918_v28 = vpop.f32.mrb[25].mxu0 }
 0xf2e   : > { %2927 = vst.msk [vmem:[#allocation2 + $0x10] sm:$0xff] %vm1882_vm5, %v2918_v28 }
 0xf34   : > { %v5672_v34 = vpop.f32.mrb[26].mxu0 }
 0xf35   : > { %v3021_v35 = vmul.f32 0.25, %v5672_v34  ;;  %v3011_v36 = vpop.f32.mrb[27].mxu0 }
 0xf36   : > { %v3020_v26 = vmul.f32 0.25, %v3011_v36 }
 0xf37   : > { %v3023_v38 = vadd.f32 %v7503_v47, %v3021_v35 }
 0xf38   : > { %v3022_v29 = vadd.f32 %v7503_v47, %v3020_v26 }
 0xf39   : > { %v3027_v31 = vsel %vm1882_vm5, %v3023_v38, -inf }
 0xf3a   : > { %3028 = vmax.xlane.f32.xlu0 %v3027_v31  ;;  %v3024_v39 = vsel %vm1882_vm5, %v3022_v29, -inf }
 0xf3b   : > { %3025 = vmax.xlane.f32.xlu1 %v3024_v39 }
 0xfc7   : > { %v3029_v4 = vpop.xlane.xlu0 %3028 }
 0xfc8   : > { %v3031_v43 = vsub.f32 %v3023_v38, %v3029_v4  ;;  %v3026_v45 = vpop.xlane.xlu1 %3025 }
 0xfc9   : > { %v3030_v48 = vsub.f32 %v3022_v29, %v3026_v45 }
 0xfca   : > { %v3034_v50 = vmul.f32 1.442695, %v3031_v43 }
 0xfcb   : > { %v3032_v51 = vmul.f32 1.442695, %v3030_v48 }
 0xfcc   : > { %6331 = vpow2.f32 %v3034_v50 }
 0xfcd   : > { %6333 = vpow2.f32 %v3032_v51 }
 0xfd6   : > { %v6332_v52 = vpop.eup %6331 }
 0xfd7   : > { %v6334_v53 = vpop.eup %6333  ;;  %v3039_v54 = vsel %vm1882_vm5, %v6332_v52, 0.0 }
 0xfd8   : > { %3040 = vadd.xlane.f32.xlu1 %v3039_v54  ;;  %v3036_v55 = vsel %vm1882_vm5, %v6334_v53, 0.0 }
 0xfd9   : > { %3037 = vadd.xlane.f32.xlu0 %v3036_v55 }
 0xfe9   : > { %6237 = vrot.lane.b32.xlu1 %v7482_v5, %s6632_s6 }
 0xfed   : > { %3145 = vrot.lane.b32.xlu1 %v7474_v30, %s6633_s29 }
 0xfef   : > { %6232 = vrot.lane.b32.xlu0 %v7365_v40, %s6631_s25 }
 0xff3   : > { %3147 = vrot.lane.b32.xlu0 %v7478_v32, %s6633_s29 }
0x1065   : > { %v3041_v56 = vpop.xlane.xlu1 %3040 }
0x1066   : > { %6335 = vrcp.f32 %v3041_v56  ;;  %v3038_v57 = vpop.xlane.xlu0 %3037 }
0x1067   : > { %6337 = vrcp.f32 %v3038_v57 }
0x1069   : > { %v6238_v1 = vpop.permute.xlu1 %6237 }
0x106a   : > { %v6233_v2 = vpop.permute.xlu0 %6232  ;;  %v6240_v6 = vunpack.i.h.bf16 %v6238_v1  ;;  %v6239_v8 = vunpack.i.l.bf16 %v6238_v1 }
0x106b   : > { %v6235_v9 = vunpack.i.h.bf16 %v6233_v2  ;;  %v6234_v10 = vunpack.i.l.bf16 %v6233_v2 }
0x106c   : > { %v5993_v37 = vpack.c.bf16 %v6240_v6, %v6239_v8 }
0x106d   : > { %v5989_v11 = vpack.c.bf16 %v6235_v9, %v6234_v10  ;;  %v3146_v18 = vpop.permute.xlu1 %3145 }
0x106e   : > { %v3148_v19 = vpop.permute.xlu0 %3147 }
0x106f   : > { %5990 = vmatprep.subr.bf16.mxu1 %v5989_v11 }
0x1070   : > { %v6336_v12 = vpop.eup %6335  ;;  %5992 = vmatpush3.bf16.msra.mxu1 %v5989_v11 }
0x1071   : > { %v6338_v3 = vpop.eup %6337  ;;  %5995 = vmatprep.subr.msk.bf16.mxu1 %vm7373_vm6, %v5993_v37  ;;  %v3045_v17 = vmul.f32 %v6336_v12, %v6332_v52 }
0x1072   : > { %v3044_v15 = vmul.f32 %v6338_v3, %v6334_v53 }
0x1074   : > { %5677 = vmatprep.mubr.msk.f32.mxu1 %vm1882_vm5, %v3044_v15 }
0x1075   : > { %5678 = vmatmul.mubr.msk.f32.vlgmr.msra.gmra.mrb[36].mxu1 %vm1882_vm5, %v3045_v17 }
0x1076   : > { %5684 = vmatprep.mubr.msk.f32.mxu1 %vm1882_vm5, %v3146_v18 }
0x1079   : > { %5998 = vmatpush3.bf16.xpose.msk.msra.mxu1 %vm7373_vm6, %v5993_v37 }
0x1080   : > { %5685 = vmatmul.mubr.msk.f32.vlgmr.msra.gmra.mrb[38].mxu1 %vm1882_vm5, %v3148_v19 }
0x1148   : > { %v7549_v20 = vpop.f32.mrb[36].mxu1 }
0x1149   : > { %v7551_v21 = vpop.f32.mrb[37].mxu1 }
0x1153   : > { %v5686_v23 = vpop.f32.mrb[38].mxu1 }
0x1154   : > { %v3237_v49 = vmul.f32 0.25, %v5686_v23  ;;  %v3227_v24 = vpop.f32.mrb[39].mxu1 }
0x1155   : > { %v3236_v25 = vmul.f32 0.25, %v3227_v24 }
0x1156   : > { %v3239_v27 = vadd.f32 %v7503_v47, %v3237_v49 }
0x1157   : > { %v3238_v28 = vadd.f32 %v7503_v47, %v3236_v25 }
0x1158   : > { %v3243_v34 = vsel %vm1882_vm5, %v3239_v27, -inf }
0x1159   : > { %3244 = vmax.xlane.f32.xlu0 %v3243_v34  ;;  %v3240_v35 = vsel %vm1882_vm5, %v3238_v28, -inf }
0x115a   : > { %3241 = vmax.xlane.f32.xlu1 %v3240_v35 }
0x11e6   : > { %v3245_v36 = vpop.xlane.xlu0 %3244 }
0x11e7   : > { %v3247_v26 = vsub.f32 %v3239_v27, %v3245_v36  ;;  %v3242_v38 = vpop.xlane.xlu1 %3241 }
0x11e8   : > { %v3246_v29 = vsub.f32 %v3238_v28, %v3242_v38  ;;  %v7593_v38 = vadd.f32 %v7361_v7, %v7337_v16 }
0x11e9   : > { %v3250_v31 = vmul.f32 1.442695, %v3247_v26  ;;  %v7589_v26 = vadd.f32 %v7359_v33, %v7337_v16 }
0x11ea   : > { %v3248_v39 = vmul.f32 1.442695, %v3246_v29 }
0x11eb   : > { %6339 = vpow2.f32 %v3250_v31  ;;  %v7597_v29 = vpack.i.bf16 %v7593_v38, %v7589_v26 }
0x11ec   : > { %6341 = vpow2.f32 %v3248_v39 }
0x11f5   : > { %v6340_v4 = vpop.eup %6339 }
0x11f6   : > { %v6342_v43 = vpop.eup %6341  ;;  %v3255_v45 = vsel %vm1882_vm5, %v6340_v4, 0.0 }
0x11f7   : > { %3256 = vadd.xlane.f32.xlu1 %v3255_v45  ;;  %v3252_v48 = vsel %vm1882_vm5, %v6342_v43, 0.0 }
0x11f8   : > { %3253 = vadd.xlane.f32.xlu0 %v3252_v48 }
0x1208   : > { %6247 = vrot.lane.b32.xlu1 %v7482_v5, %s6634_s26 }
0x120c   : > { %3359 = vrot.lane.b32.xlu1 %v7474_v30, %s6635_s7 }
0x120e   : > { %6242 = vrot.lane.b32.xlu0 %v7365_v40, %s6633_s29 }
0x1212   : > { %3361 = vrot.lane.b32.xlu0 %v7478_v32, %s6635_s7 }
0x1284   : > { %v3257_v50 = vpop.xlane.xlu1 %3256 }
0x1285   : > { %6343 = vrcp.f32 %v3257_v50  ;;  %v3254_v51 = vpop.xlane.xlu0 %3253 }
0x1286   : > { %6345 = vrcp.f32 %v3254_v51 }
0x1288   : > { %v6248_v52 = vpop.permute.xlu1 %6247 }
0x1289   : > { %v6243_v53 = vpop.permute.xlu0 %6242  ;;  %v6250_v54 = vunpack.i.h.bf16 %v6248_v52  ;;  %v6249_v55 = vunpack.i.l.bf16 %v6248_v52 }
0x128a   : > { %v6245_v56 = vunpack.i.h.bf16 %v6243_v53  ;;  %v6244_v57 = vunpack.i.l.bf16 %v6243_v53 }
0x128b   : > { %v6003_v1 = vpack.c.bf16 %v6250_v54, %v6249_v55 }
0x128c   : > { %v5999_v5 = vpack.c.bf16 %v6245_v56, %v6244_v57  ;;  %v3360_v8 = vpop.permute.xlu1 %3359  ;;  %v7620_v57 = vld [vmem:[%s8053_s17 + $0x2] ss:$0 sm:$0xff] }
0x128d   : > { %v3362_v9 = vpop.permute.xlu0 %3361 }
0x128e   : > { %6000 = vmatprep.subr.bf16.mxu0 %v5999_v5 }
0x128f   : > { %v6344_v30 = vpop.eup %6343  ;;  %6002 = vmatpush3.bf16.msra.mxu0 %v5999_v5 }
0x1290   : > { %v6346_v2 = vpop.eup %6345  ;;  %6005 = vmatprep.subr.msk.bf16.mxu0 %vm7373_vm6, %v6003_v1  ;;  %v3261_v6 = vmul.f32 %v6344_v30, %v6340_v4 }
0x1291   : > { %v3260_v32 = vmul.f32 %v6346_v2, %v6342_v43 }
0x1293   : > { %5691 = vmatprep.mubr.msk.f32.mxu0 %vm1882_vm5, %v3260_v32 }
0x1294   : > { %5692 = vmatmul.mubr.msk.f32.vlgmr.msra.gmra.mrb[28].mxu0 %vm1882_vm5, %v3261_v6 }
0x1295   : > { %5698 = vmatprep.mubr.msk.f32.mxu0 %vm1882_vm5, %v3360_v8 }
0x1298   : > { %6008 = vmatpush3.bf16.xpose.msk.msra.mxu0 %vm7373_vm6, %v6003_v1 }
0x1299   : > { %6020 = vmatprep.subr.bf16.mxu0 %v7367_v41 }
0x129f   : > { %5699 = vmatmul.mubr.msk.f32.vlgmr.msra.gmra.mrb[30].mxu0 %vm1882_vm5, %v3362_v9 }
0x12a0   : > { %6022 = vmatpush3.bf16.msra.mxu0 %v7367_v41 }
0x1367   : > { %v7577_v10 = vpop.f32.mrb[28].mxu0 }
0x1368   : > { %v7579_v11 = vpop.f32.mrb[29].mxu0 }
0x1372   : > { %v5700_v37 = vpop.f32.mrb[30].mxu0 }
0x1373   : > { %v3451_v12 = vmul.f32 0.25, %v5700_v37  ;;  %v3441_v3 = vpop.f32.mrb[31].mxu0 }
0x1374   : > { %v3450_v15 = vmul.f32 0.25, %v3441_v3 }
0x1375   : > { %v3453_v17 = vadd.f32 %v7503_v47, %v3451_v12 }
0x1376   : > { %v3452_v18 = vadd.f32 %v7503_v47, %v3450_v15 }
0x1377   : > { %v3457_v19 = vsel %vm1882_vm5, %v3453_v17, -inf }
0x1378   : > { %3458 = vmax.xlane.f32.xlu0 %v3457_v19  ;;  %v3454_v23 = vsel %vm1882_vm5, %v3452_v18, -inf }
0x1379   : > { %3455 = vmax.xlane.f32.xlu1 %v3454_v23 }
0x1405   : > { %v3459_v49 = vpop.xlane.xlu0 %3458 }
0x1406   : > { %v3461_v41 = vsub.f32 %v3453_v17, %v3459_v49  ;;  %v3456_v24 = vpop.xlane.xlu1 %3455 }
0x1407   : > { %v3460_v25 = vsub.f32 %v3452_v18, %v3456_v24 }
0x1408   : > { %v3464_v27 = vmul.f32 1.442695, %v3461_v41 }
0x1409   : > { %v3462_v28 = vmul.f32 1.442695, %v3460_v25 }
0x140a   : > { %6347 = vpow2.f32 %v3464_v27 }
0x140b   : > { %6349 = vpow2.f32 %v3462_v28 }
0x1414   : > { %v6348_v34 = vpop.eup %6347 }
0x1415   : > { %v6350_v35 = vpop.eup %6349  ;;  %v3469_v36 = vsel %vm1882_vm5, %v6348_v34, 0.0 }
0x1416   : > { %3470 = vadd.xlane.f32.xlu1 %v3469_v36  ;;  %v3466_v47 = vsel %vm1882_vm5, %v6350_v35, 0.0 }
0x1417   : > { %3467 = vadd.xlane.f32.xlu0 %v3466_v47 }
0x1427   : > { %6257 = vrot.lane.b32.xlu1 %v7597_v29, %s6629_s11  ;;  %s8054_s11 = sld [smem:[#allocation27_spill]] }
0x142d   : > { %6252 = vrot.lane.b32.xlu0 %v7365_v40, %s6635_s7 }
0x14a3   : > { %v3471_v31 = vpop.xlane.xlu1 %3470 }
0x14a4   : > { %6351 = vrcp.f32 %v3471_v31  ;;  %v3468_v39 = vpop.xlane.xlu0 %3467 }
0x14a5   : > { %6353 = vrcp.f32 %v3468_v39 }
0x14a7   : > { %v6258_v33 = vpop.permute.xlu1 %6257 }
0x14a8   : > { %v6253_v4 = vpop.permute.xlu0 %6252  ;;  %v6260_v43 = vunpack.i.h.bf16 %v6258_v33  ;;  %v6259_v45 = vunpack.i.l.bf16 %v6258_v33 }
0x14a9   : > { %v6255_v16 = vunpack.i.h.bf16 %v6253_v4  ;;  %v6254_v7 = vunpack.i.l.bf16 %v6253_v4 }
0x14aa   : > { %v6013_v50 = vpack.c.bf16 %v6260_v43, %v6259_v45 }
0x14ab   : > { %v6009_v48 = vpack.c.bf16 %v6255_v16, %v6254_v7 }
0x14ad   : > { %6010 = vmatprep.subr.bf16.mxu1 %v6009_v48 }
0x14ae   : > { %v6352_v51 = vpop.eup %6351  ;;  %6012 = vmatpush3.bf16.msra.mxu1 %v6009_v48 }
0x14af   : > { %v6354_v52 = vpop.eup %6353  ;;  %6015 = vmatprep.subr.msk.bf16.mxu1 %vm7373_vm6, %v6013_v50  ;;  %v3475_v53 = vmul.f32 %v6352_v51, %v6348_v34 }
0x14b0   : > { %v3474_v40 = vmul.f32 %v6354_v52, %v6350_v35 }
0x14b2   : > { %5705 = vmatprep.mubr.msk.f32.mxu1 %vm1882_vm5, %v3474_v40 }
0x14b3   : > { %5706 = vmatmul.mubr.msk.f32.vlgmr.msra.gmra.mrb[40].mxu1 %vm1882_vm5, %v3475_v53 }
0x14b4   : > { %5712 = vmatprep.mubr.msk.f32.mxu1 %vm1882_vm5, %v7589_v26 }
0x14b7   : > { %6018 = vmatpush3.bf16.xpose.msk.msra.mxu1 %vm7373_vm6, %v6013_v50 }
0x14be   : > { %5713 = vmatmul.mubr.msk.f32.vlgmr.msra.gmra.mrb[42].mxu1 %vm1882_vm5, %v7593_v38 }
0x1586   : > { %v7613_v54 = vpop.f32.mrb[40].mxu1 }
0x1587   : > { %v7615_v55 = vpop.f32.mrb[41].mxu1 }
0x1591   : > { %v5714_v56 = vpop.f32.mrb[42].mxu1 }
0x1592   : > { %v3664_v5 = vmul.f32 0.25, %v5714_v56  ;;  %v3654_v1 = vpop.f32.mrb[43].mxu1 }
0x1593   : > { %v3663_v30 = vmul.f32 0.25, %v3654_v1 }
0x1594   : > { %v3670_v2 = vadd.f32 %v7620_v57, %v3664_v5 }
0x1595   : > { %v3669_v32 = vadd.f32 %v7620_v57, %v3663_v30 }
0x1596   : > { %v3674_v6 = vsel %vm1882_vm5, %v3670_v2, -inf }
0x1597   : > { %3675 = vmax.xlane.f32.xlu0 %v3674_v6  ;;  %v3671_v8 = vsel %vm1882_vm5, %v3669_v32, -inf }
0x1598   : > { %3672 = vmax.xlane.f32.xlu1 %v3671_v8 }
0x1624   : > { %v3676_v9 = vpop.xlane.xlu0 %3675 }
0x1625   : > { %v3678_v37 = vsub.f32 %v3670_v2, %v3676_v9  ;;  %v3673_v12 = vpop.xlane.xlu1 %3672 }
0x1626   : > { %v3677_v3 = vsub.f32 %v3669_v32, %v3673_v12 }
0x1627   : > { %v3681_v15 = vmul.f32 1.442695, %v3678_v37 }
0x1628   : > { %v3679_v17 = vmul.f32 1.442695, %v3677_v3 }
0x1629   : > { %6355 = vpow2.f32 %v3681_v15 }
0x162a   : > { %6357 = vpow2.f32 %v3679_v17 }
0x1633   : > { %v6356_v18 = vpop.eup %6355 }
0x1634   : > { %v6358_v19 = vpop.eup %6357  ;;  %v3686_v23 = vsel %vm1882_vm5, %v6356_v18, 0.0 }
0x1635   : > { %3687 = vadd.xlane.f32.xlu1 %v3686_v23  ;;  %v3683_v49 = vsel %vm1882_vm5, %v6358_v19, 0.0 }
0x1636   : > { %3684 = vadd.xlane.f32.xlu0 %v3683_v49 }
0x1646   : > { %3776 = vrot.lane.b32.xlu1 %v7589_v26, %s6631_s25 }
0x164a   : > { %3778 = vrot.lane.b32.xlu1 %v7593_v38, %s6631_s25 }
0x164c   : > { %6262 = vrot.lane.b32.xlu0 %v7597_v29, %s6630_s23 }
0x16c2   : > { %v3688_v41 = vpop.xlane.xlu1 %3687 }
0x16c3   : > { %6359 = vrcp.f32 %v3688_v41  ;;  %v3685_v24 = vpop.xlane.xlu0 %3684 }
0x16c4   : > { %6361 = vrcp.f32 %v3685_v24 }
0x16c6   : > { %v3777_v39 = vpop.permute.xlu1 %3776 }
0x16c7   : > { %v6263_v25 = vpop.permute.xlu0 %6262 }
0x16c8   : > { %v6265_v27 = vunpack.i.h.bf16 %v6263_v25  ;;  %v6264_v28 = vunpack.i.l.bf16 %v6263_v25 }
0x16ca   : > { %v6023_v34 = vpack.c.bf16 %v6265_v27, %v6264_v28  ;;  %v3779_v33 = vpop.permute.xlu1 %3778 }
0x16cc   : > { %6025 = vmatprep.subr.msk.bf16.mxu0 %vm7373_vm6, %v6023_v34 }
0x16cd   : > { %v6360_v35 = vpop.eup %6359 }
0x16ce   : > { %v6362_v36 = vpop.eup %6361  ;;  %v3692_v31 = vmul.f32 %v6360_v35, %v6356_v18 }
0x16cf   : > { %v3691_v47 = vmul.f32 %v6362_v36, %v6358_v19 }
0x16d1   : > { %5719 = vmatprep.mubr.msk.f32.mxu0 %vm1882_vm5, %v3691_v47 }
0x16d2   : > { %5720 = vmatmul.mubr.msk.f32.vlgmr.msra.gmra.mrb[32].mxu0 %vm1882_vm5, %v3692_v31 }
0x16d3   : > { %6028 = vmatpush3.bf16.xpose.msk.msra.mxu0 %vm7373_vm6, %v6023_v34  ;;  %5726 = vmatprep.mubr.msk.f32.mxu0 %vm1882_vm5, %v3777_v39 }
0x16da   : > { %5727 = vmatmul.mubr.msk.f32.vlgmr.msra.gmra.mrb[34].mxu0 %vm1882_vm5, %v3779_v33 }
0x17a5   : > { %v5721_v4 = vpop.f32.mrb[32].mxu0 }
0x17a6   : > { %3775 = vst.msk [vmem:[#allocation2 + $0x28] sm:$0xff] %vm1882_vm5, %v5721_v4  ;;  %v3765_v43 = vpop.f32.mrb[33].mxu0 }
0x17a7   : > { %3774 = vst.msk [vmem:[#allocation2 + $0x20] sm:$0xff] %vm1882_vm5, %v3765_v43 }
0x17ad   : > { %v5728_v45 = vpop.f32.mrb[34].mxu0 }
0x17ae   : > { %v3868_v16 = vmul.f32 0.25, %v5728_v45  ;;  %v3858_v7 = vpop.f32.mrb[35].mxu0 }
0x17af   : > { %v3867_v48 = vmul.f32 0.25, %v3858_v7 }
0x17b0   : > { %v3870_v50 = vadd.f32 %v7620_v57, %v3868_v16 }
0x17b1   : > { %v3869_v51 = vadd.f32 %v7620_v57, %v3867_v48 }
0x17b2   : > { %v3874_v52 = vsel %vm1882_vm5, %v3870_v50, -inf }
0x17b3   : > { %3875 = vmax.xlane.f32.xlu1 %v3874_v52  ;;  %v3871_v40 = vsel %vm1882_vm5, %v3869_v51, -inf }
0x17b4   : > { %3872 = vmax.xlane.f32.xlu0 %v3871_v40 }
0x17c4   : > { %6267 = vrot.lane.b32.xlu1 %v7369_v42, %s6631_s25 }
0x17c8   : > { %3992 = vrot.lane.b32.xlu1 %v7589_v26, %s6633_s29 }
0x17cc   : > { %3994 = vrot.lane.b32.xlu1 %v7593_v38, %s6633_s29 }
0x1840   : > { %v3876_v53 = vpop.xlane.xlu1 %3875 }
0x1841   : > { %v3878_v56 = vsub.f32 %v3870_v50, %v3876_v53  ;;  %v3873_v5 = vpop.xlane.xlu0 %3872 }
0x1842   : > { %v3877_v1 = vsub.f32 %v3869_v51, %v3873_v5 }
0x1843   : > { %v3881_v30 = vmul.f32 1.442695, %v3878_v56 }
0x1844   : > { %v3879_v2 = vmul.f32 1.442695, %v3877_v1  ;;  %v6268_v32 = vpop.permute.xlu1 %6267 }
0x1845   : > { %6363 = vpow2.f32 %v3881_v30  ;;  %v6270_v6 = vunpack.i.h.bf16 %v6268_v32  ;;  %v6269_v8 = vunpack.i.l.bf16 %v6268_v32 }
0x1846   : > { %6365 = vpow2.f32 %v3879_v2 }
0x1847   : > { %v6029_v9 = vpack.c.bf16 %v6270_v6, %v6269_v8 }
0x1848   : > { %v3993_v34 = vpop.permute.xlu1 %3992 }
0x1849   : > { %6030 = vmatprep.subr.bf16.mxu1 %v6029_v9 }
0x184a   : > { %6032 = vmatpush3.bf16.msra.mxu1 %v6029_v9 }
0x184c   : > { %v3995_v35 = vpop.permute.xlu1 %3994 }
0x184f   : > { %v6364_v37 = vpop.eup %6363 }
0x1850   : > { %v3886_v12 = vsel %vm1882_vm5, %v6364_v37, 0.0  ;;  %v6366_v3 = vpop.eup %6365 }
0x1851   : > { %3887 = vadd.xlane.f32.xlu0 %v3886_v12  ;;  %v3883_v15 = vsel %vm1882_vm5, %v6366_v3, 0.0 }
0x1855   : > { %3884 = vadd.xlane.f32.xlu0 %v3883_v15 }
0x186b   : > { %6272 = vrot.lane.b32.xlu0 %v7597_v29, %s6632_s6 }
0x18de   : > { %v3888_v17 = vpop.xlane.xlu0 %3887 }
0x18df   : > { %6367 = vrcp.f32 %v3888_v17 }
0x18e2   : > { %v3885_v18 = vpop.xlane.xlu0 %3884 }
0x18e3   : > { %6369 = vrcp.f32 %v3885_v18 }
0x18e6   : > { %v6273_v19 = vpop.permute.xlu0 %6272 }
0x18e7   : > { %v6275_v23 = vunpack.i.h.bf16 %v6273_v19  ;;  %v6274_v49 = vunpack.i.l.bf16 %v6273_v19 }
0x18e9   : > { %v6033_v41 = vpack.c.bf16 %v6275_v23, %v6274_v49  ;;  %v6368_v24 = vpop.eup %6367 }
0x18ea   : > { %v3892_v28 = vmul.f32 %v6368_v24, %v6364_v37 }
0x18eb   : > { %6035 = vmatprep.subr.msk.bf16.mxu1 %vm7373_vm6, %v6033_v41 }
0x18ed   : > { %v6370_v25 = vpop.eup %6369 }
0x18ee   : > { %v3891_v27 = vmul.f32 %v6370_v25, %v6366_v3 }
0x18f0   : > { %5733 = vmatprep.mubr.msk.f32.mxu1 %vm1882_vm5, %v3891_v27 }
0x18f1   : > { %5734 = vmatmul.mubr.msk.f32.vlgmr.msra.gmra.mrb[44].mxu1 %vm1882_vm5, %v3892_v28 }
0x18f2   : > { %6038 = vmatpush3.bf16.xpose.msk.msra.mxu1 %vm7373_vm6, %v6033_v41  ;;  %5740 = vmatprep.mubr.msk.f32.mxu1 %vm1882_vm5, %v3993_v34 }
0x18f9   : > { %5741 = vmatmul.mubr.msk.f32.vlgmr.msra.gmra.mrb[46].mxu1 %vm1882_vm5, %v3995_v35 }
0x19c4   : > { %v7666_v36 = vpop.f32.mrb[44].mxu1 }
0x19c5   : > { %v7668_v47 = vpop.f32.mrb[45].mxu1 }
0x19cc   : > { %v5742_v31 = vpop.f32.mrb[46].mxu1 }
0x19cd   : > { %v4084_v39 = vmul.f32 0.25, %v5742_v31  ;;  %v4074_v33 = vpop.f32.mrb[47].mxu1 }
0x19ce   : > { %v4083_v4 = vmul.f32 0.25, %v4074_v33 }
0x19cf   : > { %v4086_v43 = vadd.f32 %v7620_v57, %v4084_v39 }
0x19d0   : > { %v4085_v45 = vadd.f32 %v7620_v57, %v4083_v4 }
0x19d1   : > { %v4090_v16 = vsel %vm1882_vm5, %v4086_v43, -inf }
0x19d2   : > { %4091 = vmax.xlane.f32.xlu1 %v4090_v16  ;;  %v4087_v7 = vsel %vm1882_vm5, %v4085_v45, -inf }
0x19d3   : > { %4088 = vmax.xlane.f32.xlu0 %v4087_v7 }
0x19e3   : > { %6277 = vrot.lane.b32.xlu1 %v7369_v42, %s6633_s29  ;;  %s8055_s29 = scalar_lea.vmem %s7936_s10, %s7062_s21 }
0x19e7   : > { %4206 = vrot.lane.b32.xlu1 %v7589_v26, %s6635_s7 }
0x19eb   : > { %4208 = vrot.lane.b32.xlu1 %v7593_v38, %s6635_s7 }
0x1a5f   : > { %v4092_v48 = vpop.xlane.xlu1 %4091 }
0x1a60   : > { %v4094_v50 = vsub.f32 %v4086_v43, %v4092_v48  ;;  %v4089_v51 = vpop.xlane.xlu0 %4088 }
0x1a61   : > { %v4093_v52 = vsub.f32 %v4085_v45, %v4089_v51 }
0x1a62   : > { %v4097_v40 = vmul.f32 1.442695, %v4094_v50 }
0x1a63   : > { %v4095_v53 = vmul.f32 1.442695, %v4093_v52  ;;  %v6278_v56 = vpop.permute.xlu1 %6277 }
0x1a64   : > { %6371 = vpow2.f32 %v4097_v40  ;;  %v6280_v5 = vunpack.i.h.bf16 %v6278_v56  ;;  %v6279_v1 = vunpack.i.l.bf16 %v6278_v56 }
0x1a65   : > { %6373 = vpow2.f32 %v4095_v53 }
0x1a66   : > { %v6039_v30 = vpack.c.bf16 %v6280_v5, %v6279_v1 }
0x1a67   : > { %v4207_v23 = vpop.permute.xlu1 %4206 }
0x1a68   : > { %6040 = vmatprep.subr.bf16.mxu0 %v6039_v30 }
0x1a69   : > { %6042 = vmatpush3.bf16.msra.mxu0 %v6039_v30 }
0x1a6e   : > { %v6372_v2 = vpop.eup %6371 }
0x1a6f   : > { %v4102_v26 = vsel %vm1882_vm5, %v6372_v2, 0.0  ;;  %v6374_v32 = vpop.eup %6373 }
0x1a70   : > { %4103 = vadd.xlane.f32.xlu0 %v4102_v26  ;;  %v4099_v38 = vsel %vm1882_vm5, %v6374_v32, 0.0 }
0x1a74   : > { %4100 = vadd.xlane.f32.xlu0 %v4099_v38 }
0x1a8a   : > { %6282 = vrot.lane.b32.xlu0 %v7597_v29, %s6634_s26  ;;  %v4209_v29 = vpop.permute.xlu1 %4208 }
0x1afd   : > { %v4104_v6 = vpop.xlane.xlu0 %4103 }
0x1afe   : > { %6375 = vrcp.f32 %v4104_v6 }
0x1b01   : > { %v4101_v8 = vpop.xlane.xlu0 %4100 }
0x1b02   : > { %6377 = vrcp.f32 %v4101_v8 }
0x1b05   : > { %v6283_v9 = vpop.permute.xlu0 %6282 }
0x1b06   : > { %v6285_v37 = vunpack.i.h.bf16 %v6283_v9  ;;  %v6284_v12 = vunpack.i.l.bf16 %v6283_v9 }
0x1b08   : > { %v6043_v3 = vpack.c.bf16 %v6285_v37, %v6284_v12  ;;  %v6376_v15 = vpop.eup %6375 }
0x1b09   : > { %v4108_v19 = vmul.f32 %v6376_v15, %v6372_v2 }
0x1b0a   : > { %6045 = vmatprep.subr.msk.bf16.mxu0 %vm7373_vm6, %v6043_v3 }
0x1b0c   : > { %v6378_v17 = vpop.eup %6377 }
0x1b0d   : > { %v4107_v18 = vmul.f32 %v6378_v17, %v6374_v32  ;;  %v4518_v17 = vld [vmem:[%s7040_s14] sm:$0xff] }
0x1b0f   : > { %5747 = vmatprep.mubr.msk.f32.mxu0 %vm1882_vm5, %v4107_v18  ;;  %v4519_v18 = vld [vmem:[%s7040_s14 + $0x8] sm:$0xff] }
0x1b10   : > { %5748 = vmatmul.mubr.msk.f32.vlgmr.msra.gmra.mrb[36].mxu0 %vm1882_vm5, %v4108_v19  ;;  %v4520_v19 = vld [vmem:[%s7040_s14 + $0x10] sm:$0xff] }
0x1b11   : > { %6048 = vmatpush3.bf16.xpose.msk.msra.mxu0 %vm7373_vm6, %v6043_v3  ;;  %5754 = vmatprep.mubr.msk.f32.mxu0 %vm1882_vm5, %v4207_v23  ;;  %v6063_v23 = vpack.c.bf16 %v4519_v18, %v4518_v17  ;;  %v5183_v17 = vld [vmem:[%s8055_s29] ss:$0 sm:$0xff] }
0x1b12   : > { %6062 = vmatprep.subr.bf16.mxu0 %v6626_v13  ;;  %v1573_v18 = vadd.f32 %v5183_v17, %v7319_v59 }
0x1b18   : > { %5755 = vmatmul.mubr.msk.f32.vlgmr.msra.gmra.mrb[38].mxu0 %vm1882_vm5, %v4209_v29  ;;  %v4521_v29 = vld [vmem:[%s7040_s14 + $0x18] sm:$0xff] }
0x1b19   : > { %5801 = vmatprep.mubr.msk.f32.mxu0 %vm6627_vm2, %v6628_v14  ;;  %6064 = vmatpush3.bf16.msra.mxu0 %v6063_v23 }
0x1b1a   : > { %6065 = vmatprep.subr.bf16.mxu0 %v6626_v13 }
0x1be3   : > { %v7695_v49 = vpop.f32.mrb[36].mxu0 }
0x1be4   : > { %v4187_v41 = vpop.f32.mrb[37].mxu0 }
0x1beb   : > { %v5756_v24 = vpop.f32.mrb[38].mxu0 }
0x1bec   : > { %v4298_v25 = vmul.f32 0.25, %v5756_v24  ;;  %v4288_v27 = vpop.f32.mrb[39].mxu0  ;;  %v4523_v24 = vld [vmem:[%s7040_s14 + $0x28] sm:$0xff] }
0x1bed   : > { %v4297_v28 = vmul.f32 0.25, %v4288_v27  ;;  %v4524_v27 = vld [vmem:[%s7040_s14 + $0x30] sm:$0xff] }
0x1bee   : > { %v4300_v46 = vadd.f32 %v7620_v57, %v4298_v25 }
0x1bef   : > { %v4299_v34 = vadd.f32 %v7620_v57, %v4297_v28  ;;  %v4525_v28 = vld [vmem:[%s7040_s14 + $0x38] sm:$0xff] }
0x1bf0   : > { %v4304_v35 = vsel %vm1882_vm5, %v4300_v46, -inf }
0x1bf1   : > { %4305 = vmax.xlane.f32.xlu1 %v4304_v35  ;;  %v4301_v31 = vsel %vm1882_vm5, %v4299_v34, -inf }
0x1bf2   : > { %4302 = vmax.xlane.f32.xlu0 %v4301_v31 }
0x1c02   : > { %6287 = vrot.lane.b32.xlu1 %v7369_v42, %s6635_s7 }
0x1c06   : > { %2289 = vrot.lane.b32.xlu1 %v7456_v58, %s6634_s26 }
0x1c0a   : > { %2502 = vrot.lane.b32.xlu1 %v7462_v0, %s6632_s6 }
0x1c0e   : > { %2717 = vrot.lane.b32.xlu1 %v7498_v44, %s6630_s23 }
0x1c12   : > { %3137 = vrot.lane.b32.xlu1 %v7551_v21, %s6634_s26 }
0x1c16   : > { %3351 = vrot.lane.b32.xlu1 %v7579_v11, %s6632_s6 }
0x1c1a   : > { %3565 = vrot.lane.b32.xlu1 %v7615_v55, %s6630_s23 }
0x1c1e   : > { %3984 = vrot.lane.b32.xlu1 %v7668_v47, %s6634_s26 }
0x1c22   : > { %4198 = vrot.lane.b32.xlu1 %v4187_v41, %s6632_s6  ;;  %v4522_v41 = vld [vmem:[%s7040_s14 + $0x20] sm:$0xff]  ;;  %s8058_s14 = scalar_lea.vmem %s8057_s19, %s7062_s21 }
0x1c23   : > { %v6069_v25 = vpack.c.bf16 %v4523_v24, %v4522_v41 }
0x1c7e   : > { %v4306_v42 = vpop.xlane.xlu1 %4305 }
0x1c7f   : > { %v4308_v58 = vsub.f32 %v4300_v46, %v4306_v42  ;;  %v4303_v0 = vpop.xlane.xlu0 %4302  ;;  %v6072_v46 = vpack.c.bf16 %v4525_v28, %v4524_v27  ;;  %v5283_v27 = vld [vmem:[%s1134_s30] ss:$0 sm:$0xff] }
0x1c80   : > { %v4307_v57 = vsub.f32 %v4299_v34, %v4303_v0  ;;  %v4420_v0 = vld [vmem:[%s8054_s11] sm:$0xff] }
0x1c81   : > { %v4311_v39 = vmul.f32 1.442695, %v4308_v58  ;;  %v5188_v28 = vld [vmem:[%s1131_s16] ss:$0 sm:$0xff] }
0x1c82   : > { %v4309_v44 = vmul.f32 1.442695, %v4307_v57  ;;  %v6288_v33 = vpop.permute.xlu1 %6287  ;;  %v4421_v57 = vld [vmem:[%s8054_s11 + $0x8] sm:$0xff] }
0x1c83   : > { %v6290_v4 = vunpack.i.h.bf16 %v6288_v33  ;;  %v6289_v21 = vunpack.i.l.bf16 %v6288_v33  ;;  %v4649_v33 = vld [vmem:[%s7046_s1 + $0x8] sm:$0xff] }
0x1c84   : > { %6379 = vpow2.f32 %v4309_v44  ;;  %v4648_v44 = vld [vmem:[%s7046_s1] sm:$0xff] }
0x1c85   : > { %v6049_v11 = vpack.c.bf16 %v6290_v4, %v6289_v21  ;;  %6381 = vpow2.f32 %v4311_v39  ;;  %v4422_v39 = vld [vmem:[%s8054_s11 + $0x10] sm:$0xff]  ;;  %v6075_v4 = vpack.c.bf16 %v4649_v33, %v4648_v44 }
0x1c86   : > { %v2290_v43 = vpop.permute.xlu1 %2289  ;;  %v6389_v33 = vld [vmem:[%s8041_s4 + $0x10] sm:$0xff] }
0x1c87   : > { %2295 = vst.msk [vmem:[#allocation2 + $0x8] sm:$0xff] %vm2293_vm7, %v2290_v43  ;;  %6050 = vmatprep.subr.bf16.mxu1 %v6049_v11 }
0x1c88   : > { %6052 = vmatpush3.bf16.msra.mxu1 %v6049_v11 }
0x1c89   : > { %6053 = vmatprep.subr.bf16.mxu1 %v6626_v13 }
0x1c8a   : > { %v2503_v55 = vpop.permute.xlu1 %2502 }
0x1c8e   : > { %v6380_v47 = vpop.eup %6379  ;;  %v2718_v45 = vpop.permute.xlu1 %2717 }
0x1c8f   : > { %v4313_v16 = vsel %vm1882_vm5, %v6380_v47, 0.0  ;;  %v6382_v7 = vpop.eup %6381 }
0x1c90   : > { %4314 = vadd.xlane.f32.xlu0 %v4313_v16  ;;  %v4316_v50 = vsel %vm1882_vm5, %v6382_v7, 0.0  ;;  %v4650_v16 = vld [vmem:[%s7046_s1 + $0x10] sm:$0xff] }
0x1c92   : > { %v3138_v48 = vpop.permute.xlu1 %3137 }
0x1c93   : > { %3143 = vst.msk [vmem:[#allocation2 + $0x10] sm:$0xff] %vm2293_vm7, %v3138_v48 }
0x1c94   : > { %4317 = vadd.xlane.f32.xlu0 %v4316_v50  ;;  %v4652_v50 = vld [vmem:[%s7046_s1 + $0x20] sm:$0xff] }
0x1c96   : > { %v3352_v51 = vpop.permute.xlu1 %3351 }
0x1c97   : > { %3357 = vst.msk [vmem:[#allocation2 + $0x10] sm:$0xff] %vm2508_vm8, %v3352_v51  ;;  %v4653_v51 = vld [vmem:[%s7046_s1 + $0x28] sm:$0xff] }
0x1c9a   : > { %v3566_v52 = vpop.permute.xlu1 %3565 }
0x1c9b   : > { %3571 = vst.msk [vmem:[#allocation2 + $0x10] sm:$0xff] %vm2723_vm9, %v3566_v52  ;;  %v6081_v52 = vpack.c.bf16 %v4653_v51, %v4652_v50 }
0x1c9e   : > { %v3985_v40 = vpop.permute.xlu1 %3984 }
0x1c9f   : > { %3990 = vst.msk [vmem:[#allocation2 + $0x20] sm:$0xff] %vm2293_vm7, %v3985_v40  ;;  %v4654_v40 = vld [vmem:[%s7046_s1 + $0x30] sm:$0xff] }
0x1ca2   : > { %v4199_v53 = vpop.permute.xlu1 %4198  ;;  %v4425_v9 = vld [vmem:[#allocation2 + $0x10] sm:$0xff] }
0x1ca3   : > { %4204 = vst.msk [vmem:[#allocation2 + $0x20] sm:$0xff] %vm2508_vm8, %v4199_v53  ;;  %v4655_v53 = vld [vmem:[%s7046_s1 + $0x38] sm:$0xff] }
0x1caa   : > { %2287 = vrot.lane.b32.xlu0 %v7458_v60, %s6634_s26 }
0x1cae   : > { %2504 = vrot.lane.b32.xlu0 %v7460_v62, %s6632_s6 }
0x1cb2   : > { %2719 = vrot.lane.b32.xlu0 %v7496_v22, %s6630_s23 }
0x1cb6   : > { %3139 = vrot.lane.b32.xlu0 %v7549_v20, %s6634_s26 }
0x1cba   : > { %3353 = vrot.lane.b32.xlu0 %v7577_v10, %s6632_s6 }
0x1cbe   : > { %3567 = vrot.lane.b32.xlu0 %v7613_v54, %s6630_s23 }
0x1cc2   : > { %3986 = vrot.lane.b32.xlu0 %v7666_v36, %s6634_s26 }
0x1cc6   : > { %4200 = vrot.lane.b32.xlu0 %v7695_v49, %s6632_s6  ;;  %v6066_v49 = vpack.c.bf16 %v4521_v29, %v4520_v19  ;;  %v6387_v19 = vld [vmem:[%s8041_s4] sm:$0xff] }
0x1cc7   : > { %v1586_v23 = vadd.f32 %v6387_v19, %v1573_v18  ;;  %v5279_v29 = vld [vmem:[%s8058_s14] ss:$0 sm:$0xff] }
0x1cc8   : > { %6067 = vmatpush3.bf16.msra.mxu0 %v6066_v49  ;;  %v1578_v49 = vadd.f32 %v5183_v17, %v7321_v61  ;;  %v1583_v61 = vadd.f32 %v5183_v17, %v7323_v63  ;;  %v5291_v18 = vld [vmem:[%s8066_s15] ss:$0 sm:$0xff] }
0x1cc9   : > { %6068 = vmatprep.subr.bf16.mxu0 %v6626_v13 }
0x1ccc   : > { %6070 = vmatpush3.bf16.msra.mxu0 %v6069_v25 }
0x1ccd   : > { %6071 = vmatprep.subr.bf16.mxu0 %v6626_v13 }
0x1cd0   : > { %6073 = vmatpush3.bf16.msra.mxu0 %v6072_v46  ;;  %v6388_v46 = vld [vmem:[%s8041_s4 + $0x8] sm:$0xff] }
0x1cd1   : > { %6086 = vmatprep.subr.bf16.mxu0 %v6626_v13 }
0x1d1d   : > { %v4315_v60 = vpop.xlane.xlu0 %4314 }
0x1d1e   : > { %6383 = vrcp.f32 %v4315_v60  ;;  %v6084_v60 = vpack.c.bf16 %v4655_v53, %v4654_v40 }
0x1d21   : > { %v4318_v62 = vpop.xlane.xlu0 %4317 }
0x1d22   : > { %6385 = vrcp.f32 %v4318_v62  ;;  %v4755_v62 = vld [vmem:[%s7101_s24] sm:$0xff] }
0x1d25   : > { %v2288_v22 = vpop.permute.xlu0 %2287 }
0x1d26   : > { %2294 = vst.msk [vmem:[#allocation2] sm:$0xff] %vm2293_vm7, %v2288_v22  ;;  %v4756_v22 = vld [vmem:[%s7101_s24 + $0x8] sm:$0xff] }
0x1d27   : > { %2509 = vst.msk [vmem:[#allocation2] sm:$0xff] %vm2508_vm8, %v2503_v55 }
0x1d28   : > { %v6384_v20 = vpop.eup %6383  ;;  %2724 = vst.msk [vmem:[#allocation2] sm:$0xff] %vm2723_vm9, %v2718_v45 }
0x1d29   : > { %v2505_v10 = vpop.permute.xlu0 %2504  ;;  %v4321_v54 = vmul.f32 %v6384_v20, %v6380_v47  ;;  %v4757_v20 = vld [vmem:[%s7101_s24 + $0x10] sm:$0xff] }
0x1d2a   : > { %2510 = vst.msk [vmem:[#allocation2 + $0x8] sm:$0xff] %vm2508_vm8, %v2505_v10  ;;  %v6087_v10 = vpack.c.bf16 %v4756_v22, %v4755_v62  ;;  %v4769_v62 = vld [vmem:[%s7101_s24 + $0x70] sm:$0xff]  ;;  %v4770_v22 = vld [vmem:[%s7101_s24 + $0x78] sm:$0xff] }
0x1d2b   : > { %5761 = vmatprep.mubr.msk.f32.mxu1 %vm1882_vm5, %v4321_v54  ;;  %v4758_v54 = vld [vmem:[%s7101_s24 + $0x18] sm:$0xff] }
0x1d2c   : > { %v6386_v36 = vpop.eup %6385 }
0x1d2d   : > { %v4322_v56 = vmul.f32 %v6386_v36, %v6382_v7  ;;  %v2720_v5 = vpop.permute.xlu0 %2719  ;;  %v4651_v7 = vld [vmem:[%s7046_s1 + $0x18] sm:$0xff]  ;;  %v6090_v36 = vpack.c.bf16 %v4758_v54, %v4757_v20  ;;  %v6108_v20 = vpack.c.bf16 %v4770_v22, %v4769_v62 }
0x1d2e   : > { %2725 = vst.msk [vmem:[#allocation2 + $0x8] sm:$0xff] %vm2723_vm9, %v2720_v5  ;;  %v6078_v48 = vpack.c.bf16 %v4651_v7, %v4650_v16  ;;  %v4760_v5 = vld [vmem:[%s7101_s24 + $0x28] sm:$0xff] }
0x1d2f   : > { %5762 = vmatmul.mubr.msk.f32.vlgmr.msra.gmra.mrb[48].mxu1 %vm1882_vm5, %v4322_v56  ;;  %v4423_v2 = vld [vmem:[#allocation2] sm:$0xff] }
0x1d30   : > { %5776 = vmatprep.mubr.msk.f32.mxu1 %vm6627_vm2, %v6628_v14  ;;  %v4759_v56 = vld [vmem:[%s7101_s24 + $0x20] sm:$0xff] }
0x1d31   : > { %v3140_v1 = vpop.permute.xlu0 %3139 }
0x1d32   : > { %3144 = vst.msk [vmem:[#allocation2 + $0x18] sm:$0xff] %vm2293_vm7, %v3140_v1  ;;  %v6093_v1 = vpack.c.bf16 %v4760_v5, %v4759_v56 }
0x1d35   : > { %v3354_v30 = vpop.permute.xlu0 %3353  ;;  %v4424_v26 = vld [vmem:[#allocation2 + $0x8] sm:$0xff] }
0x1d36   : > { %3358 = vst.msk [vmem:[#allocation2 + $0x18] sm:$0xff] %vm2508_vm8, %v3354_v30  ;;  %v6054_v32 = vpack.c.bf16 %v4424_v26, %v4423_v2  ;;  %v4761_v30 = vld [vmem:[%s7101_s24 + $0x30] sm:$0xff]  ;;  %v4762_v2 = vld [vmem:[%s7101_s24 + $0x38] sm:$0xff] }
0x1d37   : > { %v6096_v26 = vpack.c.bf16 %v4762_v2, %v4761_v30 }
0x1d38   : > { %6055 = vmatpush3.bf16.msra.mxu1 %v6054_v32  ;;  %v4763_v32 = vld [vmem:[%s7101_s24 + $0x40] sm:$0xff] }
0x1d39   : > { %v3568_v38 = vpop.permute.xlu0 %3567  ;;  %6056 = vmatprep.subr.bf16.mxu1 %v6626_v13 }
0x1d3a   : > { %3572 = vst.msk [vmem:[#allocation2 + $0x18] sm:$0xff] %vm2723_vm9, %v3568_v38  ;;  %v4764_v38 = vld [vmem:[%s7101_s24 + $0x48] sm:$0xff] }
0x1d3d   : > { %v3987_v6 = vpop.permute.xlu0 %3986 }
0x1d3e   : > { %3991 = vst.msk [vmem:[#allocation2 + $0x28] sm:$0xff] %vm2293_vm7, %v3987_v6  ;;  %v6099_v6 = vpack.c.bf16 %v4764_v38, %v4763_v32 }
0x1d41   : > { %v4201_v8 = vpop.permute.xlu0 %4200  ;;  %v4426_v37 = vld [vmem:[#allocation2 + $0x18] sm:$0xff] }
0x1d42   : > { %4205 = vst.msk [vmem:[#allocation2 + $0x28] sm:$0xff] %vm2508_vm8, %v4201_v8  ;;  %v6057_v12 = vpack.c.bf16 %v4426_v37, %v4425_v9  ;;  %v4765_v8 = vld [vmem:[%s7101_s24 + $0x50] sm:$0xff]  ;;  %v4766_v9 = vld [vmem:[%s7101_s24 + $0x58] sm:$0xff] }
0x1d43   : > { %v6102_v37 = vpack.c.bf16 %v4766_v9, %v4765_v8  ;;  %v5289_v9 = vld [vmem:[%s1125_s2] ss:$0 sm:$0xff] }
0x1d44   : > { %6058 = vmatpush3.bf16.msra.mxu1 %v6057_v12  ;;  %v4767_v12 = vld [vmem:[%s7101_s24 + $0x60] sm:$0xff] }
0x1d45   : > { %6059 = vmatprep.subr.bf16.mxu1 %v6626_v13 }
0x1e02   : > { %v5763_v3 = vpop.f32.mrb[48].mxu1 }
0x1e03   : > { %4414 = vrot.lane.b32.xlu0 %v5763_v3, %s6630_s23  ;;  %v4401_v15 = vpop.f32.mrb[49].mxu1  ;;  %v4768_v3 = vld [vmem:[%s7101_s24 + $0x68] sm:$0xff] }
0x1e04   : > { %4412 = vrot.lane.b32.xlu1 %v4401_v15, %s6630_s23  ;;  %v6105_v15 = vpack.c.bf16 %v4768_v3, %v4767_v12 }
0x1e75   : > { %v4415_v34 = vpop.permute.xlu0 %4414 }
0x1e76   : > { %4419 = vst.msk [vmem:[#allocation2 + $0x28] sm:$0xff] %vm2723_vm9, %v4415_v34  ;;  %v4413_v35 = vpop.permute.xlu1 %4412  ;;  %v1587_v34 = vadd.f32 %v6388_v46, %v1578_v49 }
0x1e77   : > { %4418 = vst.msk [vmem:[#allocation2 + $0x20] sm:$0xff] %vm2723_vm9, %v4413_v35 }
0x1e7d   : > { %v4428_v31 = vld [vmem:[#allocation2 + $0x28] sm:$0xff] }
0x1e7e   : > { %v4427_v42 = vld [vmem:[#allocation2 + $0x20] sm:$0xff] }
0x1e7f   : > { %v6060_v58 = vpack.c.bf16 %v4428_v31, %v4427_v42 }
0x1e81   : > { %6061 = vmatpush3.bf16.msra.mxu1 %v6060_v58 }
0x1e82   : > { %6074 = vmatprep.subr.bf16.mxu1 %v6626_v13 }
0x1e84   : > { %5777 = vmatmul.mubr.msk.f32.vlgmr.msra.gmra.mrb[50].mxu1 %vm1284_vm3, %v4420_v0 }
0x1e85   : > { %5779 = vmatprep.mubr.msk.f32.mxu1 %vm6627_vm2, %v6628_v14  ;;  %6076 = vmatpush3.bf16.msra.mxu1 %v6075_v4  ;;  %v1588_v4 = vadd.f32 %v6389_v33, %v1583_v61 }
0x1e86   : > { %6077 = vmatprep.subr.bf16.mxu1 %v6626_v13 }
0x1e88   : > { %5780 = vmatmul.mubr.msk.f32.gmra.mrb[52].mxu1 %vm1284_vm3, %v4421_v57 }
0x1e89   : > { %5782 = vmatprep.mubr.msk.f32.mxu1 %vm6627_vm2, %v6628_v14  ;;  %6079 = vmatpush3.bf16.msra.mxu1 %v6078_v48 }
0x1e8a   : > { %6080 = vmatprep.subr.bf16.mxu1 %v6626_v13 }
0x1e8c   : > { %5783 = vmatmul.mubr.msk.f32.gmra.mrb[54].mxu1 %vm1284_vm3, %v4422_v39 }
0x1e8d   : > { %5826 = vmatprep.mubr.msk.f32.mxu1 %vm6627_vm2, %v6628_v14  ;;  %6082 = vmatpush3.bf16.msra.mxu1 %v6081_v52 }
0x1e8e   : > { %6083 = vmatprep.subr.bf16.mxu1 %v6626_v13 }
0x1e91   : > { %6085 = vmatpush3.bf16.msra.mxu1 %v6084_v60 }
0x1f57   : > { %v4504_v21 = vpop.f32.mrb[50].mxu1 }
0x1f58   : > { %5802 = vmatmul.mubr.msk.f32.vlgmr.msra.gmra.mrb[40].mxu0 %vm1389_vm4, %v4504_v21  ;;  %v5778_v11 = vpop.f32.mrb[51].mxu1 }
0x1f59   : > { %5804 = vmatprep.mubr.msk.f32.mxu0 %vm6627_vm2, %v6628_v14  ;;  %6088 = vmatpush3.bf16.msra.mxu0 %v6087_v10  ;;  %v5285_v10 = vld [vmem:[%s1117_s12] ss:$0 sm:$0xff] }
0x1f5a   : > { %6089 = vmatprep.subr.bf16.mxu0 %v6626_v13 }
0x1f5b   : > { %v4509_v43 = vpop.f32.mrb[52].mxu1 }
0x1f5c   : > { %5805 = vmatmul.mubr.msk.f32.gmra.mrb[42].mxu0 %vm1389_vm4, %v4509_v43  ;;  %v5781_v55 = vpop.f32.mrb[53].mxu1 }
0x1f5d   : > { %5807 = vmatprep.mubr.msk.f32.mxu0 %vm6627_vm2, %v6628_v14  ;;  %6091 = vmatpush3.bf16.msra.mxu0 %v6090_v36 }
0x1f5e   : > { %6092 = vmatprep.subr.bf16.mxu0 %v6626_v13 }
0x1f5f   : > { %v4514_v47 = vpop.f32.mrb[54].mxu1 }
0x1f60   : > { %5808 = vmatmul.mubr.msk.f32.gmra.mrb[44].mxu0 %vm1389_vm4, %v4514_v47  ;;  %v5784_v45 = vpop.f32.mrb[55].mxu1 }
0x1f61   : > { %5867 = vmatprep.mubr.msk.f32.mxu0 %vm6627_vm2, %v6628_v14  ;;  %6094 = vmatpush3.bf16.msra.mxu0 %v6093_v1 }
0x1f62   : > { %6095 = vmatprep.subr.bf16.mxu0 %v6626_v13 }
0x1f65   : > { %6097 = vmatpush3.bf16.msra.mxu0 %v6096_v26 }
0x1f66   : > { %6098 = vmatprep.subr.bf16.mxu0 %v6626_v13 }
0x1f69   : > { %6100 = vmatpush3.bf16.msra.mxu0 %v6099_v6 }
0x1f6a   : > { %6101 = vmatprep.subr.bf16.mxu0 %v6626_v13 }
0x1f6d   : > { %6103 = vmatpush3.bf16.msra.mxu0 %v6102_v37 }
0x1f6e   : > { %6104 = vmatprep.subr.bf16.mxu0 %v6626_v13 }
0x1f71   : > { %6106 = vmatpush3.bf16.msra.mxu0 %v6105_v15  ;;  %v5290_v15 = vld [vmem:[%s8065_s27] ss:$0 sm:$0xff] }
0x1f72   : > { %6107 = vmatprep.subr.bf16.mxu0 %v6626_v13  ;;  %v5187_v13 = vld [vmem:[%s1128_s18] ss:$0 sm:$0xff]  ;;  %s8062_s18 = scalar_lea.vmem [#allocation8], %s8056_s5 }
0x1f73   : > { %v1596_v25 = vmul.f32 %v5187_v13, %v1586_v23  ;;  %v5284_v31 = vld [vmem:[%s8062_s18] ss:$0 sm:$0xff]  ;;  %v1597_v44 = vmul.f32 %v5187_v13, %v1587_v34  ;;  %v1598_v7 = vmul.f32 %v5187_v13, %v1588_v4 }
0x1f75   : > { %v1606_v39 = vadd.f32 %v5188_v28, %v1596_v25  ;;  %v1607_v16 = vadd.f32 %v5188_v28, %v1597_v44  ;;  %v1608_v40 = vadd.f32 %v5188_v28, %v1598_v7  ;;  %6109 = vmatpush3.bf16.msra.mxu0 %v6108_v20 }
0x202b   : > { %v4608_v41 = vpop.f32.mrb[40].mxu0 }
0x202c   : > { %v4609_v59 = vadd.f32 %v5279_v29, %v4608_v41  ;;  %v5803_v24 = vpop.f32.mrb[41].mxu0 }
0x202e   : > { %v4622_v35 = vadd.f32 %v6387_v19, %v4609_v59 }
0x202f   : > { %v4613_v42 = vpop.f32.mrb[42].mxu0 }
0x2030   : > { %v4632_v58 = vmul.f32 %v5283_v27, %v4622_v35  ;;  %v4614_v0 = vadd.f32 %v5279_v29, %v4613_v42  ;;  %v5806_v57 = vpop.f32.mrb[43].mxu0 }
0x2032   : > { %v4642_v21 = vadd.f32 %v5284_v31, %v4632_v58  ;;  %v4623_v11 = vadd.f32 %v6388_v46, %v4614_v0 }
0x2033   : > { %v4618_v43 = vpop.f32.mrb[44].mxu0 }
0x2034   : > { %v4645_v55 = vadd.f32 %v4642_v21, %v1606_v39  ;;  %v4633_v47 = vmul.f32 %v5283_v27, %v4623_v11  ;;  %v4619_v63 = vadd.f32 %v5279_v29, %v4618_v43  ;;  %v5809_v45 = vpop.f32.mrb[45].mxu0 }
0x2036   : > { %v4643_v48 = vadd.f32 %v5284_v31, %v4633_v47  ;;  %v4624_v50 = vadd.f32 %v6389_v33, %v4619_v63  ;;  %5827 = vmatmul.mubr.msk.f32.vlgmr.msra.gmra.mrb[56].mxu1 %vm1389_vm4, %v4645_v55 }
0x2037   : > { %5829 = vmatprep.mubr.msk.f32.mxu1 %vm6627_vm2, %v6628_v14 }
0x2038   : > { %v4634_v51 = vmul.f32 %v5283_v27, %v4624_v50  ;;  %v4646_v52 = vadd.f32 %v4643_v48, %v1607_v16 }
0x203a   : > { %v4644_v53 = vadd.f32 %v5284_v31, %v4634_v51  ;;  %5830 = vmatmul.mubr.msk.f32.gmra.mrb[58].mxu1 %vm1389_vm4, %v4646_v52 }
0x203b   : > { %5832 = vmatprep.mubr.msk.f32.mxu1 %vm6627_vm2, %v6628_v14 }
0x203c   : > { %v4647_v60 = vadd.f32 %v4644_v53, %v1608_v40 }
0x203e   : > { %5833 = vmatmul.mubr.msk.f32.gmra.mrb[60].mxu1 %vm1389_vm4, %v4647_v60 }
0x2109   : > { %v4738_v54 = vpop.f32.mrb[56].mxu1 }
0x210a   : > { %v4739_v36 = vadd.f32 %v5285_v10, %v4738_v54  ;;  %v5828_v56 = vpop.f32.mrb[57].mxu1 }
0x210c   : > { %v4752_v5 = vmax.f32 %v4739_v36, 0.0 }
0x210d   : > { %v4743_v1 = vpop.f32.mrb[58].mxu1 }
0x210e   : > { %v4744_v30 = vadd.f32 %v5285_v10, %v4743_v1  ;;  %v5831_v2 = vpop.f32.mrb[59].mxu1  ;;  %5868 = vmatmul.mubr.f32.vlgmr.msra.gmra.mrb[46].mxu0 %v4752_v5 }
0x210f   : > { %5870 = vmatprep.mubr.msk.f32.mxu0 %vm6627_vm2, %v6628_v14 }
0x2110   : > { %v4753_v26 = vmax.f32 %v4744_v30, 0.0 }
0x2111   : > { %v4748_v32 = vpop.f32.mrb[60].mxu1 }
0x2112   : > { %v4749_v38 = vadd.f32 %v5285_v10, %v4748_v32  ;;  %v5834_v6 = vpop.f32.mrb[61].mxu1  ;;  %5871 = vmatmul.mubr.f32.gmra.mrb[48].mxu0 %v4753_v26 }
0x2113   : > { %5873 = vmatprep.mubr.msk.f32.mxu0 %vm6627_vm2, %v6628_v14 }
0x2114   : > { %v4754_v8 = vmax.f32 %v4749_v38, 0.0 }
0x2116   : > { %5874 = vmatmul.mubr.f32.gmra.mrb[50].mxu0 %v4754_v8 }
0x21e1   : > { %v4844_v37 = vpop.f32.mrb[46].mxu0 }
0x21e2   : > { %v4845_v12 = vadd.f32 %v5289_v9, %v4844_v37  ;;  %v5869_v3 = vpop.f32.mrb[47].mxu0 }
0x21e4   : > { %v4858_v17 = vadd.f32 %v4845_v12, %v4645_v55 }
0x21e5   : > { %v4849_v19 = vpop.f32.mrb[48].mxu0 }
0x21e6   : > { %v4868_v23 = vmul.f32 %v5290_v15, %v4858_v17  ;;  %v4850_v29 = vadd.f32 %v5289_v9, %v4849_v19  ;;  %v5872_v13 = vpop.f32.mrb[49].mxu0 }
0x21e8   : > { %v4878_v14 = vadd.f32 %v5291_v18, %v4868_v23  ;;  %v4859_v49 = vadd.f32 %v4850_v29, %v4646_v52 }
0x21e9   : > { %v4854_v41 = vpop.f32.mrb[50].mxu0 }
0x21ea   : > { %4881 = vst.msk [vmem:[%s8041_s4] sm:$0xff] %vm1389_vm4, %v4878_v14  ;;  %v4869_v59 = vmul.f32 %v5290_v15, %v4859_v49  ;;  %v4855_v24 = vadd.f32 %v5289_v9, %v4854_v41  ;;  %v5875_v25 = vpop.f32.mrb[51].mxu0 }
0x21ec   : > { %v4879_v27 = vadd.f32 %v5291_v18, %v4869_v59  ;;  %v4860_v28 = vadd.f32 %v4855_v24, %v4647_v60 }
0x21ee   : > { %4882 = vst.msk [vmem:[%s8041_s4 + $0x8] sm:$0xff] %vm1389_vm4, %v4879_v27  ;;  %v4870_v46 = vmul.f32 %v5290_v15, %v4860_v28 }
0x21f0   : > { %v4880_v34 = vadd.f32 %v5291_v18, %v4870_v46 }
0x21f2   : > { %4883 = vst.msk [vmem:[%s8041_s4 + $0x10] sm:$0xff] %vm1389_vm4, %v4880_v34 }
0x21f3 PF: > { %s8067_s30 = sld [smem:[#allocation19_spill]]  ;;  %s8068_s29 = sld [smem:[#allocation17_spill]] }
0x21f4   : > { %s8069_s2 = sld [smem:[#allocation18_spill]]  ;;  %s8070_s6 = sld [smem:[#allocation20_spill]] }
0x21f9   : > { %p44_p1 = scmp.ge.s32.totalorder %s8067_s30, 12  }
0x21fb   :  { %46 = sbr.rel (!%p44_p1) target bundleno = 35 (0x23), region = 257 }
0x2202   :  { %4895 = vsyncpa [#allocation4], 1 }
0x2203   :  { %4897 = vsyncpa [#allocation4 + $0x1], 1 }
0x2204   :  { %4898 = vsyncpa [#allocation6], 1 }
0x2205   :  { %4900 = vsyncpa [#allocation6 + $0x1], 1 }
0x2206   :  { %4901 = vsyncpa [#allocation9], 1 }
0x2207   :  { %4903 = vsyncpa [#allocation9 + $0x1], 1 }
0x2208   :  { %4904 = vsyncpa [#allocation12], 1 }
0x2209   :  { %4906 = vsyncpa [#allocation12 + $0x1], 1 }

</bundles_post_ra>
